<compile_context>
chip_gen: v6e
topology: v6e:2x2x1
jax: 0.10.0
libtpu: 0.0.40
codegen_flags: <defaults>
</compile_context>

<pallas_src>
import functools

import jax
import jax.numpy as jnp
from jax import lax
from jax.experimental import pallas as pl
from jax.experimental.pallas import tpu as pltpu

LANE = 128


def _round_up(x, m):
    return -(-x // m) * m


# ----------------------------- Pallas kernels ------------------------------

def _conv_stats_kernel(x_ref, w_ref, y_ref, su_ref, sq_ref, *, ks, s, Ho, Wo):
    """Conv as ks*ks shifted MXU matmuls + fused per-image BN partial stats.

    x_ref : (s*s, 1, Hpp, Wpp, Cin) bf16  stride-phase planes of one padded image
    w_ref : (ks*ks, Cin, TC)        bf16  per-tap weight matrices (one Cout tile)
    y_ref : (Ho*Wo, TC)             f32   conv output rows for this image
    su_ref: (1, 1, TC)              f32   per-image column sum of y
    sq_ref: (1, 1, TC)              f32   per-image column sum of y*y
    """
    cin = x_ref.shape[-1]
    tc = w_ref.shape[-1]
    acc = jnp.zeros((Ho * Wo, tc), jnp.float32)
    for dh in range(ks):
        for dw in range(ks):
            win = x_ref[(dh % s) * s + (dw % s), 0,
                        dh // s: dh // s + Ho,
                        dw // s: dw // s + Wo, :]
            acc = acc + jnp.dot(win.reshape(Ho * Wo, cin), w_ref[dh * ks + dw],
                                preferred_element_type=jnp.float32)
    y_ref[...] = acc
    su_ref[0] = jnp.sum(acc, axis=0, keepdims=True)
    sq_ref[0] = jnp.sum(acc * acc, axis=0, keepdims=True)


def _bn_relu_kernel(y_ref, sc_ref, sh_ref, o_ref):
    # relu(y * scale + shift); emits bf16 (only consumed as the next conv's MXU operand)
    o_ref[...] = jnp.maximum(y_ref[...] * sc_ref[...] + sh_ref[...], 0.0).astype(o_ref.dtype)


def _bn_idconv_add_relu_kernel(y_ref, xid_ref, wid_ref, bid_ref, sc_ref, sh_ref, o_ref):
    # relu(bn2(y2) + (xid @ Wid + bid));  ni == nf uses an identity Wid
    idp = jnp.dot(xid_ref[...], wid_ref[...], preferred_element_type=jnp.float32) + bid_ref[...]
    o_ref[...] = jnp.maximum(y_ref[...] * sc_ref[...] + sh_ref[...] + idp, 0.0)


# --------------------------- pallas_call wrappers ---------------------------

def _conv_bn_stats(x_phases, w_taps, ks, stride, ho, wo):
    ss, n, hpp, wpp, cin = x_phases.shape
    kk, _, cp = w_taps.shape
    tc = min(cp, LANE)
    nct = cp // tc
    m = n * ho * wo
    kern = functools.partial(_conv_stats_kernel, ks=ks, s=stride, Ho=ho, Wo=wo)
    return pl.pallas_call(
        kern,
        out_shape=(
            jax.ShapeDtypeStruct((m, cp), jnp.float32),
            jax.ShapeDtypeStruct((n, 1, cp), jnp.float32),
            jax.ShapeDtypeStruct((n, 1, cp), jnp.float32),
        ),
        grid=(n, nct),
        in_specs=[
            pl.BlockSpec((ss, 1, hpp, wpp, cin), lambda i, j: (0, i, 0, 0, 0)),
            pl.BlockSpec((kk, cin, tc), lambda i, j: (0, 0, j)),
        ],
        out_specs=(
            pl.BlockSpec((ho * wo, tc), lambda i, j: (i, j)),
            pl.BlockSpec((1, 1, tc), lambda i, j: (i, 0, j)),
            pl.BlockSpec((1, 1, tc), lambda i, j: (i, 0, j)),
        ),
        compiler_params=pltpu.CompilerParams(
            dimension_semantics=("parallel", "parallel")),
    )(x_phases, w_taps)


def _bn_relu(y, scale, shift, n, unit):
    m, cp = y.shape
    tc = min(cp, LANE)
    nct = cp // tc
    return pl.pallas_call(
        _bn_relu_kernel,
        out_shape=jax.ShapeDtypeStruct((m, cp), jnp.bfloat16),
        grid=(n, nct),
        in_specs=[
            pl.BlockSpec((unit, tc), lambda i, j: (i, j)),
            pl.BlockSpec((1, tc), lambda i, j: (0, j)),
            pl.BlockSpec((1, tc), lambda i, j: (0, j)),
        ],
        out_specs=pl.BlockSpec((unit, tc), lambda i, j: (i, j)),
        compiler_params=pltpu.CompilerParams(
            dimension_semantics=("parallel", "parallel")),
    )(y, scale, shift)


def _bn_idconv_add_relu(y, xid, wid, bid, scale, shift, n, unit):
    m, cp = y.shape
    cid = xid.shape[1]
    tc = min(cp, LANE)
    nct = cp // tc
    return pl.pallas_call(
        _bn_idconv_add_relu_kernel,
        out_shape=jax.ShapeDtypeStruct((m, cp), jnp.float32),
        grid=(n, nct),
        in_specs=[
            pl.BlockSpec((unit, tc), lambda i, j: (i, j)),      # y2
            pl.BlockSpec((unit, cid), lambda i, j: (i, 0)),     # pooled skip input
            pl.BlockSpec((cid, tc), lambda i, j: (0, j)),       # 1x1 weight (or eye)
            pl.BlockSpec((1, tc), lambda i, j: (0, j)),         # idconv bias
            pl.BlockSpec((1, tc), lambda i, j: (0, j)),         # bn2 scale
            pl.BlockSpec((1, tc), lambda i, j: (0, j)),         # bn2 shift
        ],
        out_specs=pl.BlockSpec((unit, tc), lambda i, j: (i, j)),
        compiler_params=pltpu.CompilerParams(
            dimension_semantics=("parallel", "parallel")),
    )(y, xid, wid, bid, scale, shift)


# ------------------------------ JAX glue ------------------------------------

def _phase_decompose(x_nhwc, ks, stride, pad):
    """Zero-pad and split into stride x stride phase planes so the conv kernel only needs
    static, unstrided slices.  Returns (s*s, N, Hpp, Wpp, C) and the conv output size."""
    n, h, w, c = x_nhwc.shape
    s = stride
    ho = (h + 2 * pad - ks) // s + 1
    wo = (w + 2 * pad - ks) // s + 1
    hpp = _round_up(h + 2 * pad, s) // s
    wpp = _round_up(w + 2 * pad, s) // s
    xp = jnp.pad(x_nhwc, ((0, 0), (pad, s * hpp - h - pad), (pad, s * wpp - w - pad), (0, 0)))
    ph = xp.reshape(n, hpp, s, wpp, s, c).transpose(2, 4, 0, 1, 3, 5)
    return ph.reshape(s * s, n, hpp, wpp, c), ho, wo


def _w_taps(w_oihw, cin_p, cout_p):
    # (O, I, kh, kw) -> (kh*kw, Ipad, Opad) bf16, matching the (dh, dw) tap order in-kernel
    o, i, kh, kw = w_oihw.shape
    wt = jnp.transpose(w_oihw, (2, 3, 1, 0)).reshape(kh * kw, i, o)
    wt = jnp.pad(wt, ((0, 0), (0, cin_p - i), (0, cout_p - o)))
    return wt.astype(jnp.bfloat16)


def _pad_last(v, target):
    return jnp.pad(v, (0, target - v.shape[-1]))


def _bn_scale_shift(su, sq, gamma_p, beta_p, count, eps):
    # training-mode batch stats from the fused per-image partial sums (f32 accumulation)
    mean = jnp.sum(su, axis=(0, 1)) / count
    ex2 = jnp.sum(sq, axis=(0, 1)) / count
    var = jnp.maximum(ex2 - mean * mean, 0.0)
    scale = gamma_p / jnp.sqrt(var + eps)
    shift = beta_p - mean * scale
    return scale.reshape(1, -1), shift.reshape(1, -1)


def avgpool2_ceil(x_nhwc):
    """AvgPool2d(2, stride=2, ceil_mode=True), padding=0 -> divisor = #valid elements."""
    n, h, w, c = x_nhwc.shape
    ho, wo = -(-h // 2), -(-w // 2)
    xp = jnp.pad(x_nhwc, ((0, 0), (0, 2 * ho - h), (0, 2 * wo - w), (0, 0)))
    ssum = xp.reshape(n, ho, 2, wo, 2, c).sum(axis=(2, 4))
    ch = jnp.minimum(jnp.arange(ho) * 2 + 2, h) - jnp.arange(ho) * 2
    cw = jnp.minimum(jnp.arange(wo) * 2 + 2, w) - jnp.arange(wo) * 2
    cnt = (ch[:, None] * cw[None, :]).astype(x_nhwc.dtype)
    return ssum / cnt[None, :, :, None]


# ----------------------------- ResBlock forward ------------------------------

@functools.partial(jax.jit, static_argnames=("stride", "ks"))
def resblock_pallas(x_nchw, params, stride=1, ks=3, eps=1e-5):
    x = jnp.transpose(x_nchw, (0, 2, 3, 1)).astype(jnp.float32)  # NHWC
    n, h, w, ni = x.shape
    nf = params["w1"].shape[0]
    pad = ks // 2
    cp = _round_up(nf, LANE)  # lane-dense padded channel count

    # ---- conv1 (stride 1) + fused BN1 batch stats (conv bias dropped: cancels in BN) ----
    xph, ho1, wo1 = _phase_decompose(x.astype(jnp.bfloat16), ks, 1, pad)
    y1, su1, sq1 = _conv_bn_stats(xph, _w_taps(params["w1"], ni, cp), ks, 1, ho1, wo1)
    s1, sh1 = _bn_scale_shift(su1, sq1, _pad_last(params["g1"], cp),
                              _pad_last(params["be1"], cp), n * ho1 * wo1, eps)
    hmid = _bn_relu(y1, s1, sh1, n, ho1 * wo1)  # (n*h*w, cp) bf16

    # ---- conv2 (stride s) + fused BN2 batch stats ----
    hph, ho2, wo2 = _phase_decompose(hmid.reshape(n, ho1, wo1, cp), ks, stride, pad)
    y2, su2, sq2 = _conv_bn_stats(hph, _w_taps(params["w2"], cp, cp), ks, stride, ho2, wo2)
    s2, sh2 = _bn_scale_shift(su2, sq2, _pad_last(params["g2"], cp),
                              _pad_last(params["be2"], cp), n * ho2 * wo2, eps)

    # ---- identity path: avgpool in JAX (commutes with the 1x1 conv), conv fused below ----
    xid = avgpool2_ceil(x) if stride != 1 else x
    xid = xid.reshape(n * ho2 * wo2, ni).astype(jnp.bfloat16)
    if "wid" in params:
        wid = jnp.pad(params["wid"][:, :, 0, 0].T, ((0, 0), (0, cp - nf))).astype(jnp.bfloat16)
        bid = _pad_last(params["bid"], cp).reshape(1, cp).astype(jnp.float32)
    else:
        wid = jnp.eye(ni, cp, dtype=jnp.bfloat16)  # identity skip as a (cheap) matmul
        bid = jnp.zeros((1, cp), jnp.float32)

    out = _bn_idconv_add_relu(y2, xid, wid, bid, s2, sh2, n, ho2 * wo2)
    out = out[:, :nf].reshape(n, ho2, wo2, nf)
    return jnp.transpose(out, (0, 3, 1, 2))  # back to NCHW


# ----------------------------- pure-JAX reference ----------------------------

def resblock_ref(x_nchw, params, stride=1, ks=3, eps=1e-5):
    pad = ks // 2

    def conv(x, wgt, b, s, p):
        y = lax.conv_general_dilated(
            x, wgt, (s, s), [(p, p), (p, p)],
            dimension_numbers=("NCHW", "OIHW", "NCHW"))
        return y + b[None, :, None, None]

    def bn(x, g, be):
        m = x.mean(axis=(0, 2, 3), keepdims=True)
        v = jnp.mean((x - m) ** 2, axis=(0, 2, 3), keepdims=True)
        return (x - m) / jnp.sqrt(v + eps) * g[None, :, None, None] + be[None, :, None, None]

    h = conv(x_nchw, params["w1"], params["b1"], 1, pad)
    h = jnp.maximum(bn(h, params["g1"], params["be1"]), 0.0)
    h = conv(h, params["w2"], params["b2"], stride, pad)
    h = bn(h, params["g2"], params["be2"])

    xid = x_nchw
    if "wid" in params:
        xid = conv(xid, params["wid"], params["bid"], 1, 0)
    if stride != 1:
        xid = jnp.transpose(
            avgpool2_ceil(jnp.transpose(xid, (0, 2, 3, 1))), (0, 3, 1, 2))
    return jnp.maximum(h + xid, 0.0)


# ----------------------------------- main ------------------------------------

def make_params(key, ni, nf, ks):
    ks_ = jax.random.split(key, 8)
    p = {
        "w1": 0.1 * jax.random.normal(ks_[0], (nf, ni, ks, ks), jnp.float32),
        "b1": 0.1 * jax.random.normal(ks_[1], (nf,), jnp.float32),
        "g1": 1.0 + 0.1 * jax.random.normal(ks_[2], (nf,), jnp.float32),
        "be1": 0.1 * jax.random.normal(ks_[3], (nf,), jnp.float32),
        "w2": 0.1 * jax.random.normal(ks_[4], (nf, nf, ks, ks), jnp.float32),
        "b2": 0.1 * jax.random.normal(ks_[5], (nf,), jnp.float32),
        "g2": 1.0 + 0.1 * jax.random.normal(ks_[6], (nf,), jnp.float32),
        "be2": 0.1 * jax.random.normal(ks_[7], (nf,), jnp.float32),
    }
    if ni != nf:
        kid = jax.random.split(ks_[0], 2)
        p["wid"] = 0.1 * jax.random.normal(kid[0], (nf, ni, 1, 1), jnp.float32)
        p["bid"] = 0.1 * jax.random.normal(kid[1], (nf,), jnp.float32)
    return p


if __name__ == "__main__":
    key = jax.random.PRNGKey(0)
    k_x, k_p1, k_p2 = jax.random.split(key, 3)

    # Config A: channel change + stride 2 (exercises 1x1 idconv + ceil-mode avgpool skip)
    n, ni, nf, h, w, stride, ks = 2, 4, 8, 16, 16, 2, 3
    x = jax.random.normal(k_x, (n, ni, h, w), jnp.float32)
    params = make_params(k_p1, ni, nf, ks)
    out = jax.block_until_ready(resblock_pallas(x, params, stride=stride, ks=ks))
    ref = resblock_ref(x, params, stride=stride, ks=ks)
    assert out.shape == (n, nf, -(-h // 2), -(-w // 2)), out.shape
    err = float(jnp.abs(out - ref).max())
    assert jnp.allclose(out, ref, rtol=3e-2, atol=3e-2), err  # bf16 MXU operands, f32 accum

    # Config B: ni == nf, stride 1 (Identity skip path)
    ni2 = nf2 = 8
    x2 = jax.random.normal(k_x, (n, ni2, h, w), jnp.float32)
    params2 = make_params(k_p2, ni2, nf2, ks)
    out2 = jax.block_until_ready(resblock_pallas(x2, params2, stride=1, ks=ks))
    ref2 = resblock_ref(x2, params2, stride=1, ks=ks)
    assert out2.shape == (n, nf2, h, w)
    err2 = float(jnp.abs(out2 - ref2).max())
    assert jnp.allclose(out2, ref2, rtol=3e-2, atol=3e-2), err2

    print("KERNEL_OK")
</pallas_src>

<mosaic_0001>
module attributes {stable_mosaic.version = 11 : i64} {
  func.func @_bn_relu_kernel(%arg0: i32, %arg1: i32, %arg2: memref<256x128xf32, #tpu.memory_space<vmem>>, %arg3: memref<1x128xf32, #tpu.memory_space<vmem>>, %arg4: memref<1x128xf32, #tpu.memory_space<vmem>>, %arg5: memref<256x128xbf16, #tpu.memory_space<vmem>>) attributes {dimension_semantics = [#tpu.dimension_semantics<parallel>, #tpu.dimension_semantics<parallel>], iteration_bounds = array<i64: 2, 1>, scalar_prefetch = 0 : i64, scratch_operands = 0 : i64, tpu.core_type = #tpu.core_type<tc>, window_params = [{transform_indices = @transform_0, window_bounds = array<i64: 256, 128>}, {transform_indices = @transform_1, window_bounds = array<i64: 1, 128>}, {transform_indices = @transform_2, window_bounds = array<i64: 1, 128>}, {transform_indices = @transform_3, window_bounds = array<i64: 256, 128>}]} {
    %c0 = arith.constant 0 : index
    %c0_0 = arith.constant 0 : index
    %0 = vector.load %arg2[%c0, %c0_0] : memref<256x128xf32, #tpu.memory_space<vmem>>, vector<256x128xf32>
    %c0_1 = arith.constant 0 : index
    %c0_2 = arith.constant 0 : index
    %1 = vector.load %arg3[%c0_1, %c0_2] : memref<1x128xf32, #tpu.memory_space<vmem>>, vector<1x128xf32>
    %2 = vector.broadcast %1 : vector<1x128xf32> to vector<256x128xf32>
    %3 = arith.mulf %0, %2 : vector<256x128xf32>
    %c0_3 = arith.constant 0 : index
    %c0_4 = arith.constant 0 : index
    %4 = vector.load %arg4[%c0_3, %c0_4] : memref<1x128xf32, #tpu.memory_space<vmem>>, vector<1x128xf32>
    %5 = vector.broadcast %4 : vector<1x128xf32> to vector<256x128xf32>
    %6 = arith.addf %3, %5 : vector<256x128xf32>
    %cst = arith.constant 0.000000e+00 : f32
    %7 = vector.broadcast %cst : f32 to vector<256x128xf32>
    %8 = arith.maximumf %6, %7 : vector<256x128xf32>
    %9 = arith.truncf %8 : vector<256x128xf32> to vector<256x128xbf16>
    %c0_5 = arith.constant 0 : index
    %c0_6 = arith.constant 0 : index
    %10 = vector.load %arg5[%c0_5, %c0_6] : memref<256x128xbf16, #tpu.memory_space<vmem>>, vector<256x128xbf16>
    tpu.vector_store %arg5[%c0_5, %c0_6], %9 {strides = array<i32>} : memref<256x128xbf16, #tpu.memory_space<vmem>>, vector<256x128xbf16>,
    return
  }
  func.func @transform_0(%arg0: i32, %arg1: i32) -> (i32, i32) {
    %c0_i32 = arith.constant 0 : i32
    return %arg0, %arg1 : i32, i32
  }
  func.func @transform_1(%arg0: i32, %arg1: i32) -> (i32, i32) {
    %c0_i32 = arith.constant 0 : i32
    %c0_i32_0 = arith.constant 0 : i32
    return %c0_i32, %arg1 : i32, i32
  }
  func.func @transform_2(%arg0: i32, %arg1: i32) -> (i32, i32) {
    %c0_i32 = arith.constant 0 : i32
    %c0_i32_0 = arith.constant 0 : i32
    return %c0_i32, %arg1 : i32, i32
  }
  func.func @transform_3(%arg0: i32, %arg1: i32) -> (i32, i32) {
    %c0_i32 = arith.constant 0 : i32
    return %arg0, %arg1 : i32, i32
  }
}

module attributes {stable_mosaic.version = 11 : i64} {
  func.func @_conv_stats_kernel(%arg0: i32, %arg1: i32, %arg2: memref<1x1x18x18x4xbf16, #tpu.memory_space<vmem>>, %arg3: memref<9x4x128xbf16, #tpu.memory_space<vmem>>, %arg4: memref<256x128xf32, #tpu.memory_space<vmem>>, %arg5: memref<1x1x128xf32, #tpu.memory_space<vmem>>, %arg6: memref<1x1x128xf32, #tpu.memory_space<vmem>>) attributes {dimension_semantics = [#tpu.dimension_semantics<parallel>, #tpu.dimension_semantics<parallel>], iteration_bounds = array<i64: 2, 1>, scalar_prefetch = 0 : i64, scratch_operands = 0 : i64, tpu.core_type = #tpu.core_type<tc>, window_params = [{transform_indices = @transform_0, window_bounds = array<i64: 1, 1, 18, 18, 4>}, {transform_indices = @transform_1, window_bounds = array<i64: 9, 4, 128>}, {transform_indices = @transform_2, window_bounds = array<i64: 256, 128>}, {transform_indices = @transform_3, window_bounds = array<i64: 1, 1, 128>}, {transform_indices = @transform_4, window_bounds = array<i64: 1, 1, 128>}]} {
    %cst = arith.constant 0.000000e+00 : f32
    %0 = vector.broadcast %cst : f32 to vector<256x128xf32>
    %c0 = arith.constant 0 : index
    %c0_0 = arith.constant 0 : index
    %c0_1 = arith.constant 0 : index
    %c0_2 = arith.constant 0 : index
    %c0_3 = arith.constant 0 : index
    %1 = vector.load %arg2[%c0, %c0_0, %c0_1, %c0_2, %c0_3] : memref<1x1x18x18x4xbf16, #tpu.memory_space<vmem>>, vector<1x1x16x16x4xbf16>
    %2 = vector.shape_cast %1 : vector<1x1x16x16x4xbf16> to vector<16x16x4xbf16>
    %3 = vector.shape_cast %2 : vector<16x16x4xbf16> to vector<256x4xbf16>
    %c0_4 = arith.constant 0 : index
    %c0_5 = arith.constant 0 : index
    %c0_6 = arith.constant 0 : index
    %4 = vector.load %arg3[%c0_4, %c0_5, %c0_6] : memref<9x4x128xbf16, #tpu.memory_space<vmem>>, vector<1x4x128xbf16>
    %5 = vector.shape_cast %4 : vector<1x4x128xbf16> to vector<4x128xbf16>
    %cst_7 = arith.constant dense<0.000000e+00> : vector<256x128xf32>
    %6 = tpu.matmul %3, %5, %cst_7 {dimension_numbers = #tpu.dot_dimension_numbers<[1], [0], [0], [1], [0, 0, 1, 1], [], []>} : vector<256x4xbf16>, vector<4x128xbf16>, vector<256x128xf32> -> vector<256x128xf32>
    %7 = arith.addf %0, %6 : vector<256x128xf32>
    %c0_8 = arith.constant 0 : index
    %c0_9 = arith.constant 0 : index
    %c0_10 = arith.constant 0 : index
    %c1 = arith.constant 1 : index
    %c0_11 = arith.constant 0 : index
    %8 = vector.load %arg2[%c0_8, %c0_9, %c0_10, %c1, %c0_11] : memref<1x1x18x18x4xbf16, #tpu.memory_space<vmem>>, vector<1x1x16x16x4xbf16>
    %9 = vector.shape_cast %8 : vector<1x1x16x16x4xbf16> to vector<16x16x4xbf16>
    %10 = vector.shape_cast %9 : vector<16x16x4xbf16> to vector<256x4xbf16>
    %c1_12 = arith.constant 1 : index
    %c0_13 = arith.constant 0 : index
    %c0_14 = arith.constant 0 : index
    %11 = vector.load %arg3[%c1_12, %c0_13, %c0_14] : memref<9x4x128xbf16, #tpu.memory_space<vmem>>, vector<1x4x128xbf16>
    %12 = vector.shape_cast %11 : vector<1x4x128xbf16> to vector<4x128xbf16>
    %cst_15 = arith.constant dense<0.000000e+00> : vector<256x128xf32>
    %13 = tpu.matmul %10, %12, %cst_15 {dimension_numbers = #tpu.dot_dimension_numbers<[1], [0], [0], [1], [0, 0, 1, 1], [], []>} : vector<256x4xbf16>, vector<4x128xbf16>, vector<256x128xf32> -> vector<256x128xf32>
    %14 = arith.addf %7, %13 : vector<256x128xf32>
    %c0_16 = arith.constant 0 : index
    %c0_17 = arith.constant 0 : index
    %c0_18 = arith.constant 0 : index
    %c2 = arith.constant 2 : index
    %c0_19 = arith.constant 0 : index
    %15 = vector.load %arg2[%c0_16, %c0_17, %c0_18, %c2, %c0_19] : memref<1x1x18x18x4xbf16, #tpu.memory_space<vmem>>, vector<1x1x16x16x4xbf16>
    %16 = vector.shape_cast %15 : vector<1x1x16x16x4xbf16> to vector<16x16x4xbf16>
    %17 = vector.shape_cast %16 : vector<16x16x4xbf16> to vector<256x4xbf16>
    %c2_20 = arith.constant 2 : index
    %c0_21 = arith.constant 0 : index
    %c0_22 = arith.constant 0 : index
    %18 = vector.load %arg3[%c2_20, %c0_21, %c0_22] : memref<9x4x128xbf16, #tpu.memory_space<vmem>>, vector<1x4x128xbf16>
    %19 = vector.shape_cast %18 : vector<1x4x128xbf16> to vector<4x128xbf16>
    %cst_23 = arith.constant dense<0.000000e+00> : vector<256x128xf32>
    %20 = tpu.matmul %17, %19, %cst_23 {dimension_numbers = #tpu.dot_dimension_numbers<[1], [0], [0], [1], [0, 0, 1, 1], [], []>} : vector<256x4xbf16>, vector<4x128xbf16>, vector<256x128xf32> -> vector<256x128xf32>
    %21 = arith.addf %14, %20 : vector<256x128xf32>
    %c0_24 = arith.constant 0 : index
    %c0_25 = arith.constant 0 : index
    %c1_26 = arith.constant 1 : index
    %c0_27 = arith.constant 0 : index
    %c0_28 = arith.constant 0 : index
    %22 = vector.load %arg2[%c0_24, %c0_25, %c1_26, %c0_27, %c0_28] : memref<1x1x18x18x4xbf16, #tpu.memory_space<vmem>>, vector<1x1x16x16x4xbf16>
    %23 = vector.shape_cast %22 : vector<1x1x16x16x4xbf16> to vector<16x16x4xbf16>
    %24 = vector.shape_cast %23 : vector<16x16x4xbf16> to vector<256x4xbf16>
    %c3 = arith.constant 3 : index
    %c0_29 = arith.constant 0 : index
    %c0_30 = arith.constant 0 : index
    %25 = vector.load %arg3[%c3, %c0_29, %c0_30] : memref<9x4x128xbf16, #tpu.memory_space<vmem>>, vector<1x4x128xbf16>
    %26 = vector.shape_cast %25 : vector<1x4x128xbf16> to vector<4x128xbf16>
    %cst_31 = arith.constant dense<0.000000e+00> : vector<256x128xf32>
    %27 = tpu.matmul %24, %26, %cst_31 {dimension_numbers = #tpu.dot_dimension_numbers<[1], [0], [0], [1], [0, 0, 1, 1], [], []>} : vector<256x4xbf16>, vector<4x128xbf16>, vector<256x128xf32> -> vector<256x128xf32>
    %28 = arith.addf %21, %27 : vector<256x128xf32>
    %c0_32 = arith.constant 0 : index
    %c0_33 = arith.constant 0 : index
    %c1_34 = arith.constant 1 : index
    %c1_35 = arith.constant 1 : index
    %c0_36 = arith.constant 0 : index
    %29 = vector.load %arg2[%c0_32, %c0_33, %c1_34, %c1_35, %c0_36] : memref<1x1x18x18x4xbf16, #tpu.memory_space<vmem>>, vector<1x1x16x16x4xbf16>
    %30 = vector.shape_cast %29 : vector<1x1x16x16x4xbf16> to vector<16x16x4xbf16>
    %31 = vector.shape_cast %30 : vector<16x16x4xbf16> to vector<256x4xbf16>
    %c4 = arith.constant 4 : index
    %c0_37 = arith.constant 0 : index
    %c0_38 = arith.constant 0 : index
    %32 = vector.load %arg3[%c4, %c0_37, %c0_38] : memref<9x4x128xbf16, #tpu.memory_space<vmem>>, vector<1x4x128xbf16>
    %33 = vector.shape_cast %32 : vector<1x4x128xbf16> to vector<4x128xbf16>
    %cst_39 = arith.constant dense<0.000000e+00> : vector<256x128xf32>
    %34 = tpu.matmul %31, %33, %cst_39 {dimension_numbers = #tpu.dot_dimension_numbers<[1], [0], [0], [1], [0, 0, 1, 1], [], []>} : vector<256x4xbf16>, vector<4x128xbf16>, vector<256x128xf32> -> vector<256x128xf32>
    %35 = arith.addf %28, %34 : vector<256x128xf32>
    %c0_40 = arith.constant 0 : index
    %c0_41 = arith.constant 0 : index
    %c1_42 = arith.constant 1 : index
    %c2_43 = arith.constant 2 : index
    %c0_44 = arith.constant 0 : index
    %36 = vector.load %arg2[%c0_40, %c0_41, %c1_42, %c2_43, %c0_44] : memref<1x1x18x18x4xbf16, #tpu.memory_space<vmem>>, vector<1x1x16x16x4xbf16>
    %37 = vector.shape_cast %36 : vector<1x1x16x16x4xbf16> to vector<16x16x4xbf16>
    %38 = vector.shape_cast %37 : vector<16x16x4xbf16> to vector<256x4xbf16>
    %c5 = arith.constant 5 : index
    %c0_45 = arith.constant 0 : index
    %c0_46 = arith.constant 0 : index
    %39 = vector.load %arg3[%c5, %c0_45, %c0_46] : memref<9x4x128xbf16, #tpu.memory_space<vmem>>, vector<1x4x128xbf16>
    %40 = vector.shape_cast %39 : vector<1x4x128xbf16> to vector<4x128xbf16>
    %cst_47 = arith.constant dense<0.000000e+00> : vector<256x128xf32>
    %41 = tpu.matmul %38, %40, %cst_47 {dimension_numbers = #tpu.dot_dimension_numbers<[1], [0], [0], [1], [0, 0, 1, 1], [], []>} : vector<256x4xbf16>, vector<4x128xbf16>, vector<256x128xf32> -> vector<256x128xf32>
    %42 = arith.addf %35, %41 : vector<256x128xf32>
    %c0_48 = arith.constant 0 : index
    %c0_49 = arith.constant 0 : index
    %c2_50 = arith.constant 2 : index
    %c0_51 = arith.constant 0 : index
    %c0_52 = arith.constant 0 : index
    %43 = vector.load %arg2[%c0_48, %c0_49, %c2_50, %c0_51, %c0_52] : memref<1x1x18x18x4xbf16, #tpu.memory_space<vmem>>, vector<1x1x16x16x4xbf16>
    %44 = vector.shape_cast %43 : vector<1x1x16x16x4xbf16> to vector<16x16x4xbf16>
    %45 = vector.shape_cast %44 : vector<16x16x4xbf16> to vector<256x4xbf16>
    %c6 = arith.constant 6 : index
    %c0_53 = arith.constant 0 : index
    %c0_54 = arith.constant 0 : index
    %46 = vector.load %arg3[%c6, %c0_53, %c0_54] : memref<9x4x128xbf16, #tpu.memory_space<vmem>>, vector<1x4x128xbf16>
    %47 = vector.shape_cast %46 : vector<1x4x128xbf16> to vector<4x128xbf16>
    %cst_55 = arith.constant dense<0.000000e+00> : vector<256x128xf32>
    %48 = tpu.matmul %45, %47, %cst_55 {dimension_numbers = #tpu.dot_dimension_numbers<[1], [0], [0], [1], [0, 0, 1, 1], [], []>} : vector<256x4xbf16>, vector<4x128xbf16>, vector<256x128xf32> -> vector<256x128xf32>
    %49 = arith.addf %42, %48 : vector<256x128xf32>
    %c0_56 = arith.constant 0 : index
    %c0_57 = arith.constant 0 : index
    %c2_58 = arith.constant 2 : index
    %c1_59 = arith.constant 1 : index
    %c0_60 = arith.constant 0 : index
    %50 = vector.load %arg2[%c0_56, %c0_57, %c2_58, %c1_59, %c0_60] : memref<1x1x18x18x4xbf16, #tpu.memory_space<vmem>>, vector<1x1x16x16x4xbf16>
    %51 = vector.shape_cast %50 : vector<1x1x16x16x4xbf16> to vector<16x16x4xbf16>
    %52 = vector.shape_cast %51 : vector<16x16x4xbf16> to vector<256x4xbf16>
    %c7 = arith.constant 7 : index
    %c0_61 = arith.constant 0 : index
    %c0_62 = arith.constant 0 : index
    %53 = vector.load %arg3[%c7, %c0_61, %c0_62] : memref<9x4x128xbf16, #tpu.memory_space<vmem>>, vector<1x4x128xbf16>
    %54 = vector.shape_cast %53 : vector<1x4x128xbf16> to vector<4x128xbf16>
    %cst_63 = arith.constant dense<0.000000e+00> : vector<256x128xf32>
    %55 = tpu.matmul %52, %54, %cst_63 {dimension_numbers = #tpu.dot_dimension_numbers<[1], [0], [0], [1], [0, 0, 1, 1], [], []>} : vector<256x4xbf16>, vector<4x128xbf16>, vector<256x128xf32> -> vector<256x128xf32>
    %56 = arith.addf %49, %55 : vector<256x128xf32>
    %c0_64 = arith.constant 0 : index
    %c0_65 = arith.constant 0 : index
    %c2_66 = arith.constant 2 : index
    %c2_67 = arith.constant 2 : index
    %c0_68 = arith.constant 0 : index
    %57 = vector.load %arg2[%c0_64, %c0_65, %c2_66, %c2_67, %c0_68] : memref<1x1x18x18x4xbf16, #tpu.memory_space<vmem>>, vector<1x1x16x16x4xbf16>
    %58 = vector.shape_cast %57 : vector<1x1x16x16x4xbf16> to vector<16x16x4xbf16>
    %59 = vector.shape_cast %58 : vector<16x16x4xbf16> to vector<256x4xbf16>
    %c8 = arith.constant 8 : index
    %c0_69 = arith.constant 0 : index
    %c0_70 = arith.constant 0 : index
    %60 = vector.load %arg3[%c8, %c0_69, %c0_70] : memref<9x4x128xbf16, #tpu.memory_space<vmem>>, vector<1x4x128xbf16>
    %61 = vector.shape_cast %60 : vector<1x4x128xbf16> to vector<4x128xbf16>
    %cst_71 = arith.constant dense<0.000000e+00> : vector<256x128xf32>
    %62 = tpu.matmul %59, %61, %cst_71 {dimension_numbers = #tpu.dot_dimension_numbers<[1], [0], [0], [1], [0, 0, 1, 1], [], []>} : vector<256x4xbf16>, vector<4x128xbf16>, vector<256x128xf32> -> vector<256x128xf32>
    %63 = arith.addf %56, %62 : vector<256x128xf32>
    %c0_72 = arith.constant 0 : index
    %c0_73 = arith.constant 0 : index
    %64 = vector.load %arg4[%c0_72, %c0_73] : memref<256x128xf32, #tpu.memory_space<vmem>>, vector<256x128xf32>
    tpu.vector_store %arg4[%c0_72, %c0_73], %63 {strides = array<i32>} : memref<256x128xf32, #tpu.memory_space<vmem>>, vector<256x128xf32>,
    %cst_74 = arith.constant dense<0.000000e+00> : vector<128xf32>
    %65 = vector.multi_reduction <add>, %63, %cst_74 [0] : vector<256x128xf32> to vector<128xf32>
    %66 = vector.shape_cast %65 : vector<128xf32> to vector<1x128xf32>
    %c0_75 = arith.constant 0 : index
    %c0_76 = arith.constant 0 : index
    %c0_77 = arith.constant 0 : index
    %67 = vector.load %arg5[%c0_75, %c0_76, %c0_77] : memref<1x1x128xf32, #tpu.memory_space<vmem>>, vector<1x1x128xf32>
    %68 = vector.shape_cast %67 : vector<1x1x128xf32> to vector<1x128xf32>
    %69 = vector.shape_cast %66 : vector<1x128xf32> to vector<1x1x128xf32>
    tpu.vector_store %arg5[%c0_75, %c0_76, %c0_77], %69 {strides = array<i32>} : memref<1x1x128xf32, #tpu.memory_space<vmem>>, vector<1x1x128xf32>,
    %70 = arith.mulf %63, %63 : vector<256x128xf32>
    %cst_78 = arith.constant dense<0.000000e+00> : vector<128xf32>
    %71 = vector.multi_reduction <add>, %70, %cst_78 [0] : vector<256x128xf32> to vector<128xf32>
    %72 = vector.shape_cast %71 : vector<128xf32> to vector<1x128xf32>
    %c0_79 = arith.constant 0 : index
    %c0_80 = arith.constant 0 : index
    %c0_81 = arith.constant 0 : index
    %73 = vector.load %arg6[%c0_79, %c0_80, %c0_81] : memref<1x1x128xf32, #tpu.memory_space<vmem>>, vector<1x1x128xf32>
    %74 = vector.shape_cast %73 : vector<1x1x128xf32> to vector<1x128xf32>
    %75 = vector.shape_cast %72 : vector<1x128xf32> to vector<1x1x128xf32>
    tpu.vector_store %arg6[%c0_79, %c0_80, %c0_81], %75 {strides = array<i32>} : memref<1x1x128xf32, #tpu.memory_space<vmem>>, vector<1x1x128xf32>,
    return
  }
  func.func @transform_0(%arg0: i32, %arg1: i32) -> (i32, i32, i32, i32, i32) {
    %c0_i32 = arith.constant 0 : i32
    %c0_i32_0 = arith.constant 0 : i32
    %c0_i32_1 = arith.constant 0 : i32
    %c0_i32_2 = arith.constant 0 : i32
    %c0_i32_3 = arith.constant 0 : i32
    return %c0_i32, %arg0, %c0_i32_0, %c0_i32_1, %c0_i32_2 : i32, i32, i32, i32, i32
  }
  func.func @transform_1(%arg0: i32, %arg1: i32) -> (i32, i32, i32) {
    %c0_i32 = arith.constant 0 : i32
    %c0_i32_0 = arith.constant 0 : i32
    %c0_i32_1 = arith.constant 0 : i32
    return %c0_i32, %c0_i32_0, %arg1 : i32, i32, i32
  }
  func.func @transform_2(%arg0: i32, %arg1: i32) -> (i32, i32) {
    %c0_i32 = arith.constant 0 : i32
    return %arg0, %arg1 : i32, i32
  }
  func.func @transform_3(%arg0: i32, %arg1: i32) -> (i32, i32, i32) {
    %c0_i32 = arith.constant 0 : i32
    %c0_i32_0 = arith.constant 0 : i32
    return %arg0, %c0_i32, %arg1 : i32, i32, i32
  }
  func.func @transform_4(%arg0: i32, %arg1: i32) -> (i32, i32, i32) {
    %c0_i32 = arith.constant 0 : i32
    %c0_i32_0 = arith.constant 0 : i32
    return %arg0, %c0_i32, %arg1 : i32, i32, i32
  }
}

module attributes {stable_mosaic.version = 11 : i64} {
  func.func @_conv_stats_kernel(%arg0: i32, %arg1: i32, %arg2: memref<4x1x9x9x128xbf16, #tpu.memory_space<vmem>>, %arg3: memref<9x128x128xbf16, #tpu.memory_space<vmem>>, %arg4: memref<64x128xf32, #tpu.memory_space<vmem>>, %arg5: memref<1x1x128xf32, #tpu.memory_space<vmem>>, %arg6: memref<1x1x128xf32, #tpu.memory_space<vmem>>) attributes {dimension_semantics = [#tpu.dimension_semantics<parallel>, #tpu.dimension_semantics<parallel>], iteration_bounds = array<i64: 2, 1>, scalar_prefetch = 0 : i64, scratch_operands = 0 : i64, tpu.core_type = #tpu.core_type<tc>, window_params = [{transform_indices = @transform_0, window_bounds = array<i64: 4, 1, 9, 9, 128>}, {transform_indices = @transform_1, window_bounds = array<i64: 9, 128, 128>}, {transform_indices = @transform_2, window_bounds = array<i64: 64, 128>}, {transform_indices = @transform_3, window_bounds = array<i64: 1, 1, 128>}, {transform_indices = @transform_4, window_bounds = array<i64: 1, 1, 128>}]} {
    %cst = arith.constant 0.000000e+00 : f32
    %0 = vector.broadcast %cst : f32 to vector<64x128xf32>
    %c0 = arith.constant 0 : index
    %c0_0 = arith.constant 0 : index
    %c0_1 = arith.constant 0 : index
    %c0_2 = arith.constant 0 : index
    %c0_3 = arith.constant 0 : index
    %1 = vector.load %arg2[%c0, %c0_0, %c0_1, %c0_2, %c0_3] : memref<4x1x9x9x128xbf16, #tpu.memory_space<vmem>>, vector<1x1x8x8x128xbf16>
    %2 = vector.shape_cast %1 : vector<1x1x8x8x128xbf16> to vector<8x8x128xbf16>
    %3 = vector.shape_cast %2 : vector<8x8x128xbf16> to vector<64x128xbf16>
    %c0_4 = arith.constant 0 : index
    %c0_5 = arith.constant 0 : index
    %c0_6 = arith.constant 0 : index
    %4 = vector.load %arg3[%c0_4, %c0_5, %c0_6] : memref<9x128x128xbf16, #tpu.memory_space<vmem>>, vector<1x128x128xbf16>
    %5 = vector.shape_cast %4 : vector<1x128x128xbf16> to vector<128x128xbf16>
    %cst_7 = arith.constant dense<0.000000e+00> : vector<64x128xf32>
    %6 = tpu.matmul %3, %5, %cst_7 {dimension_numbers = #tpu.dot_dimension_numbers<[1], [0], [0], [1], [0, 0, 1, 1], [], []>} : vector<64x128xbf16>, vector<128x128xbf16>, vector<64x128xf32> -> vector<64x128xf32>
    %7 = arith.addf %0, %6 : vector<64x128xf32>
    %c1 = arith.constant 1 : index
    %c0_8 = arith.constant 0 : index
    %c0_9 = arith.constant 0 : index
    %c0_10 = arith.constant 0 : index
    %c0_11 = arith.constant 0 : index
    %8 = vector.load %arg2[%c1, %c0_8, %c0_9, %c0_10, %c0_11] : memref<4x1x9x9x128xbf16, #tpu.memory_space<vmem>>, vector<1x1x8x8x128xbf16>
    %9 = vector.shape_cast %8 : vector<1x1x8x8x128xbf16> to vector<8x8x128xbf16>
    %10 = vector.shape_cast %9 : vector<8x8x128xbf16> to vector<64x128xbf16>
    %c1_12 = arith.constant 1 : index
    %c0_13 = arith.constant 0 : index
    %c0_14 = arith.constant 0 : index
    %11 = vector.load %arg3[%c1_12, %c0_13, %c0_14] : memref<9x128x128xbf16, #tpu.memory_space<vmem>>, vector<1x128x128xbf16>
    %12 = vector.shape_cast %11 : vector<1x128x128xbf16> to vector<128x128xbf16>
    %cst_15 = arith.constant dense<0.000000e+00> : vector<64x128xf32>
    %13 = tpu.matmul %10, %12, %cst_15 {dimension_numbers = #tpu.dot_dimension_numbers<[1], [0], [0], [1], [0, 0, 1, 1], [], []>} : vector<64x128xbf16>, vector<128x128xbf16>, vector<64x128xf32> -> vector<64x128xf32>
    %14 = arith.addf %7, %13 : vector<64x128xf32>
    %c0_16 = arith.constant 0 : index
    %c0_17 = arith.constant 0 : index
    %c0_18 = arith.constant 0 : index
    %c1_19 = arith.constant 1 : index
    %c0_20 = arith.constant 0 : index
    %15 = vector.load %arg2[%c0_16, %c0_17, %c0_18, %c1_19, %c0_20] : memref<4x1x9x9x128xbf16, #tpu.memory_space<vmem>>, vector<1x1x8x8x128xbf16>
    %16 = vector.shape_cast %15 : vector<1x1x8x8x128xbf16> to vector<8x8x128xbf16>
    %17 = vector.shape_cast %16 : vector<8x8x128xbf16> to vector<64x128xbf16>
    %c2 = arith.constant 2 : index
    %c0_21 = arith.constant 0 : index
    %c0_22 = arith.constant 0 : index
    %18 = vector.load %arg3[%c2, %c0_21, %c0_22] : memref<9x128x128xbf16, #tpu.memory_space<vmem>>, vector<1x128x128xbf16>
    %19 = vector.shape_cast %18 : vector<1x128x128xbf16> to vector<128x128xbf16>
    %cst_23 = arith.constant dense<0.000000e+00> : vector<64x128xf32>
    %20 = tpu.matmul %17, %19, %cst_23 {dimension_numbers = #tpu.dot_dimension_numbers<[1], [0], [0], [1], [0, 0, 1, 1], [], []>} : vector<64x128xbf16>, vector<128x128xbf16>, vector<64x128xf32> -> vector<64x128xf32>
    %21 = arith.addf %14, %20 : vector<64x128xf32>
    %c2_24 = arith.constant 2 : index
    %c0_25 = arith.constant 0 : index
    %c0_26 = arith.constant 0 : index
    %c0_27 = arith.constant 0 : index
    %c0_28 = arith.constant 0 : index
    %22 = vector.load %arg2[%c2_24, %c0_25, %c0_26, %c0_27, %c0_28] : memref<4x1x9x9x128xbf16, #tpu.memory_space<vmem>>, vector<1x1x8x8x128xbf16>
    %23 = vector.shape_cast %22 : vector<1x1x8x8x128xbf16> to vector<8x8x128xbf16>
    %24 = vector.shape_cast %23 : vector<8x8x128xbf16> to vector<64x128xbf16>
    %c3 = arith.constant 3 : index
    %c0_29 = arith.constant 0 : index
    %c0_30 = arith.constant 0 : index
    %25 = vector.load %arg3[%c3, %c0_29, %c0_30] : memref<9x128x128xbf16, #tpu.memory_space<vmem>>, vector<1x128x128xbf16>
    %26 = vector.shape_cast %25 : vector<1x128x128xbf16> to vector<128x128xbf16>
    %cst_31 = arith.constant dense<0.000000e+00> : vector<64x128xf32>
    %27 = tpu.matmul %24, %26, %cst_31 {dimension_numbers = #tpu.dot_dimension_numbers<[1], [0], [0], [1], [0, 0, 1, 1], [], []>} : vector<64x128xbf16>, vector<128x128xbf16>, vector<64x128xf32> -> vector<64x128xf32>
    %28 = arith.addf %21, %27 : vector<64x128xf32>
    %c3_32 = arith.constant 3 : index
    %c0_33 = arith.constant 0 : index
    %c0_34 = arith.constant 0 : index
    %c0_35 = arith.constant 0 : index
    %c0_36 = arith.constant 0 : index
    %29 = vector.load %arg2[%c3_32, %c0_33, %c0_34, %c0_35, %c0_36] : memref<4x1x9x9x128xbf16, #tpu.memory_space<vmem>>, vector<1x1x8x8x128xbf16>
    %30 = vector.shape_cast %29 : vector<1x1x8x8x128xbf16> to vector<8x8x128xbf16>
    %31 = vector.shape_cast %30 : vector<8x8x128xbf16> to vector<64x128xbf16>
    %c4 = arith.constant 4 : index
    %c0_37 = arith.constant 0 : index
    %c0_38 = arith.constant 0 : index
    %32 = vector.load %arg3[%c4, %c0_37, %c0_38] : memref<9x128x128xbf16, #tpu.memory_space<vmem>>, vector<1x128x128xbf16>
    %33 = vector.shape_cast %32 : vector<1x128x128xbf16> to vector<128x128xbf16>
    %cst_39 = arith.constant dense<0.000000e+00> : vector<64x128xf32>
    %34 = tpu.matmul %31, %33, %cst_39 {dimension_numbers = #tpu.dot_dimension_numbers<[1], [0], [0], [1], [0, 0, 1, 1], [], []>} : vector<64x128xbf16>, vector<128x128xbf16>, vector<64x128xf32> -> vector<64x128xf32>
    %35 = arith.addf %28, %34 : vector<64x128xf32>
    %c2_40 = arith.constant 2 : index
    %c0_41 = arith.constant 0 : index
    %c0_42 = arith.constant 0 : index
    %c1_43 = arith.constant 1 : index
    %c0_44 = arith.constant 0 : index
    %36 = vector.load %arg2[%c2_40, %c0_41, %c0_42, %c1_43, %c0_44] : memref<4x1x9x9x128xbf16, #tpu.memory_space<vmem>>, vector<1x1x8x8x128xbf16>
    %37 = vector.shape_cast %36 : vector<1x1x8x8x128xbf16> to vector<8x8x128xbf16>
    %38 = vector.shape_cast %37 : vector<8x8x128xbf16> to vector<64x128xbf16>
    %c5 = arith.constant 5 : index
    %c0_45 = arith.constant 0 : index
    %c0_46 = arith.constant 0 : index
    %39 = vector.load %arg3[%c5, %c0_45, %c0_46] : memref<9x128x128xbf16, #tpu.memory_space<vmem>>, vector<1x128x128xbf16>
    %40 = vector.shape_cast %39 : vector<1x128x128xbf16> to vector<128x128xbf16>
    %cst_47 = arith.constant dense<0.000000e+00> : vector<64x128xf32>
    %41 = tpu.matmul %38, %40, %cst_47 {dimension_numbers = #tpu.dot_dimension_numbers<[1], [0], [0], [1], [0, 0, 1, 1], [], []>} : vector<64x128xbf16>, vector<128x128xbf16>, vector<64x128xf32> -> vector<64x128xf32>
    %42 = arith.addf %35, %41 : vector<64x128xf32>
    %c0_48 = arith.constant 0 : index
    %c0_49 = arith.constant 0 : index
    %c1_50 = arith.constant 1 : index
    %c0_51 = arith.constant 0 : index
    %c0_52 = arith.constant 0 : index
    %43 = vector.load %arg2[%c0_48, %c0_49, %c1_50, %c0_51, %c0_52] : memref<4x1x9x9x128xbf16, #tpu.memory_space<vmem>>, vector<1x1x8x8x128xbf16>
    %44 = vector.shape_cast %43 : vector<1x1x8x8x128xbf16> to vector<8x8x128xbf16>
    %45 = vector.shape_cast %44 : vector<8x8x128xbf16> to vector<64x128xbf16>
    %c6 = arith.constant 6 : index
    %c0_53 = arith.constant 0 : index
    %c0_54 = arith.constant 0 : index
    %46 = vector.load %arg3[%c6, %c0_53, %c0_54] : memref<9x128x128xbf16, #tpu.memory_space<vmem>>, vector<1x128x128xbf16>
    %47 = vector.shape_cast %46 : vector<1x128x128xbf16> to vector<128x128xbf16>
    %cst_55 = arith.constant dense<0.000000e+00> : vector<64x128xf32>
    %48 = tpu.matmul %45, %47, %cst_55 {dimension_numbers = #tpu.dot_dimension_numbers<[1], [0], [0], [1], [0, 0, 1, 1], [], []>} : vector<64x128xbf16>, vector<128x128xbf16>, vector<64x128xf32> -> vector<64x128xf32>
    %49 = arith.addf %42, %48 : vector<64x128xf32>
    %c1_56 = arith.constant 1 : index
    %c0_57 = arith.constant 0 : index
    %c1_58 = arith.constant 1 : index
    %c0_59 = arith.constant 0 : index
    %c0_60 = arith.constant 0 : index
    %50 = vector.load %arg2[%c1_56, %c0_57, %c1_58, %c0_59, %c0_60] : memref<4x1x9x9x128xbf16, #tpu.memory_space<vmem>>, vector<1x1x8x8x128xbf16>
    %51 = vector.shape_cast %50 : vector<1x1x8x8x128xbf16> to vector<8x8x128xbf16>
    %52 = vector.shape_cast %51 : vector<8x8x128xbf16> to vector<64x128xbf16>
    %c7 = arith.constant 7 : index
    %c0_61 = arith.constant 0 : index
    %c0_62 = arith.constant 0 : index
    %53 = vector.load %arg3[%c7, %c0_61, %c0_62] : memref<9x128x128xbf16, #tpu.memory_space<vmem>>, vector<1x128x128xbf16>
    %54 = vector.shape_cast %53 : vector<1x128x128xbf16> to vector<128x128xbf16>
    %cst_63 = arith.constant dense<0.000000e+00> : vector<64x128xf32>
    %55 = tpu.matmul %52, %54, %cst_63 {dimension_numbers = #tpu.dot_dimension_numbers<[1], [0], [0], [1], [0, 0, 1, 1], [], []>} : vector<64x128xbf16>, vector<128x128xbf16>, vector<64x128xf32> -> vector<64x128xf32>
    %56 = arith.addf %49, %55 : vector<64x128xf32>
    %c0_64 = arith.constant 0 : index
    %c0_65 = arith.constant 0 : index
    %c1_66 = arith.constant 1 : index
    %c1_67 = arith.constant 1 : index
    %c0_68 = arith.constant 0 : index
    %57 = vector.load %arg2[%c0_64, %c0_65, %c1_66, %c1_67, %c0_68] : memref<4x1x9x9x128xbf16, #tpu.memory_space<vmem>>, vector<1x1x8x8x128xbf16>
    %58 = vector.shape_cast %57 : vector<1x1x8x8x128xbf16> to vector<8x8x128xbf16>
    %59 = vector.shape_cast %58 : vector<8x8x128xbf16> to vector<64x128xbf16>
    %c8 = arith.constant 8 : index
    %c0_69 = arith.constant 0 : index
    %c0_70 = arith.constant 0 : index
    %60 = vector.load %arg3[%c8, %c0_69, %c0_70] : memref<9x128x128xbf16, #tpu.memory_space<vmem>>, vector<1x128x128xbf16>
    %61 = vector.shape_cast %60 : vector<1x128x128xbf16> to vector<128x128xbf16>
    %cst_71 = arith.constant dense<0.000000e+00> : vector<64x128xf32>
    %62 = tpu.matmul %59, %61, %cst_71 {dimension_numbers = #tpu.dot_dimension_numbers<[1], [0], [0], [1], [0, 0, 1, 1], [], []>} : vector<64x128xbf16>, vector<128x128xbf16>, vector<64x128xf32> -> vector<64x128xf32>
    %63 = arith.addf %56, %62 : vector<64x128xf32>
    %c0_72 = arith.constant 0 : index
    %c0_73 = arith.constant 0 : index
    %64 = vector.load %arg4[%c0_72, %c0_73] : memref<64x128xf32, #tpu.memory_space<vmem>>, vector<64x128xf32>
    tpu.vector_store %arg4[%c0_72, %c0_73], %63 {strides = array<i32>} : memref<64x128xf32, #tpu.memory_space<vmem>>, vector<64x128xf32>,
    %cst_74 = arith.constant dense<0.000000e+00> : vector<128xf32>
    %65 = vector.multi_reduction <add>, %63, %cst_74 [0] : vector<64x128xf32> to vector<128xf32>
    %66 = vector.shape_cast %65 : vector<128xf32> to vector<1x128xf32>
    %c0_75 = arith.constant 0 : index
    %c0_76 = arith.constant 0 : index
    %c0_77 = arith.constant 0 : index
    %67 = vector.load %arg5[%c0_75, %c0_76, %c0_77] : memref<1x1x128xf32, #tpu.memory_space<vmem>>, vector<1x1x128xf32>
    %68 = vector.shape_cast %67 : vector<1x1x128xf32> to vector<1x128xf32>
    %69 = vector.shape_cast %66 : vector<1x128xf32> to vector<1x1x128xf32>
    tpu.vector_store %arg5[%c0_75, %c0_76, %c0_77], %69 {strides = array<i32>} : memref<1x1x128xf32, #tpu.memory_space<vmem>>, vector<1x1x128xf32>,
    %70 = arith.mulf %63, %63 : vector<64x128xf32>
    %cst_78 = arith.constant dense<0.000000e+00> : vector<128xf32>
    %71 = vector.multi_reduction <add>, %70, %cst_78 [0] : vector<64x128xf32> to vector<128xf32>
    %72 = vector.shape_cast %71 : vector<128xf32> to vector<1x128xf32>
    %c0_79 = arith.constant 0 : index
    %c0_80 = arith.constant 0 : index
    %c0_81 = arith.constant 0 : index
    %73 = vector.load %arg6[%c0_79, %c0_80, %c0_81] : memref<1x1x128xf32, #tpu.memory_space<vmem>>, vector<1x1x128xf32>
    %74 = vector.shape_cast %73 : vector<1x1x128xf32> to vector<1x128xf32>
    %75 = vector.shape_cast %72 : vector<1x128xf32> to vector<1x1x128xf32>
    tpu.vector_store %arg6[%c0_79, %c0_80, %c0_81], %75 {strides = array<i32>} : memref<1x1x128xf32, #tpu.memory_space<vmem>>, vector<1x1x128xf32>,
    return
  }
  func.func @transform_0(%arg0: i32, %arg1: i32) -> (i32, i32, i32, i32, i32) {
    %c0_i32 = arith.constant 0 : i32
    %c0_i32_0 = arith.constant 0 : i32
    %c0_i32_1 = arith.constant 0 : i32
    %c0_i32_2 = arith.constant 0 : i32
    %c0_i32_3 = arith.constant 0 : i32
    return %c0_i32, %arg0, %c0_i32_0, %c0_i32_1, %c0_i32_2 : i32, i32, i32, i32, i32
  }
  func.func @transform_1(%arg0: i32, %arg1: i32) -> (i32, i32, i32) {
    %c0_i32 = arith.constant 0 : i32
    %c0_i32_0 = arith.constant 0 : i32
    %c0_i32_1 = arith.constant 0 : i32
    return %c0_i32, %c0_i32_0, %arg1 : i32, i32, i32
  }
  func.func @transform_2(%arg0: i32, %arg1: i32) -> (i32, i32) {
    %c0_i32 = arith.constant 0 : i32
    return %arg0, %arg1 : i32, i32
  }
  func.func @transform_3(%arg0: i32, %arg1: i32) -> (i32, i32, i32) {
    %c0_i32 = arith.constant 0 : i32
    %c0_i32_0 = arith.constant 0 : i32
    return %arg0, %c0_i32, %arg1 : i32, i32, i32
  }
  func.func @transform_4(%arg0: i32, %arg1: i32) -> (i32, i32, i32) {
    %c0_i32 = arith.constant 0 : i32
    %c0_i32_0 = arith.constant 0 : i32
    return %arg0, %c0_i32, %arg1 : i32, i32, i32
  }
}

module attributes {stable_mosaic.version = 11 : i64} {
  func.func @_bn_idconv_add_relu_kernel(%arg0: i32, %arg1: i32, %arg2: memref<64x128xf32, #tpu.memory_space<vmem>>, %arg3: memref<64x4xbf16, #tpu.memory_space<vmem>>, %arg4: memref<4x128xbf16, #tpu.memory_space<vmem>>, %arg5: memref<1x128xf32, #tpu.memory_space<vmem>>, %arg6: memref<1x128xf32, #tpu.memory_space<vmem>>, %arg7: memref<1x128xf32, #tpu.memory_space<vmem>>, %arg8: memref<64x128xf32, #tpu.memory_space<vmem>>) attributes {dimension_semantics = [#tpu.dimension_semantics<parallel>, #tpu.dimension_semantics<parallel>], iteration_bounds = array<i64: 2, 1>, scalar_prefetch = 0 : i64, scratch_operands = 0 : i64, tpu.core_type = #tpu.core_type<tc>, window_params = [{transform_indices = @transform_0, window_bounds = array<i64: 64, 128>}, {transform_indices = @transform_1, window_bounds = array<i64: 64, 4>}, {transform_indices = @transform_2, window_bounds = array<i64: 4, 128>}, {transform_indices = @transform_3, window_bounds = array<i64: 1, 128>}, {transform_indices = @transform_4, window_bounds = array<i64: 1, 128>}, {transform_indices = @transform_5, window_bounds = array<i64: 1, 128>}, {transform_indices = @transform_6, window_bounds = array<i64: 64, 128>}]} {
    %c0 = arith.constant 0 : index
    %c0_0 = arith.constant 0 : index
    %0 = vector.load %arg3[%c0, %c0_0] : memref<64x4xbf16, #tpu.memory_space<vmem>>, vector<64x4xbf16>
    %c0_1 = arith.constant 0 : index
    %c0_2 = arith.constant 0 : index
    %1 = vector.load %arg4[%c0_1, %c0_2] : memref<4x128xbf16, #tpu.memory_space<vmem>>, vector<4x128xbf16>
    %cst = arith.constant dense<0.000000e+00> : vector<64x128xf32>
    %2 = tpu.matmul %0, %1, %cst {dimension_numbers = #tpu.dot_dimension_numbers<[1], [0], [0], [1], [0, 0, 1, 1], [], []>} : vector<64x4xbf16>, vector<4x128xbf16>, vector<64x128xf32> -> vector<64x128xf32>
    %c0_3 = arith.constant 0 : index
    %c0_4 = arith.constant 0 : index
    %3 = vector.load %arg5[%c0_3, %c0_4] : memref<1x128xf32, #tpu.memory_space<vmem>>, vector<1x128xf32>
    %4 = vector.broadcast %3 : vector<1x128xf32> to vector<64x128xf32>
    %5 = arith.addf %2, %4 : vector<64x128xf32>
    %c0_5 = arith.constant 0 : index
    %c0_6 = arith.constant 0 : index
    %6 = vector.load %arg2[%c0_5, %c0_6] : memref<64x128xf32, #tpu.memory_space<vmem>>, vector<64x128xf32>
    %c0_7 = arith.constant 0 : index
    %c0_8 = arith.constant 0 : index
    %7 = vector.load %arg6[%c0_7, %c0_8] : memref<1x128xf32, #tpu.memory_space<vmem>>, vector<1x128xf32>
    %8 = vector.broadcast %7 : vector<1x128xf32> to vector<64x128xf32>
    %9 = arith.mulf %6, %8 : vector<64x128xf32>
    %c0_9 = arith.constant 0 : index
    %c0_10 = arith.constant 0 : index
    %10 = vector.load %arg7[%c0_9, %c0_10] : memref<1x128xf32, #tpu.memory_space<vmem>>, vector<1x128xf32>
    %11 = vector.broadcast %10 : vector<1x128xf32> to vector<64x128xf32>
    %12 = arith.addf %9, %11 : vector<64x128xf32>
    %13 = arith.addf %12, %5 : vector<64x128xf32>
    %cst_11 = arith.constant 0.000000e+00 : f32
    %14 = vector.broadcast %cst_11 : f32 to vector<64x128xf32>
    %15 = arith.maximumf %13, %14 : vector<64x128xf32>
    %c0_12 = arith.constant 0 : index
    %c0_13 = arith.constant 0 : index
    %16 = vector.load %arg8[%c0_12, %c0_13] : memref<64x128xf32, #tpu.memory_space<vmem>>, vector<64x128xf32>
    tpu.vector_store %arg8[%c0_12, %c0_13], %15 {strides = array<i32>} : memref<64x128xf32, #tpu.memory_space<vmem>>, vector<64x128xf32>,
    return
  }
  func.func @transform_0(%arg0: i32, %arg1: i32) -> (i32, i32) {
    %c0_i32 = arith.constant 0 : i32
    return %arg0, %arg1 : i32, i32
  }
  func.func @transform_1(%arg0: i32, %arg1: i32) -> (i32, i32) {
    %c0_i32 = arith.constant 0 : i32
    %c0_i32_0 = arith.constant 0 : i32
    return %arg0, %c0_i32 : i32, i32
  }
  func.func @transform_2(%arg0: i32, %arg1: i32) -> (i32, i32) {
    %c0_i32 = arith.constant 0 : i32
    %c0_i32_0 = arith.constant 0 : i32
    return %c0_i32, %arg1 : i32, i32
  }
  func.func @transform_3(%arg0: i32, %arg1: i32) -> (i32, i32) {
    %c0_i32 = arith.constant 0 : i32
    %c0_i32_0 = arith.constant 0 : i32
    return %c0_i32, %arg1 : i32, i32
  }
  func.func @transform_4(%arg0: i32, %arg1: i32) -> (i32, i32) {
    %c0_i32 = arith.constant 0 : i32
    %c0_i32_0 = arith.constant 0 : i32
    return %c0_i32, %arg1 : i32, i32
  }
  func.func @transform_5(%arg0: i32, %arg1: i32) -> (i32, i32) {
    %c0_i32 = arith.constant 0 : i32
    %c0_i32_0 = arith.constant 0 : i32
    return %c0_i32, %arg1 : i32, i32
  }
  func.func @transform_6(%arg0: i32, %arg1: i32) -> (i32, i32) {
    %c0_i32 = arith.constant 0 : i32
    return %arg0, %arg1 : i32, i32
  }
}

</mosaic_0001>

<bundles_post_ra>
// kernel: resblock_pallas.5
= control target key start
LH: loop header
LB: loop body
LE: loop exit
PB: predicated region body
PF: predicated region fallthrough
CT: control target
= control target key end

     0   :  { %s879_s12 = smov 0   ;;  %s881_s13 = smov 0   ;;  %s1042_s0 = inlined_call_operand.vmem [shape: f32[512,128], index: 0, kind: input, shape index: {}]   ;;  %s1043_s1 = inlined_call_operand.vmem [shape: f32[1,128], index: 1, kind: input, shape index: {}]   ;;  %s1044_s2 = inlined_call_operand.vmem [shape: f32[1,128], index: 2, kind: input, shape index: {}]   ;;  %s1045_s3 = inlined_call_operand.vmem [shape: bf16[512,128], index: 3, kind: output, shape index: {}]  }
   0x1   :  { %s883_s14 = smov 0  }
   0x2 LB: > { %s25_s15 = sadd.s32 1, %s853_s13  ;;  %p643_p0 = scmp.ge.s32.totalorder %s857_s14, 1  ;;  %s857_s14 = sphi %s883_s14, %s13_s14   ;;  %s853_s13 = sphi %s881_s13, %s1047_s13   ;;  %s849_s12 = sphi %s879_s12, %s1046_s12  }
   0x3   : > { %p27_p1 = scmp.ge.s32.totalorder %s25_s15, 2  ;;  %p173_p2 = scmp.lt.s32.totalorder %s857_s14, 3 }
   0x5   : > { %s1049_s15 = smov (%p27_p1, %s25_s15), 0  ;;  %p174_p3 = pnand %p643_p0, %p173_p2 }
   0x6   : > { %s644_s16 = sshll.u32 (!%p174_p3), %s849_s12, 5 }
   0x7   : > { %177 = sbr.rel (%p174_p3) target bundleno = 50 (0x32), region = 32  ;;  %p210_p4 = scmp.lt.s32.totalorder (!%p174_p3), %s644_s16, 63 }
   0xc   : > { %s1051_s16 = smov (!%p210_p4, %s644_s16), 63  ;;  %v903_v0 = vld [vmem:[%s1043_s1] ss:$0 sm:$0xff] }
   0xd   : > { %s645_s17 = sshll.u32 %s1051_s16, 3  ;;  %v913_v1 = vld [vmem:[%s1044_s2] ss:$0 sm:$0xff]  ;;  %s647_s25 = sshll.u32 %s1051_s16, 2 }
   0xe   : > { %s908_s22 = scalar_lea.vmem %s1042_s0, %s645_s17  ;;  %s945_s28 = scalar_lea.vmem %s1045_s3, %s647_s25 }
   0xf   : > { %v233_v2 = vld [vmem:[%s908_s22] sm:$0xff]  ;;  %v234_v3 = vld [vmem:[%s908_s22 + $0x8] sm:$0xff]  ;;  %v235_v4 = vld [vmem:[%s908_s22 + $0x10] sm:$0xff] }
  0x10   : > { %v272_v5 = vmul.f32 %v903_v0, %v233_v2  ;;  %v273_v6 = vmul.f32 %v903_v0, %v234_v3  ;;  %v236_v7 = vld [vmem:[%s908_s22 + $0x18] sm:$0xff]  ;;  %v274_v8 = vmul.f32 %v903_v0, %v235_v4  ;;  %v237_v9 = vld [vmem:[%s908_s22 + $0x20] sm:$0xff]  ;;  %v238_v10 = vld [vmem:[%s908_s22 + $0x28] sm:$0xff] }
  0x11   : > { %v275_v11 = vmul.f32 %v903_v0, %v236_v7  ;;  %v276_v12 = vmul.f32 %v903_v0, %v237_v9  ;;  %v277_v13 = vmul.f32 %v903_v0, %v238_v10  ;;  %v239_v14 = vld [vmem:[%s908_s22 + $0x30] sm:$0xff]  ;;  %v240_v15 = vld [vmem:[%s908_s22 + $0x38] sm:$0xff]  ;;  %v241_v24 = vld [vmem:[%s908_s22 + $0x40] sm:$0xff] }
  0x12   : > { %v311_v16 = vadd.f32 %v913_v1, %v272_v5  ;;  %v312_v17 = vadd.f32 %v913_v1, %v273_v6  ;;  %v313_v18 = vadd.f32 %v913_v1, %v274_v8  ;;  %v278_v19 = vmul.f32 %v903_v0, %v239_v14  ;;  %v242_v25 = vld [vmem:[%s908_s22 + $0x48] sm:$0xff]  ;;  %v243_v30 = vld [vmem:[%s908_s22 + $0x50] sm:$0xff]  ;;  %v244_v35 = vld [vmem:[%s908_s22 + $0x58] sm:$0xff] }
  0x13   : > { %v314_v20 = vadd.f32 %v913_v1, %v275_v11  ;;  %v315_v21 = vadd.f32 %v913_v1, %v276_v12  ;;  %v316_v22 = vadd.f32 %v913_v1, %v277_v13  ;;  %v279_v23 = vmul.f32 %v903_v0, %v240_v15  ;;  %v245_v36 = vld [vmem:[%s908_s22 + $0x60] sm:$0xff]  ;;  %v246_v41 = vld [vmem:[%s908_s22 + $0x68] sm:$0xff]  ;;  %v247_v42 = vld [vmem:[%s908_s22 + $0x70] sm:$0xff] }
  0x14   : > { %v343_v26 = vmax.f32 %v311_v16, 0.0  ;;  %v344_v27 = vmax.f32 %v312_v17, 0.0  ;;  %v345_v28 = vmax.f32 %v313_v18, 0.0  ;;  %v317_v29 = vadd.f32 %v913_v1, %v278_v19  ;;  %v248_v51 = vld [vmem:[%s908_s22 + $0x78] sm:$0xff]  ;;  %v249_v56 = vld [vmem:[%s908_s22 + $0x80] sm:$0xff]  ;;  %v250_v61 = vld [vmem:[%s908_s22 + $0x88] sm:$0xff] }
  0x15   : > { %v346_v31 = vmax.f32 %v314_v20, 0.0  ;;  %v347_v32 = vmax.f32 %v315_v21, 0.0  ;;  %v348_v33 = vmax.f32 %v316_v22, 0.0  ;;  %v318_v34 = vadd.f32 %v913_v1, %v279_v23  ;;  %v251_v4 = vld [vmem:[%s908_s22 + $0x90] sm:$0xff]  ;;  %v252_v5 = vld [vmem:[%s908_s22 + $0x98] sm:$0xff]  ;;  %v253_v10 = vld [vmem:[%s908_s22 + $0xa0] sm:$0xff] }
  0x16   : > { %v719_v37 = vpack.c.bf16 %v344_v27, %v343_v26  ;;  %v349_v38 = vmax.f32 %v317_v29, 0.0  ;;  %v280_v39 = vmul.f32 %v903_v0, %v241_v24  ;;  %v281_v40 = vmul.f32 %v903_v0, %v242_v25  ;;  %v254_v15 = vld [vmem:[%s908_s22 + $0xa8] sm:$0xff]  ;;  %v255_v20 = vld [vmem:[%s908_s22 + $0xb0] sm:$0xff]  ;;  %v256_v25 = vld [vmem:[%s908_s22 + $0xb8] sm:$0xff] }
  0x17   : > { %v724_v43 = vpack.c.bf16 %v346_v31, %v345_v28  ;;  %v729_v44 = vpack.c.bf16 %v348_v33, %v347_v32  ;;  %v350_v45 = vmax.f32 %v318_v34, 0.0  ;;  %v282_v46 = vmul.f32 %v903_v0, %v243_v30  ;;  %v257_v30 = vld [vmem:[%s908_s22 + $0xc0] sm:$0xff] }
  0x18   : > { %720 = vst [vmem:[%s945_s28] sm:$0xff] %v719_v37   ;;  %v319_v47 = vadd.f32 %v913_v1, %v280_v39  ;;  %v320_v48 = vadd.f32 %v913_v1, %v281_v40  ;;  %v283_v49 = vmul.f32 %v903_v0, %v244_v35  ;;  %v284_v50 = vmul.f32 %v903_v0, %v245_v36  ;;  %v258_v35 = vld [vmem:[%s908_s22 + $0xc8] sm:$0xff]  ;;  %v259_v40 = vld [vmem:[%s908_s22 + $0xd0] sm:$0xff] }
  0x19   : > { %796 = vst [vmem:[%s945_s28 + $0x8] sm:$0xff] %v724_v43   ;;  %797 = vst [vmem:[%s945_s28 + $0x10] sm:$0xff] %v729_v44   ;;  %v734_v52 = vpack.c.bf16 %v350_v45, %v349_v38  ;;  %v321_v53 = vadd.f32 %v913_v1, %v282_v46  ;;  %v285_v54 = vmul.f32 %v903_v0, %v246_v41  ;;  %v260_v41 = vld [vmem:[%s908_s22 + $0xd8] sm:$0xff]  ;;  %v261_v46 = vld [vmem:[%s908_s22 + $0xe0] sm:$0xff] }
  0x1a   : > { %v286_v55 = vmul.f32 %v903_v0, %v247_v42  ;;  %v351_v57 = vmax.f32 %v319_v47, 0.0  ;;  %v352_v58 = vmax.f32 %v320_v48, 0.0  ;;  %v322_v59 = vadd.f32 %v913_v1, %v283_v49 }
  0x1b   : > { %v323_v60 = vadd.f32 %v913_v1, %v284_v50  ;;  %798 = vst [vmem:[%s945_s28 + $0x18] sm:$0xff] %v734_v52   ;;  %v353_v62 = vmax.f32 %v321_v53, 0.0  ;;  %v324_v63 = vadd.f32 %v913_v1, %v285_v54  ;;  %v287_v2 = vmul.f32 %v903_v0, %v248_v51  ;;  %v262_v51 = vld [vmem:[%s908_s22 + $0xe8] sm:$0xff] }
  0x1c   : > { %v325_v3 = vadd.f32 %v913_v1, %v286_v55  ;;  %v739_v6 = vpack.c.bf16 %v352_v58, %v351_v57  ;;  %v354_v7 = vmax.f32 %v322_v59, 0.0  ;;  %v288_v9 = vmul.f32 %v903_v0, %v249_v56  ;;  %v263_v56 = vld [vmem:[%s908_s22 + $0xf0] sm:$0xff] }
  0x1d   : > { %v355_v8 = vmax.f32 %v323_v60, 0.0  ;;  %v356_v11 = vmax.f32 %v324_v63, 0.0  ;;  %v326_v12 = vadd.f32 %v913_v1, %v287_v2  ;;  %v289_v14 = vmul.f32 %v903_v0, %v250_v61  ;;  %v264_v61 = vld [vmem:[%s908_s22 + $0xf8] sm:$0xff] }
  0x1e   : > { %v357_v13 = vmax.f32 %v325_v3, 0.0  ;;  %799 = vst [vmem:[%s945_s28 + $0x20] sm:$0xff] %v739_v6   ;;  %v744_v16 = vpack.c.bf16 %v354_v7, %v353_v62  ;;  %v327_v17 = vadd.f32 %v913_v1, %v288_v9  ;;  %v290_v18 = vmul.f32 %v903_v0, %v251_v4 }
  0x1f   : > { %v291_v19 = vmul.f32 %v903_v0, %v252_v5  ;;  %v749_v21 = vpack.c.bf16 %v356_v11, %v355_v8  ;;  %v358_v22 = vmax.f32 %v326_v12, 0.0  ;;  %v328_v23 = vadd.f32 %v913_v1, %v289_v14 }
  0x20   : > { %v292_v24 = vmul.f32 %v903_v0, %v253_v10  ;;  %800 = vst [vmem:[%s945_s28 + $0x28] sm:$0xff] %v744_v16   ;;  %v359_v26 = vmax.f32 %v327_v17, 0.0  ;;  %v329_v27 = vadd.f32 %v913_v1, %v290_v18  ;;  %v293_v29 = vmul.f32 %v903_v0, %v254_v15 }
  0x21   : > { %v330_v28 = vadd.f32 %v913_v1, %v291_v19  ;;  %801 = vst [vmem:[%s945_s28 + $0x30] sm:$0xff] %v749_v21   ;;  %v754_v31 = vpack.c.bf16 %v358_v22, %v357_v13  ;;  %v360_v32 = vmax.f32 %v328_v23, 0.0  ;;  %v294_v34 = vmul.f32 %v903_v0, %v255_v20 }
  0x22   : > { %v331_v33 = vadd.f32 %v913_v1, %v292_v24  ;;  %v361_v36 = vmax.f32 %v329_v27, 0.0  ;;  %v332_v38 = vadd.f32 %v913_v1, %v293_v29  ;;  %v295_v39 = vmul.f32 %v903_v0, %v256_v25 }
  0x23   : > { %v362_v37 = vmax.f32 %v330_v28, 0.0  ;;  %802 = vst [vmem:[%s945_s28 + $0x38] sm:$0xff] %v754_v31   ;;  %v759_v42 = vpack.c.bf16 %v360_v32, %v359_v26  ;;  %v333_v44 = vadd.f32 %v913_v1, %v294_v34  ;;  %v296_v45 = vmul.f32 %v903_v0, %v257_v30 }
  0x24   : > { %v363_v43 = vmax.f32 %v331_v33, 0.0  ;;  %v364_v48 = vmax.f32 %v332_v38, 0.0  ;;  %v334_v49 = vadd.f32 %v913_v1, %v295_v39  ;;  %v297_v50 = vmul.f32 %v903_v0, %v258_v35 }
  0x25   : > { %v764_v47 = vpack.c.bf16 %v362_v37, %v361_v36  ;;  %803 = vst [vmem:[%s945_s28 + $0x40] sm:$0xff] %v759_v42   ;;  %v365_v52 = vmax.f32 %v333_v44, 0.0  ;;  %v335_v53 = vadd.f32 %v913_v1, %v296_v45  ;;  %v298_v54 = vmul.f32 %v903_v0, %v259_v40 }
  0x26   : > { %v299_v55 = vmul.f32 %v903_v0, %v260_v41  ;;  %v769_v57 = vpack.c.bf16 %v364_v48, %v363_v43  ;;  %v366_v58 = vmax.f32 %v334_v49, 0.0  ;;  %v336_v59 = vadd.f32 %v913_v1, %v297_v50 }
  0x27   : > { %804 = vst [vmem:[%s945_s28 + $0x48] sm:$0xff] %v764_v47   ;;  %v300_v60 = vmul.f32 %v903_v0, %v261_v46  ;;  %v367_v62 = vmax.f32 %v335_v53, 0.0  ;;  %v337_v63 = vadd.f32 %v913_v1, %v298_v54  ;;  %v301_v3 = vmul.f32 %v903_v0, %v262_v51 }
  0x28   : > { %v338_v2 = vadd.f32 %v913_v1, %v299_v55  ;;  %805 = vst [vmem:[%s945_s28 + $0x50] sm:$0xff] %v769_v57   ;;  %v774_v4 = vpack.c.bf16 %v366_v58, %v365_v52  ;;  %v368_v5 = vmax.f32 %v336_v59, 0.0  ;;  %v302_v7 = vmul.f32 %v903_v0, %v263_v56 }
  0x29   : > { %v339_v6 = vadd.f32 %v913_v1, %v300_v60  ;;  %v369_v8 = vmax.f32 %v337_v63, 0.0  ;;  %v340_v10 = vadd.f32 %v913_v1, %v301_v3  ;;  %v303_v11 = vmul.f32 %v903_v0, %v264_v61 }
  0x2a   : > { %v370_v9 = vmax.f32 %v338_v2, 0.0  ;;  %806 = vst [vmem:[%s945_s28 + $0x58] sm:$0xff] %v774_v4   ;;  %v779_v12 = vpack.c.bf16 %v368_v5, %v367_v62  ;;  %v341_v14 = vadd.f32 %v913_v1, %v302_v7 }
  0x2b   : > { %v371_v13 = vmax.f32 %v339_v6, 0.0  ;;  %v372_v16 = vmax.f32 %v340_v10, 0.0  ;;  %v342_v17 = vadd.f32 %v913_v1, %v303_v11 }
  0x2c   : > { %v784_v15 = vpack.c.bf16 %v370_v9, %v369_v8  ;;  %807 = vst [vmem:[%s945_s28 + $0x60] sm:$0xff] %v779_v12   ;;  %v373_v18 = vmax.f32 %v341_v14, 0.0 }
  0x2d   : > { %v789_v19 = vpack.c.bf16 %v372_v16, %v371_v13  ;;  %v374_v20 = vmax.f32 %v342_v17, 0.0 }
  0x2e   : > { %808 = vst [vmem:[%s945_s28 + $0x68] sm:$0xff] %v784_v15  }
  0x2f   : > { %809 = vst [vmem:[%s945_s28 + $0x70] sm:$0xff] %v789_v19   ;;  %v794_v21 = vpack.c.bf16 %v374_v20, %v373_v18 }
  0x31   : > { %810 = vst [vmem:[%s945_s28 + $0x78] sm:$0xff] %v794_v21  }
  0x32 PF: > { %s13_s14 = sadd.s32 1, %s857_s14   ;;  %s1046_s12 = smov %s853_s13 }
  0x33   : > { %p10_p5 = scmp.ge.s32.totalorder %s13_s14, 4   ;;  %s1047_s13 = smov %s1049_s15 }
  0x35   :  { %12 = sbr.rel (!%p10_p5) target bundleno = 2 (0x2), region = 68 }

// kernel: resblock_pallas.7
= control target key start
LH: loop header
LB: loop body
LE: loop exit
PB: predicated region body
PF: predicated region fallthrough
CT: control target
= control target key end

     0   :  { %s823_s21 = smov 0   ;;  %s825_s22 = smov 0   ;;  %s889_s0 = inlined_call_operand.vmem [shape: f32[128,128], index: 0, kind: input, shape index: {}]   ;;  %s890_s1 = inlined_call_operand.vmem [shape: bf16[128,4], index: 1, kind: input, shape index: {}]   ;;  %s891_s2 = inlined_call_operand.vmem [shape: bf16[4,128], index: 2, kind: input, shape index: {}]   ;;  %s892_s3 = inlined_call_operand.vmem [shape: f32[1,128], index: 3, kind: input, shape index: {}]   ;;  %s893_s4 = inlined_call_operand.vmem [shape: f32[1,128], index: 4, kind: input, shape index: {}]   ;;  %s894_s5 = inlined_call_operand.vmem [shape: f32[1,128], index: 5, kind: input, shape index: {}]   ;;  %s895_s6 = inlined_call_operand.vmem [shape: f32[128,128], index: 6, kind: output, shape index: {}]  }
   0x1   :  { %s827_s23 = smov 0  }
   0x2 LB: > { %s28_s24 = sadd.s32 1, %s782_s22  ;;  %p697_p0 = scmp.ge.s32.totalorder %s786_s23, 1  ;;  %s786_s23 = sphi %s827_s23, %s16_s23   ;;  %s782_s22 = sphi %s825_s22, %s897_s22   ;;  %s778_s21 = sphi %s823_s21, %s896_s21  }
   0x3   : > { %p30_p1 = scmp.ge.s32.totalorder %s28_s24, 2  ;;  %p276_p2 = scmp.lt.s32.totalorder %s786_s23, 3 }
   0x5   : > { %s899_s24 = smov (%p30_p1, %s28_s24), 0  ;;  %p277_p3 = pnand %p697_p0, %p276_p2 }
   0x6   : > { %s698_s27 = sshll.u32 (!%p277_p3), %s778_s21, 3 }
   0x7   : > { %280 = sbr.rel (%p277_p3) target bundleno = 223 (0xdf), region = 44  ;;  %p331_p4 = scmp.lt.s32.totalorder (!%p277_p3), %s698_s27, 15 }
   0xc   : > { %v376_v0 = vld [vmem:[%s891_s2] sm:$0x3]  ;;  %vm417_vm0 = vcmask 1041408   ;;  %s901_s27 = smov (!%p331_p4, %s698_s27), 15  ;;  %vm404_vm1 = vcmask 31744  }
   0xd   : > { %734 = vmatprep.subr.msk.bf16.mxu0 %vm417_vm0, %v376_v0  ;;  %735 = vmatprep.subr.msk.bf16.mxu1 %vm417_vm0, %v376_v0  ;;  %v419_v1 = vsel %vm417_vm0, %v376_v0, 0  ;;  %s701_s28 = sshll.u32 %s901_s27, 2  ;;  %s699_s8 = sshll.u32 %s901_s27, 3  ;;  %v713_v7 = vld [vmem:[%s893_s4] ss:$0 sm:$0xff] }
   0xe   : > { %723 = vmatpush3.bf16.msra.mxu0 %v419_v1  ;;  %733 = vmatpush3.bf16.msra.mxu1 %v419_v1  ;;  %s343_s7 = scalar_lea.vmem %s890_s1, %s701_s28  ;;  %s337_s11 = scalar_lea.vmem %s889_s0, %s699_s8  ;;  %v714_v12 = vld [vmem:[%s894_s5] ss:$0 sm:$0xff] }
   0xf   : > { %v760_v2 = vld [vmem:[%s343_s7] sm:$0xff]   ;;  %v761_v3 = vld [vmem:[%s343_s7 + $0x10] sm:$0xff]   ;;  %v762_v4 = vld [vmem:[%s343_s7 + $0x8] sm:$0xff]   ;;  %s870_s20 = scalar_lea.vmem %s895_s6, %s699_s8 }
  0x10   : > { %724 = vmatprep.mubr.msk.bf16.mxu0 %vm404_vm1, %v760_v2  ;;  %728 = vmatprep.mubr.msk.bf16.mxu1 %vm404_vm1, %v761_v3  ;;  %v763_v5 = vld [vmem:[%s343_s7 + $0x18] sm:$0xff]   ;;  %v488_v6 = vld [vmem:[%s337_s11 + $0x10] sm:$0xff]  ;;  %v486_v9 = vld [vmem:[%s337_s11] sm:$0xff] }
  0x11   : > { %725 = vmatmul.mubr.msk.bf16.vlgmr.msra.gmra.mxu0 %vm404_vm1, %v762_v4  ;;  %729 = vmatmul.mubr.msk.bf16.vlgmr.msra.gmra.mxu1 %vm404_vm1, %v763_v5  ;;  %v492_v8 = vld [vmem:[%s337_s11 + $0x30] sm:$0xff]  ;;  %v503_v10 = vmul.f32 %v713_v7, %v488_v6  ;;  %v490_v11 = vld [vmem:[%s337_s11 + $0x20] sm:$0xff]  ;;  %v489_v14 = vld [vmem:[%s337_s11 + $0x18] sm:$0xff]  ;;  %v501_v15 = vmul.f32 %v713_v7, %v486_v9 }
  0x12   : > { %v507_v13 = vmul.f32 %v713_v7, %v492_v8  ;;  %v493_v16 = vld [vmem:[%s337_s11 + $0x38] sm:$0xff]  ;;  %v704_v17 = vld [vmem:[%s892_s3] ss:$0 sm:$0xff]  ;;  %v505_v18 = vmul.f32 %v713_v7, %v490_v11  ;;  %v487_v19 = vld [vmem:[%s337_s11 + $0x8] sm:$0xff]  ;;  %v504_v21 = vmul.f32 %v713_v7, %v489_v14 }
  0x13   : > { %v518_v20 = vadd.f32 %v714_v12, %v503_v10  ;;  %v491_v22 = vld [vmem:[%s337_s11 + $0x28] sm:$0xff]  ;;  %v508_v25 = vmul.f32 %v713_v7, %v493_v16  ;;  %v516_v28 = vadd.f32 %v714_v12, %v501_v15  ;;  %v502_v29 = vmul.f32 %v713_v7, %v487_v19 }
  0x14   : > { %v522_v24 = vadd.f32 %v714_v12, %v507_v13  ;;  %v520_v32 = vadd.f32 %v714_v12, %v505_v18  ;;  %v506_v33 = vmul.f32 %v713_v7, %v491_v22  ;;  %v519_v37 = vadd.f32 %v714_v12, %v504_v21 }
  0x15   : > { %v523_v41 = vadd.f32 %v714_v12, %v508_v25  ;;  %v517_v46 = vadd.f32 %v714_v12, %v502_v29 }
  0x16   : > { %v521_v51 = vadd.f32 %v714_v12, %v506_v33 }
  0xd1   : > { %v726_v23 = vpop.f32.mrf.mxu0  ;;  %v730_v27 = vpop.f32.mrf.mxu1 }
  0xd2   : > { %v464_v26 = vadd.f32 %v726_v23, %v704_v17  ;;  %v480_v30 = vadd.f32 %v730_v27, %v704_v17 }
  0xd3   : > { %v455_v31 = vpop.f32.mrf.mxu0  ;;  %v471_v36 = vpop.f32.mrf.mxu1 }
  0xd4   : > { %v526_v34 = vadd.f32 %v518_v20, %v464_v26  ;;  %v456_v35 = vadd.f32 %v704_v17, %v455_v31  ;;  %v530_v38 = vadd.f32 %v522_v24, %v480_v30  ;;  %v472_v39 = vadd.f32 %v704_v17, %v471_v36 }
  0xd5   : > { %v727_v40 = vpop.f32.mrf.mxu0  ;;  %v731_v45 = vpop.f32.mrf.mxu1 }
  0xd6   : > { %v534_v42 = vmax.f32 %v526_v34, 0.0  ;;  %v524_v43 = vadd.f32 %v516_v28, %v456_v35  ;;  %v467_v44 = vadd.f32 %v727_v40, %v704_v17  ;;  %v538_v47 = vmax.f32 %v530_v38, 0.0 }
  0xd7   : > { %v528_v48 = vadd.f32 %v520_v32, %v472_v39  ;;  %v483_v49 = vadd.f32 %v731_v45, %v704_v17  ;;  %v458_v50 = vpop.f32.mrf.mxu0  ;;  %v474_v55 = vpop.f32.mrf.mxu1 }
  0xd8   : > { %542 = vst [vmem:[%s870_s20 + $0x10] sm:$0xff] %v534_v42  ;;  %v532_v52 = vmax.f32 %v524_v43, 0.0  ;;  %v527_v53 = vadd.f32 %v519_v37, %v467_v44  ;;  %v459_v54 = vadd.f32 %v704_v17, %v458_v50  ;;  %546 = vst [vmem:[%s870_s20 + $0x30] sm:$0xff] %v538_v47  ;;  %v475_v58 = vadd.f32 %v704_v17, %v474_v55 }
  0xd9   : > { %v536_v56 = vmax.f32 %v528_v48, 0.0  ;;  %v531_v57 = vadd.f32 %v523_v41, %v483_v49 }
  0xda   : > { %540 = vst [vmem:[%s870_s20] sm:$0xff] %v532_v52  ;;  %v535_v59 = vmax.f32 %v527_v53, 0.0  ;;  %v525_v60 = vadd.f32 %v517_v46, %v459_v54  ;;  %v529_v62 = vadd.f32 %v521_v51, %v475_v58 }
  0xdb   : > { %544 = vst [vmem:[%s870_s20 + $0x20] sm:$0xff] %v536_v56  ;;  %v539_v61 = vmax.f32 %v531_v57, 0.0 }
  0xdc   : > { %543 = vst [vmem:[%s870_s20 + $0x18] sm:$0xff] %v535_v59  ;;  %v533_v63 = vmax.f32 %v525_v60, 0.0  ;;  %v537_v0 = vmax.f32 %v529_v62, 0.0 }
  0xdd   : > { %547 = vst [vmem:[%s870_s20 + $0x38] sm:$0xff] %v539_v61 }
  0xde   : > { %541 = vst [vmem:[%s870_s20 + $0x8] sm:$0xff] %v533_v63  ;;  %545 = vst [vmem:[%s870_s20 + $0x28] sm:$0xff] %v537_v0 }
  0xdf PF: > { %s16_s23 = sadd.s32 1, %s786_s23   ;;  %s896_s21 = smov %s782_s22 }
  0xe0   : > { %p13_p5 = scmp.ge.s32.totalorder %s16_s23, 4   ;;  %s897_s22 = smov %s899_s24 }
  0xe2   :  { %15 = sbr.rel (!%p13_p5) target bundleno = 2 (0x2), region = 89 }

// kernel: resblock_pallas.6
= control target key start
LH: loop header
LB: loop body
LE: loop exit
PB: predicated region body
PF: predicated region fallthrough
CT: control target
= control target key end

     0   :  { %s3528_s15 = smov 0   ;;  %s3530_s16 = smov 0   ;;  %s4058_s0 = inlined_call_operand.vmem [shape: bf16[4,2,9,9,128], index: 0, kind: input, shape index: {}]   ;;  %s4059_s1 = inlined_call_operand.vmem [shape: bf16[9,128,128], index: 1, kind: input, shape index: {}]   ;;  %s4060_s2 = inlined_call_operand.vmem [shape: f32[128,128], index: 2, kind: output, shape index: {0}]   ;;  %s4061_s3 = inlined_call_operand.vmem [shape: f32[2,1,128], index: 3, kind: output, shape index: {1}]   ;;  %s4062_s4 = inlined_call_operand.vmem [shape: f32[2,1,128], index: 4, kind: output, shape index: {2}]  }
   0x1   :  { %s3532_s17 = smov 0   ;;  %s3534_s18 = smov 0  }
   0x2   :  { %s3536_s19 = smov 0  }
   0x3 LB: > { %s27_s20 = sadd.s32 1, %s3497_s18  ;;  %p41_p1 = scmp.ne.s32.totalorder %s3489_s16, %s3485_s15  ;;  %s3501_s19 = sphi %s3536_s19, %s15_s19   ;;  %s3497_s18 = sphi %s3534_s18, %s4082_s18   ;;  %s3493_s17 = sphi %s3532_s17, %s4081_s17   ;;  %s3489_s16 = sphi %s3530_s16, %s4080_s16   ;;  %s3485_s15 = sphi %s3528_s15, %s4079_s15  }
   0x4   : > { %p29_p0 = scmp.ge.s32.totalorder %s27_s20, 2  ;;  %p42_p2 = scmp.eq.s32.totalorder %s3501_s19, 0 }
   0x5   : > { %s34_s22 = sadd.s32 1, %s3489_s16  ;;  %p2669_p5 = scmp.ge.s32.totalorder %s3501_s19, 2 }
   0x6   : > { %s4084_s20 = smov (%p29_p0, %s27_s20), 0  ;;  %p43_p3 = por %p42_p2, %p41_p1 }
   0x7   : > { %s31_s21 = ssub.s32 %s3497_s18, %s4084_s20  ;;  %184 = sbr.rel (%p2669_p5) target bundleno = 35 (0x23), region = 20 }
   0x8   : > { %p32_p4 = scmp.eq.s32.totalorder %s31_s21, 0 }
   0xa   : > { %s3563_s23 = scalar_select %p32_p4, %s3489_s16, %s34_s22  }
   0xc   : > { %187 = sbr.rel (!%p43_p3) target bundleno = 35 (0x23), region = 24  ;;  %s189_s24 = sand.u32 (%p43_p3), 1, %s3489_s16  }
   0xd   : > { %s3325_s25 = smul.u32 (%p43_p3), 72, %s3497_s18 }
   0xe   : > { %s3324_s26 = smul.u32 (%p43_p3), 288, %s189_s24 }
   0xf   : > { %s3571_s29 = scalar_lea.vmem (%p43_p3), %s4058_s0, %s3325_s25 }
  0x10   : > { %v211_v0 = vld [vmem:[%s3571_s29] sm:$0xff] (%p43_p3)   ;;  %v215_v1 = vld [vmem:[%s3571_s29 + $0x8] sm:$0xff] (%p43_p3)   ;;  %v219_v2 = vld [vmem:[%s3571_s29 + $0x10] sm:$0xff] (%p43_p3)   ;;  %s3576_s30 = scalar_lea.vmem (%p43_p3), [#allocation2], %s3324_s26 }
  0x11   : > { %212 = vst [vmem:[%s3576_s30] sm:$0xff] %v211_v0   ;;  %216 = vst [vmem:[%s3576_s30 + $0x8] sm:$0xff] %v215_v1   ;;  %v223_v3 = vld [vmem:[%s3571_s29 + $0x18] sm:$0xff]   ;;  %v227_v4 = vld [vmem:[%s3571_s29 + $0x20] sm:$0xff]  }
  0x12   : > { %220 = vst [vmem:[%s3576_s30 + $0x10] sm:$0xff] %v219_v2   ;;  %v231_v5 = vld [vmem:[%s3571_s29 + $0x28] sm:$0xff]   ;;  %224 = vst [vmem:[%s3576_s30 + $0x18] sm:$0xff] %v223_v3   ;;  %v235_v6 = vld [vmem:[%s3571_s29 + $0x30] sm:$0xff]  }
  0x13   : > { %228 = vst [vmem:[%s3576_s30 + $0x20] sm:$0xff] %v227_v4   ;;  %232 = vst [vmem:[%s3576_s30 + $0x28] sm:$0xff] %v231_v5   ;;  %v239_v7 = vld [vmem:[%s3571_s29 + $0x38] sm:$0xff]   ;;  %v243_v8 = vld [vmem:[%s3571_s29 + $0x40] sm:$0xff]  }
  0x14   : > { %236 = vst [vmem:[%s3576_s30 + $0x30] sm:$0xff] %v235_v6   ;;  %240 = vst [vmem:[%s3576_s30 + $0x38] sm:$0xff] %v239_v7   ;;  %v247_v9 = vld [vmem:[%s3571_s29 + $0x90] sm:$0xff]   ;;  %v251_v10 = vld [vmem:[%s3571_s29 + $0x98] sm:$0xff]  }
  0x15   : > { %244 = vst [vmem:[%s3576_s30 + $0x40] sm:$0xff] %v243_v8   ;;  %v255_v11 = vld [vmem:[%s3571_s29 + $0xa0] sm:$0xff]   ;;  %248 = vst [vmem:[%s3576_s30 + $0x48] sm:$0xff] %v247_v9   ;;  %v259_v12 = vld [vmem:[%s3571_s29 + $0xa8] sm:$0xff]  }
  0x16   : > { %252 = vst [vmem:[%s3576_s30 + $0x50] sm:$0xff] %v251_v10   ;;  %256 = vst [vmem:[%s3576_s30 + $0x58] sm:$0xff] %v255_v11   ;;  %v263_v13 = vld [vmem:[%s3571_s29 + $0xb0] sm:$0xff]   ;;  %v267_v14 = vld [vmem:[%s3571_s29 + $0xb8] sm:$0xff]  }
  0x17   : > { %260 = vst [vmem:[%s3576_s30 + $0x60] sm:$0xff] %v259_v12   ;;  %264 = vst [vmem:[%s3576_s30 + $0x68] sm:$0xff] %v263_v13   ;;  %v271_v15 = vld [vmem:[%s3571_s29 + $0xc0] sm:$0xff]   ;;  %v275_v16 = vld [vmem:[%s3571_s29 + $0xc8] sm:$0xff]  }
  0x18   : > { %268 = vst [vmem:[%s3576_s30 + $0x70] sm:$0xff] %v267_v14   ;;  %v279_v17 = vld [vmem:[%s3571_s29 + $0xd0] sm:$0xff]   ;;  %272 = vst [vmem:[%s3576_s30 + $0x78] sm:$0xff] %v271_v15   ;;  %v283_v18 = vld [vmem:[%s3571_s29 + $0x120] sm:$0xff]  }
  0x19   : > { %276 = vst [vmem:[%s3576_s30 + $0x80] sm:$0xff] %v275_v16   ;;  %280 = vst [vmem:[%s3576_s30 + $0x88] sm:$0xff] %v279_v17   ;;  %v287_v19 = vld [vmem:[%s3571_s29 + $0x128] sm:$0xff]   ;;  %v291_v20 = vld [vmem:[%s3571_s29 + $0x130] sm:$0xff]  }
  0x1a   : > { %284 = vst [vmem:[%s3576_s30 + $0x90] sm:$0xff] %v283_v18   ;;  %288 = vst [vmem:[%s3576_s30 + $0x98] sm:$0xff] %v287_v19   ;;  %v295_v21 = vld [vmem:[%s3571_s29 + $0x138] sm:$0xff]   ;;  %v299_v22 = vld [vmem:[%s3571_s29 + $0x140] sm:$0xff]  }
  0x1b   : > { %292 = vst [vmem:[%s3576_s30 + $0xa0] sm:$0xff] %v291_v20   ;;  %v303_v23 = vld [vmem:[%s3571_s29 + $0x148] sm:$0xff]   ;;  %296 = vst [vmem:[%s3576_s30 + $0xa8] sm:$0xff] %v295_v21   ;;  %v307_v24 = vld [vmem:[%s3571_s29 + $0x150] sm:$0xff]  }
  0x1c   : > { %300 = vst [vmem:[%s3576_s30 + $0xb0] sm:$0xff] %v299_v22   ;;  %304 = vst [vmem:[%s3576_s30 + $0xb8] sm:$0xff] %v303_v23   ;;  %v311_v25 = vld [vmem:[%s3571_s29 + $0x158] sm:$0xff]   ;;  %v315_v26 = vld [vmem:[%s3571_s29 + $0x160] sm:$0xff]  }
  0x1d   : > { %308 = vst [vmem:[%s3576_s30 + $0xc0] sm:$0xff] %v307_v24   ;;  %312 = vst [vmem:[%s3576_s30 + $0xc8] sm:$0xff] %v311_v25   ;;  %v319_v27 = vld [vmem:[%s3571_s29 + $0x1b0] sm:$0xff]   ;;  %v323_v28 = vld [vmem:[%s3571_s29 + $0x1b8] sm:$0xff]  }
  0x1e   : > { %316 = vst [vmem:[%s3576_s30 + $0xd0] sm:$0xff] %v315_v26   ;;  %v327_v29 = vld [vmem:[%s3571_s29 + $0x1c0] sm:$0xff]   ;;  %320 = vst [vmem:[%s3576_s30 + $0xd8] sm:$0xff] %v319_v27   ;;  %v331_v30 = vld [vmem:[%s3571_s29 + $0x1c8] sm:$0xff]  }
  0x1f   : > { %324 = vst [vmem:[%s3576_s30 + $0xe0] sm:$0xff] %v323_v28   ;;  %328 = vst [vmem:[%s3576_s30 + $0xe8] sm:$0xff] %v327_v29   ;;  %v335_v31 = vld [vmem:[%s3571_s29 + $0x1d0] sm:$0xff]   ;;  %v339_v32 = vld [vmem:[%s3571_s29 + $0x1d8] sm:$0xff]  }
  0x20   : > { %332 = vst [vmem:[%s3576_s30 + $0xf0] sm:$0xff] %v331_v30   ;;  %336 = vst [vmem:[%s3576_s30 + $0xf8] sm:$0xff] %v335_v31   ;;  %v343_v33 = vld [vmem:[%s3571_s29 + $0x1e0] sm:$0xff]   ;;  %v347_v34 = vld [vmem:[%s3571_s29 + $0x1e8] sm:$0xff]  }
  0x21   : > { %340 = vst [vmem:[%s3576_s30 + $0x100] sm:$0xff] %v339_v32   ;;  %v351_v35 = vld [vmem:[%s3571_s29 + $0x1f0] sm:$0xff]   ;;  %344 = vst [vmem:[%s3576_s30 + $0x108] sm:$0xff] %v343_v33  }
  0x22   : > { %348 = vst [vmem:[%s3576_s30 + $0x110] sm:$0xff] %v347_v34   ;;  %352 = vst [vmem:[%s3576_s30 + $0x118] sm:$0xff] %v351_v35  }
  0x23 PF: > { %p2671_p6 = scmp.ge.s32.totalorder %s3501_s19, 1  ;;  %p521_p7 = scmp.lt.s32.totalorder %s3501_s19, 3 }
  0x25   : > { %p522_p8 = pnand %p2671_p6, %p521_p7 }
  0x27   : > { %525 = sbr.rel (%p522_p8) target bundleno = 435 (0x1b3), region = 65 }
  0x2c   : > { %v3367_v36 = vld [vmem:[%s4059_s1 + $0x78] sm:$0xff]   ;;  %v3369_v38 = vld [vmem:[%s4059_s1 + $0x70] sm:$0xff]   ;;  %v3371_v40 = vld [vmem:[%s4059_s1 + $0x68] sm:$0xff]   ;;  %s528_s24 = sand.u32 1, %s3485_s15   ;;  %vm938_vm0 = vsmask.f32 3328 }
  0x2d   : > { %v3368_v37 = vld [vmem:[%s4059_s1 + $0x38] sm:$0xff]   ;;  %3092 = vmatprep.subr.bf16.mxu0 %v3367_v36  ;;  %v3370_v39 = vld [vmem:[%s4059_s1 + $0x30] sm:$0xff]   ;;  %v3372_v41 = vld [vmem:[%s4059_s1 + $0x28] sm:$0xff]   ;;  %s3326_s29 = smul.u32 288, %s528_s24  ;;  %vm939_vm1 = vsmask.f32 7440 }
  0x2e   : > { %3116 = vmatprep.subr.bf16.mxu1 %v3368_v37  ;;  %3093 = vmatpush3.bf16.msra.mxu0 %v3367_v36  ;;  %v3373_v42 = vld [vmem:[%s4059_s1 + $0x60] sm:$0xff]   ;;  %v3375_v44 = vld [vmem:[%s4059_s1 + $0x58] sm:$0xff]   ;;  %v3377_v46 = vld [vmem:[%s4059_s1 + $0x50] sm:$0xff]   ;;  %s2672_s24 = sshll.u32 %s3493_s17, 3  ;;  %p585_p10 = scmp.lt.s32.totalorder %s3493_s17, 1 }
  0x2f   : > { %3117 = vmatpush3.bf16.msra.mxu1 %v3368_v37  ;;  %3094 = vmatprep.subr.bf16.mxu0 %v3369_v38  ;;  %v3374_v43 = vld [vmem:[%s4059_s1 + $0x20] sm:$0xff]   ;;  %v3376_v45 = vld [vmem:[%s4059_s1 + $0x18] sm:$0xff]   ;;  %v3378_v47 = vld [vmem:[%s4059_s1 + $0x10] sm:$0xff]   ;;  %s3686_s11 = scalar_lea.vmem [#allocation2], %s3326_s29  ;;  %p577_p9 = scmp.lt.s32.totalorder %s2672_s24, 15 }
  0x30   : > { %3118 = vmatprep.subr.bf16.mxu1 %v3370_v39  ;;  %v3383_v48 = vld [vmem:[%s3686_s11 + $0x48] ss:$8 sps:$4 sm:$0xff]   ;;  %v3381_v52 = vld [vmem:[%s4059_s1 + $0x40] sm:$0xff]   ;;  %v3387_v55 = vld [vmem:[%s4059_s1 + $0xb8] sm:$0xff]   ;;  %s4088_s17 = smov (!%p585_p10, %s3493_s17), 1 }
  0x31   : > { %v3384_v49 = vld [vmem:[%s3686_s11] ss:$8 sps:$4 sm:$0xff]   ;;  %3108 = vmatprep.mubr.bf16.mxu0 %v3383_v48  ;;  %v3388_v56 = vld [vmem:[%s4059_s1 + $0xf8] sm:$0xff]   ;;  %v3389_v58 = vld [vmem:[%s4059_s1 + $0xb0] sm:$0xff]   ;;  %s4086_s24 = smov (!%p577_p9, %s2672_s24), 15  ;;  %s590_s5 = scalar_lea.vmem %s4061_s3, %s4088_s17 }
  0x32   : > { %3095 = vmatpush3.bf16.msra.mxu0 %v3369_v38  ;;  %3132 = vmatprep.mubr.bf16.mxu1 %v3384_v49  ;;  %v3379_v50 = vld [vmem:[%s4059_s1 + $0x48] sm:$0xff]   ;;  %v3382_v53 = vld [vmem:[%s4059_s1] sm:$0xff]   ;;  %v3386_v57 = vld [vmem:[%s3686_s11 + $0x10] ss:$8 sps:$4 sm:$0xff]   ;;  %s2673_s25 = sshll.u32 %s4086_s24, 3  ;;  %s596_s7 = scalar_lea.vmem %s4062_s4, %s4088_s17 }
  0x33   : > { %3119 = vmatpush3.bf16.msra.mxu1 %v3370_v39  ;;  %3096 = vmatprep.subr.bf16.mxu0 %v3371_v40  ;;  %v3380_v51 = vld [vmem:[%s4059_s1 + $0x8] sm:$0xff]   ;;  %v3385_v54 = vld [vmem:[%s3686_s11 + $0x58] ss:$8 sps:$4 sm:$0xff]   ;;  %v3390_v59 = vld [vmem:[%s4059_s1 + $0xf0] sm:$0xff]   ;;  %s4021_s28 = scalar_lea.vmem %s4060_s2, %s2673_s25 }
  0x34   : > { %3120 = vmatprep.subr.bf16.mxu1 %v3372_v41  ;;  %v3397_v60 = vld [vmem:[%s3686_s11 + $0x68] ss:$8 sps:$4 sm:$0xff]   ;;  %v3393_v0 = vld [vmem:[%s4059_s1 + $0xa0] sm:$0xff]   ;;  %v925_v7 = vld [vmem:[%s3686_s11 + $0xc] sm:$0x1] }
  0x35   : > { %v3398_v61 = vld [vmem:[%s3686_s11 + $0x20] ss:$8 sps:$4 sm:$0xff]   ;;  %v3400_v3 = vld [vmem:[%s3686_s11 + $0x30] ss:$8 sps:$4 sm:$0xff]   ;;  %v923_v5 = vld [vmem:[%s3686_s11 + $0x4] sm:$0x1] }
  0x36   : > { %3097 = vmatpush3.bf16.msra.mxu0 %v3371_v40  ;;  %v3391_v62 = vld [vmem:[%s4059_s1 + $0xa8] sm:$0xff]   ;;  %v3399_v1 = vld [vmem:[%s3686_s11 + $0x78] ss:$8 sps:$4 sm:$0xff]   ;;  %v951_v11 = vshll.u32 %v923_v5, 16  ;;  %v926_v13 = vld [vmem:[%s3686_s11 + $0x10] sm:$0xf] }
  0x37   : > { %3121 = vmatpush3.bf16.msra.mxu1 %v3372_v41  ;;  %3098 = vmatprep.subr.bf16.mxu0 %v3373_v42  ;;  %v3392_v63 = vld [vmem:[%s4059_s1 + $0xe8] sm:$0xff]   ;;  %v3394_v2 = vld [vmem:[%s4059_s1 + $0xe0] sm:$0xff]   ;;  %v3395_v8 = vld [vmem:[%s4059_s1 + $0x98] sm:$0xff]   ;;  %v965_v16 = vshll.u32 %v925_v7, 16  ;;  %v970_v26 = vshrl.u32 %v926_v13, 16  ;;  %v973_v27 = vshll.u32 %v926_v13, 16 }
  0x38   : > { %3122 = vmatprep.subr.bf16.mxu1 %v3374_v43  ;;  %v922_v4 = vld [vmem:[%s3686_s11] sm:$0xf]  ;;  %v924_v6 = vld [vmem:[%s3686_s11 + $0x8] sm:$0xf]  ;;  %v3396_v14 = vld [vmem:[%s4059_s1 + $0xd8] sm:$0xff]   ;;  %v953_v21 = vrot.slane %v951_v11, 5 }
  0x39   : > { %v942_v9 = vshrl.u32 %v922_v4, 16  ;;  %v945_v10 = vshll.u32 %v922_v4, 16  ;;  %v956_v12 = vshrl.u32 %v924_v6, 16  ;;  %v959_v15 = vshll.u32 %v924_v6, 16  ;;  %v927_v17 = vld [vmem:[%s3686_s11 + $0x14] sm:$0x1]  ;;  %vm3751_vm2 = vmor %vm938_vm0, %vm939_vm1 }
  0x3a   : > { %3099 = vmatpush3.bf16.msra.mxu0 %v3373_v42  ;;  %v928_v18 = vld [vmem:[%s3686_s11 + $0x18] sm:$0xf]  ;;  %v929_v23 = vld [vmem:[%s3686_s11 + $0x1c] sm:$0x1]  ;;  %v967_v25 = vrot.slane %v965_v16, 5  ;;  %v979_v29 = vshll.u32 %v927_v17, 16 }
  0x3b   : > { %3123 = vmatpush3.bf16.msra.mxu1 %v3374_v43  ;;  %3100 = vmatprep.subr.bf16.mxu0 %v3375_v44  ;;  %v944_v19 = vrot.slane %v942_v9, 4  ;;  %v947_v20 = vrot.slane %v945_v10, 5  ;;  %v958_v22 = vrot.slane %v956_v12, 4  ;;  %v961_v24 = vrot.slane %v959_v15, 5  ;;  %v3401_v32 = vld [vmem:[%s4059_s1 + $0x90] sm:$0xff]   ;;  %v3403_v48 = vld [vmem:[%s4059_s1 + $0x88] sm:$0xff]  }
  0x3c   : > { %3124 = vmatprep.subr.bf16.mxu1 %v3376_v45  ;;  %v984_v30 = vshrl.u32 %v928_v18, 16  ;;  %v987_v31 = vshll.u32 %v928_v18, 16  ;;  %v972_v35 = vrot.slane %v970_v26, 4  ;;  %v975_v36 = vrot.slane %v973_v27, 5  ;;  %v3407_v38 = vld [vmem:[%s3686_s11 + $0x90] ss:$8 sps:$4 sm:$0xff]  }
  0x3d   : > { %v948_v28 = vor.u32 %v947_v20, %v944_v19  ;;  %v962_v34 = vor.u32 %v961_v24, %v958_v22  ;;  %v993_v37 = vshll.u32 %v929_v23, 16  ;;  %v3402_v39 = vld [vmem:[%s4059_s1 + $0xd0] sm:$0xff]   ;;  %v936_v13 = vld [vmem:[%s3686_s11 + $0x38] sm:$0xf]  ;;  %v937_v17 = vld [vmem:[%s3686_s11 + $0x3c] sm:$0x1] }
  0x3e   : > { %3101 = vmatpush3.bf16.msra.mxu0 %v3375_v44  ;;  %v986_v41 = vrot.slane %v984_v30, 4  ;;  %v989_v42 = vrot.slane %v987_v31, 5  ;;  %v976_v44 = vor.u32 %v975_v36, %v972_v35  ;;  %v934_v4 = vld [vmem:[%s3686_s11 + $0x30] sm:$0xf]  ;;  %v1040_v22 = vshrl.u32 %v936_v13, 16  ;;  %v3408_v24 = vld [vmem:[%s4059_s1 + $0x138] sm:$0xff]  }
  0x3f   : > { %3125 = vmatpush3.bf16.msra.mxu1 %v3376_v45  ;;  %3102 = vmatprep.subr.bf16.mxu0 %v3377_v46  ;;  %v949_v40 = vrot.slane %v948_v28, 4  ;;  %v963_v43 = vrot.slane %v962_v34, 4  ;;  %v3759_v45 = vrot.slane %v979_v29, 5  ;;  %v1026_v9 = vshrl.u32 %v934_v4, 16  ;;  %v3409_v27 = vld [vmem:[%s4059_s1 + $0x178] sm:$0xff]  }
  0x40   : > { %3126 = vmatprep.subr.bf16.mxu1 %v3378_v47  ;;  %v1043_v23 = vshll.u32 %v936_v13, 16  ;;  %v1049_v26 = vshll.u32 %v937_v17, 16  ;;  %v3410_v28 = vld [vmem:[%s3686_s11 + $0xa0] ss:$8 sps:$4 sm:$0xff]   ;;  %v1042_v31 = vrot.slane %v1040_v22, 4 }
  0x41   : > { %v968_v49 = vsel %vm3751_vm2, %v963_v43, %v967_v25  ;;  %v1028_v18 = vrot.slane %v1026_v9, 4  ;;  %v3412_v43 = vld [vmem:[%s4059_s1 + $0x170] sm:$0xff]   ;;  %v2827_v13 = vld [vmem:[%s3686_s11 + $0xa4] sm:$0x1] }
  0x42   : > { %3103 = vmatpush3.bf16.msra.mxu0 %v3377_v46  ;;  %v954_v46 = vsel %vm3751_vm2, %v949_v40, %v953_v21 }
  0x43   : > { %3127 = vmatpush3.bf16.msra.mxu1 %v3378_v47  ;;  %3104 = vmatprep.subr.bf16.mxu0 %v3379_v50  ;;  %v990_v47 = vor.u32 %v989_v42, %v986_v41  ;;  %v1051_v41 = vrot.slane %v1049_v26, 5  ;;  %v3415_v42 = vld [vmem:[%s3686_s11 + $0xb0] ss:$8 sps:$4 sm:$0xff]  }
  0x44   : > { %3128 = vmatprep.subr.bf16.mxu1 %v3380_v51 }
  0x46   : > { %3105 = vmatpush3.bf16.msra.mxu0 %v3379_v50  ;;  %v977_v50 = vrot.slane %v976_v44, 4 }
  0x47   : > { %3129 = vmatpush3.bf16.msra.mxu1 %v3380_v51  ;;  %3106 = vmatprep.subr.bf16.mxu0 %v3381_v52  ;;  %v995_v51 = vrot.slane %v993_v37, 5  ;;  %v3411_v37 = vld [vmem:[%s4059_s1 + $0x130] sm:$0xff]  }
  0x48   : > { %3130 = vmatprep.subr.bf16.mxu1 %v3382_v53 }
  0x4a   : > { %3107 = vmatpush3.bf16.msra.mxu0 %v3381_v52  ;;  %v3404_v52 = vld [vmem:[%s4059_s1 + $0xc8] sm:$0xff]  }
  0x4b   : > { %3131 = vmatpush3.bf16.msra.mxu1 %v3382_v53  ;;  %3140 = vmatprep.subr.bf16.mxu0 %v3387_v55  ;;  %v2738_v53 = vcombine.low %v954_v46, %v968_v49  ;;  %v3413_v46 = vld [vmem:[%s4059_s1 + $0x128] sm:$0xff]  }
  0x4c   : > { %3164 = vmatprep.subr.bf16.mxu1 %v3388_v56  ;;  %v3414_v49 = vld [vmem:[%s4059_s1 + $0x168] sm:$0xff]  }
  0x4d   : > { %3109 = vmatmul.mubr.bf16.vlgmr.msra.gmra.mxu0 %v3385_v54  ;;  %v991_v54 = vrot.slane %v990_v47, 4 }
  0x4e   : > { %3133 = vmatmul.mubr.bf16.vlgmr.msra.gmra.mxu1 %v3386_v57  ;;  %3141 = vmatpush3.bf16.msra.mxu0 %v3387_v55  ;;  %v930_v55 = vld [vmem:[%s3686_s11 + $0x20] sm:$0xf] }
  0x4f   : > { %3165 = vmatpush3.bf16.msra.mxu1 %v3388_v56  ;;  %3142 = vmatprep.subr.bf16.mxu0 %v3389_v58  ;;  %v931_v56 = vld [vmem:[%s3686_s11 + $0x24] sm:$0x1] }
  0x50   : > { %3166 = vmatprep.subr.bf16.mxu1 %v3390_v59  ;;  %3112 = vmatprep.mubr.bf16.mxu0 %v3397_v60  ;;  %v3405_v57 = vld [vmem:[%s4059_s1 + $0x80] sm:$0xff]   ;;  %v933_v60 = vld [vmem:[%s3686_s11 + $0x2c] sm:$0x1] }
  0x51   : > { %3136 = vmatprep.mubr.bf16.mxu1 %v3398_v61  ;;  %v998_v61 = vshrl.u32 %v930_v55, 16  ;;  %v1021_v7 = vshll.u32 %v933_v60, 16  ;;  %v2825_v60 = vld [vmem:[%s3686_s11 + $0x9c] sm:$0x1] }
  0x52   : > { %3143 = vmatpush3.bf16.msra.mxu0 %v3389_v58  ;;  %v982_v58 = vsel %vm3751_vm2, %v977_v50, %v3759_v45 }
  0x53   : > { %3167 = vmatpush3.bf16.msra.mxu1 %v3390_v59  ;;  %3144 = vmatprep.subr.bf16.mxu0 %v3391_v62  ;;  %v932_v59 = vld [vmem:[%s3686_s11 + $0x28] sm:$0xf]  ;;  %v1000_v5 = vrot.slane %v998_v61, 4  ;;  %v1023_v16 = vrot.slane %v1021_v7, 5 }
  0x54   : > { %3168 = vmatprep.subr.bf16.mxu1 %v3392_v63 }
  0x55   : > { %3113 = vmatmul.mubr.bf16.gmra.mxu0 %v3399_v1  ;;  %v1007_v1 = vshll.u32 %v931_v56, 16  ;;  %v3420_v56 = vld [vmem:[%s4059_s1 + $0x158] sm:$0xff]  }
  0x56   : > { %3145 = vmatpush3.bf16.msra.mxu0 %v3391_v62  ;;  %3137 = vmatmul.mubr.bf16.gmra.mxu1 %v3400_v3  ;;  %v1001_v62 = vshll.u32 %v930_v55, 16  ;;  %v1015_v3 = vshll.u32 %v932_v59, 16  ;;  %v3427_v55 = vld [vmem:[%s3686_s11 + $0xd8] ss:$8 sps:$4 sm:$0xff]  }
  0x57   : > { %3169 = vmatpush3.bf16.msra.mxu1 %v3392_v63  ;;  %3146 = vmatprep.subr.bf16.mxu0 %v3393_v0  ;;  %v3406_v63 = vld [vmem:[%s4059_s1 + $0xc0] sm:$0xff]   ;;  %v1009_v10 = vrot.slane %v1007_v1, 5 }
  0x58   : > { %3170 = vmatprep.subr.bf16.mxu1 %v3394_v2  ;;  %3180 = vmatprep.mubr.bf16.mxu1 %v3407_v38  ;;  %v1003_v6 = vrot.slane %v1001_v62, 5  ;;  %v1017_v12 = vrot.slane %v1015_v3, 5  ;;  %v3421_v3 = vld [vmem:[%s4059_s1 + $0x110] sm:$0xff]  }
  0x59   : > { %3156 = vmatprep.mubr.bf16.mxu0 %v2738_v53  ;;  %v3418_v53 = vld [vmem:[%s4059_s1 + $0x160] sm:$0xff]  }
  0x5a   : > { %3147 = vmatpush3.bf16.msra.mxu0 %v3393_v0  ;;  %v996_v0 = vsel %vm3751_vm2, %v991_v54, %v995_v51  ;;  %v1004_v15 = vor.u32 %v1003_v6, %v1000_v5  ;;  %v3416_v51 = vld [vmem:[%s3686_s11 + $0xc0] ss:$8 sps:$4 sm:$0xff]   ;;  %v3419_v54 = vld [vmem:[%s4059_s1 + $0x118] sm:$0xff]   ;;  %v3422_v6 = vld [vmem:[%s4059_s1 + $0x150] sm:$0xff]  }
  0x5b   : > { %3171 = vmatpush3.bf16.msra.mxu1 %v3394_v2  ;;  %3148 = vmatprep.subr.bf16.mxu0 %v3395_v8  ;;  %v1012_v2 = vshrl.u32 %v932_v59, 16  ;;  %v2739_v34 = vcombine.low %v982_v58, %v996_v0  ;;  %v2823_v58 = vld [vmem:[%s3686_s11 + $0x94] sm:$0x1]  ;;  %v2824_v59 = vld [vmem:[%s3686_s11 + $0x98] sm:$0xf] }
  0x5c   : > { %3172 = vmatprep.subr.bf16.mxu1 %v3396_v14  ;;  %v1005_v25 = vrot.slane %v1004_v15, 4  ;;  %v1580_v0 = vshrl.u32 %v2824_v59, 16  ;;  %v1583_v1 = vshll.u32 %v2824_v59, 16  ;;  %v2828_v15 = vld [vmem:[%s3686_s11 + $0xa8] sm:$0xf] }
  0x5d   : > { %v1014_v11 = vrot.slane %v1012_v2, 4  ;;  %v1589_v2 = vshll.u32 %v2825_v60, 16  ;;  %v1611_v22 = vshll.u32 %v2828_v15, 16  ;;  %v2835_v60 = vld [vmem:[%s3686_s11 + $0xc4] sm:$0x1] }
  0x5e   : > { %3149 = vmatpush3.bf16.msra.mxu0 %v3395_v8  ;;  %v935_v8 = vld [vmem:[%s3686_s11 + $0x34] sm:$0x1]  ;;  %v1010_v35 = vsel %vm3751_vm2, %v1005_v25, %v1009_v10  ;;  %v1585_v9 = vrot.slane %v1583_v1, 5  ;;  %v2836_v1 = vld [vmem:[%s3686_s11 + $0xc8] sm:$0xf] }
  0x5f   : > { %3173 = vmatpush3.bf16.msra.mxu1 %v3396_v14  ;;  %3150 = vmatprep.subr.bf16.mxu0 %v3401_v32  ;;  %v1029_v14 = vshll.u32 %v934_v4, 16  ;;  %v1035_v19 = vshll.u32 %v935_v8, 16  ;;  %v1018_v20 = vor.u32 %v1017_v12, %v1014_v11  ;;  %v1582_v8 = vrot.slane %v1580_v0, 4  ;;  %v2826_v12 = vld [vmem:[%s3686_s11 + $0xa0] sm:$0xf] }
  0x60   : > { %3174 = vmatprep.subr.bf16.mxu1 %v3402_v39  ;;  %v1591_v10 = vrot.slane %v1589_v2, 5  ;;  %v1594_v17 = vshrl.u32 %v2826_v12, 16 }
  0x61   : > { %v1031_v21 = vrot.slane %v1029_v14, 5  ;;  %v1019_v29 = vrot.slane %v1018_v20, 4  ;;  %v1037_v36 = vrot.slane %v1035_v19, 5  ;;  %v1586_v14 = vor.u32 %v1585_v9, %v1582_v8  ;;  %v3432_v9 = vld [vmem:[%s4059_s1 + $0x1f0] sm:$0xff]  }
  0x62   : > { %3151 = vmatpush3.bf16.msra.mxu0 %v3401_v32  ;;  %v1045_v32 = vrot.slane %v1043_v23, 5  ;;  %v1603_v20 = vshll.u32 %v2827_v13, 16  ;;  %v1664_v13 = vshrl.u32 %v2836_v1, 16 }
  0x63   : > { %3175 = vmatpush3.bf16.msra.mxu1 %v3402_v39  ;;  %3152 = vmatprep.subr.bf16.mxu0 %v3403_v48  ;;  %v1032_v30 = vor.u32 %v1031_v21, %v1028_v18  ;;  %v1024_v38 = vsel %vm3751_vm2, %v1019_v29, %v1023_v16  ;;  %v2829_v16 = vld [vmem:[%s3686_s11 + $0xac] sm:$0x1]  ;;  %v1597_v18 = vshll.u32 %v2826_v12, 16  ;;  %v1608_v21 = vshrl.u32 %v2828_v15, 16 }
  0x64   : > { %3176 = vmatprep.subr.bf16.mxu1 %v3404_v52  ;;  %v1046_v40 = vor.u32 %v1045_v32, %v1042_v31  ;;  %v2740_v44 = vcombine.low %v1010_v35, %v1024_v38  ;;  %v1587_v23 = vrot.slane %v1586_v14, 4  ;;  %v1617_v26 = vshll.u32 %v2829_v16, 16  ;;  %v3424_v31 = vld [vmem:[%s4059_s1 + $0x148] sm:$0xff]  }
  0x65   : > { %v1033_v39 = vrot.slane %v1032_v30, 4  ;;  %v1599_v25 = vrot.slane %v1597_v18, 5  ;;  %v1610_v29 = vrot.slane %v1608_v21, 4  ;;  %v1613_v30 = vrot.slane %v1611_v22, 5  ;;  %v3435_v21 = vld [vmem:[%s4059_s1 + $0x1a8] sm:$0xff]  }
  0x66   : > { %3153 = vmatpush3.bf16.msra.mxu0 %v3403_v48  ;;  %v1047_v45 = vrot.slane %v1046_v40, 4  ;;  %v1592_v32 = vsel %vm3751_vm2, %v1587_v23, %v1591_v10  ;;  %v1605_v35 = vrot.slane %v1603_v20, 5  ;;  %v1619_v38 = vrot.slane %v1617_v26, 5 }
  0x67   : > { %3177 = vmatpush3.bf16.msra.mxu1 %v3404_v52  ;;  %3154 = vmatprep.subr.bf16.mxu0 %v3405_v57  ;;  %v1038_v47 = vsel %vm3751_vm2, %v1033_v39, %v1037_v36  ;;  %v3417_v52 = vld [vmem:[%s4059_s1 + $0x120] sm:$0xff]   ;;  %v1659_v12 = vshll.u32 %v2835_v60, 16  ;;  %v1667_v15 = vshll.u32 %v2836_v1, 16  ;;  %v1666_v20 = vrot.slane %v1664_v13, 4  ;;  %v2946_v60 = vld [vmem:[%s3686_s11 + $0x28] sm:$0xf] }
  0x68   : > { %3178 = vmatprep.subr.bf16.mxu1 %v3406_v63  ;;  %v1052_v48 = vsel %vm3751_vm2, %v1047_v45, %v1051_v41  ;;  %v3425_v39 = vld [vmem:[%s4059_s1 + $0x100] sm:$0xff]   ;;  %v3429_v45 = vld [vmem:[%s4059_s1 + $0x1b8] sm:$0xff]   ;;  %v3452_v13 = vld [vmem:[%s4059_s1 + $0x230] sm:$0xff]  }
  0x69   : > { %v2741_v50 = vcombine.low %v1038_v47, %v1052_v48  ;;  %v3426_v41 = vld [vmem:[%s4059_s1 + $0x140] sm:$0xff]   ;;  %v2831_v47 = vld [vmem:[%s3686_s11 + $0xb4] sm:$0x1]  ;;  %v2832_v48 = vld [vmem:[%s3686_s11 + $0xb8] sm:$0xf]  ;;  %v1661_v23 = vrot.slane %v1659_v12, 5 }
  0x6a   : > { %3155 = vmatpush3.bf16.msra.mxu0 %v3405_v57  ;;  %v2822_v57 = vld [vmem:[%s3686_s11 + $0x90] sm:$0xf] }
  0x6b   : > { %3179 = vmatpush3.bf16.msra.mxu1 %v3406_v63  ;;  %3188 = vmatprep.subr.bf16.mxu0 %v3408_v24  ;;  %v1566_v61 = vshrl.u32 %v2822_v57, 16  ;;  %v1569_v62 = vshll.u32 %v2822_v57, 16  ;;  %v1575_v63 = vshll.u32 %v2823_v58, 16  ;;  %v1636_v57 = vshrl.u32 %v2832_v48, 16 }
  0x6c   : > { %3212 = vmatprep.subr.bf16.mxu1 %v3409_v27  ;;  %v1639_v58 = vshll.u32 %v2832_v48, 16  ;;  %v3445_v48 = vld [vmem:[%s4059_s1 + $0x180] sm:$0xff]  }
  0x6d   : > { %3157 = vmatmul.mubr.bf16.vlgmr.msra.gmra.mxu0 %v2739_v34  ;;  %v1568_v4 = vrot.slane %v1566_v61, 4  ;;  %v1571_v5 = vrot.slane %v1569_v62, 5  ;;  %v1577_v7 = vrot.slane %v1575_v63, 5 }
  0x6e   : > { %3181 = vmatmul.mubr.bf16.vlgmr.msra.gmra.mxu1 %v3410_v28  ;;  %3189 = vmatpush3.bf16.msra.mxu0 %v3408_v24  ;;  %v1596_v24 = vrot.slane %v1594_v17, 4  ;;  %v3433_v17 = vld [vmem:[%s3686_s11 + $0xf8] ss:$8 sps:$4 sm:$0xff]  }
  0x6f   : > { %3213 = vmatpush3.bf16.msra.mxu1 %v3409_v27  ;;  %3190 = vmatprep.subr.bf16.mxu0 %v3411_v37  ;;  %v1572_v11 = vor.u32 %v1571_v5, %v1568_v4  ;;  %v3423_v27 = vld [vmem:[%s4059_s1 + $0x108] sm:$0xff]   ;;  %v1638_v4 = vrot.slane %v1636_v57, 4  ;;  %v1641_v5 = vrot.slane %v1639_v58, 5  ;;  %v3448_v57 = vld [vmem:[%s3686_s11 + $0x18] ss:$8 sps:$4 sm:$0xff]  }
  0x70   : > { %3214 = vmatprep.subr.bf16.mxu1 %v3412_v43  ;;  %3160 = vmatprep.mubr.bf16.mxu0 %v2740_v44  ;;  %v1600_v34 = vor.u32 %v1599_v25, %v1596_v24  ;;  %v2830_v44 = vld [vmem:[%s3686_s11 + $0xb0] sm:$0xf]  ;;  %v1669_v24 = vrot.slane %v1667_v15, 5  ;;  %v3450_v58 = vld [vmem:[%s4059_s1 + $0x238] sm:$0xff]  }
  0x71   : > { %3184 = vmatprep.mubr.bf16.mxu1 %v3415_v42  ;;  %v1573_v19 = vrot.slane %v1572_v11, 4  ;;  %v1642_v14 = vor.u32 %v1641_v5, %v1638_v4  ;;  %v2949_v5 = vld [vmem:[%s3686_s11 + $0x34] sm:$0x1] }
  0x72   : > { %3191 = vmatpush3.bf16.msra.mxu0 %v3411_v37  ;;  %v1614_v37 = vor.u32 %v1613_v30, %v1610_v29  ;;  %v1601_v40 = vrot.slane %v1600_v34, 4  ;;  %v1670_v30 = vor.u32 %v1669_v24, %v1666_v20 }
  0x73   : > { %3215 = vmatpush3.bf16.msra.mxu1 %v3412_v43  ;;  %3192 = vmatprep.subr.bf16.mxu0 %v3413_v46  ;;  %v1578_v28 = vsel %vm3751_vm2, %v1573_v19, %v1577_v7  ;;  %v2837_v7 = vld [vmem:[%s3686_s11 + $0xcc] sm:$0x1]  ;;  %v1643_v22 = vrot.slane %v1642_v14, 4 }
  0x74   : > { %3216 = vmatprep.subr.bf16.mxu1 %v3414_v49  ;;  %v2854_v36 = vcombine.low %v1578_v28, %v1592_v32  ;;  %v1615_v42 = vrot.slane %v1614_v37, 4  ;;  %v1606_v43 = vsel %vm3751_vm2, %v1601_v40, %v1605_v35  ;;  %v1673_v16 = vshll.u32 %v2837_v7, 16  ;;  %v3434_v28 = vld [vmem:[%s3686_s11 + $0x108] ss:$8 sps:$4 sm:$0xff]   ;;  %v3437_v37 = vld [vmem:[%s4059_s1 + $0x1a0] sm:$0xff]  }
  0x75   : > { %3161 = vmatmul.mubr.bf16.gmra.mxu0 %v2741_v50  ;;  %v3430_v50 = vld [vmem:[%s4059_s1 + $0x1f8] sm:$0xff]   ;;  %v1671_v35 = vrot.slane %v1670_v30, 4  ;;  %v3447_v40 = vld [vmem:[%s3686_s11 + $0x8] ss:$8 sps:$4 sm:$0xff]   ;;  %v2249_v7 = vshll.u32 %v2946_v60, 16 }
  0x76   : > { %3193 = vmatpush3.bf16.msra.mxu0 %v3413_v46  ;;  %3185 = vmatmul.mubr.bf16.gmra.mxu1 %v3416_v51  ;;  %v1620_v46 = vsel %vm3751_vm2, %v1615_v42, %v1619_v38  ;;  %v3449_v42 = vld [vmem:[%s3686_s11 + $0x50] ss:$8 sps:$4 sm:$0xff]   ;;  %v3455_v30 = vld [vmem:[%s4059_s1 + $0x228] sm:$0xff]  }
  0x77   : > { %3217 = vmatpush3.bf16.msra.mxu1 %v3414_v49  ;;  %3194 = vmatprep.subr.bf16.mxu0 %v3417_v52  ;;  %v2833_v49 = vld [vmem:[%s3686_s11 + $0xbc] sm:$0x1]  ;;  %v2855_v51 = vcombine.low %v1606_v43, %v1620_v46  ;;  %v3443_v46 = vld [vmem:[%s4059_s1 + $0x188] sm:$0xff]  }
  0x78   : > { %3218 = vmatprep.subr.bf16.mxu1 %v3418_v53  ;;  %3204 = vmatprep.mubr.bf16.mxu0 %v3427_v55  ;;  %v2834_v55 = vld [vmem:[%s3686_s11 + $0xc0] sm:$0xf]  ;;  %v1645_v59 = vshll.u32 %v2833_v49, 16  ;;  %v3440_v43 = vld [vmem:[%s4059_s1 + $0x1d8] sm:$0xff]  }
  0x79   : > { %3228 = vmatprep.mubr.bf16.mxu1 %v2854_v36  ;;  %v1650_v61 = vshrl.u32 %v2834_v55, 16  ;;  %v1653_v2 = vshll.u32 %v2834_v55, 16  ;;  %v3446_v49 = vld [vmem:[%s4059_s1 + $0x1c0] sm:$0xff]  }
  0x7a   : > { %3195 = vmatpush3.bf16.msra.mxu0 %v3417_v52  ;;  %v1622_v52 = vshrl.u32 %v2830_v44, 16 }
  0x7b   : > { %3219 = vmatpush3.bf16.msra.mxu1 %v3418_v53  ;;  %3196 = vmatprep.subr.bf16.mxu0 %v3419_v54  ;;  %v1625_v53 = vshll.u32 %v2830_v44, 16  ;;  %v1652_v8 = vrot.slane %v1650_v61, 4  ;;  %v1655_v11 = vrot.slane %v1653_v2, 5  ;;  %v3441_v44 = vld [vmem:[%s4059_s1 + $0x190] sm:$0xff]   ;;  %v2947_v61 = vld [vmem:[%s3686_s11 + $0x2c] sm:$0x1] }
  0x7c   : > { %3220 = vmatprep.subr.bf16.mxu1 %v3420_v56  ;;  %v1624_v62 = vrot.slane %v1622_v52, 4  ;;  %v2940_v52 = vld [vmem:[%s3686_s11 + $0x10] sm:$0xf] }
  0x7d   : > { %v1627_v63 = vrot.slane %v1625_v53, 5  ;;  %v1656_v19 = vor.u32 %v1655_v11, %v1652_v8  ;;  %v2941_v53 = vld [vmem:[%s3686_s11 + $0x14] sm:$0x1]  ;;  %v2948_v2 = vld [vmem:[%s3686_s11 + $0x30] sm:$0xf] }
  0x7e   : > { %3197 = vmatpush3.bf16.msra.mxu0 %v3419_v54  ;;  %v1631_v54 = vshll.u32 %v2831_v47, 16  ;;  %v3444_v47 = vld [vmem:[%s4059_s1 + $0x1c8] sm:$0xff]   ;;  %v2213_v4 = vshll.u32 %v2941_v53, 16  ;;  %v2260_v11 = vshrl.u32 %v2948_v2, 16  ;;  %v2263_v12 = vshll.u32 %v2948_v2, 16 }
  0x7f   : > { %3221 = vmatpush3.bf16.msra.mxu1 %v3420_v56  ;;  %3198 = vmatprep.subr.bf16.mxu0 %v3421_v3  ;;  %v3428_v56 = vld [vmem:[%s3686_s11 + $0xe8] ss:$8 sps:$4 sm:$0xff]   ;;  %v1628_v10 = vor.u32 %v1627_v63, %v1624_v62  ;;  %v1657_v26 = vrot.slane %v1656_v19, 4 }
  0x80   : > { %3222 = vmatprep.subr.bf16.mxu1 %v3422_v6  ;;  %v1633_v0 = vrot.slane %v1631_v54, 5  ;;  %v3451_v8 = vld [vmem:[%s3686_s11 + $0x60] ss:$8 sps:$4 sm:$0xff]   ;;  %v2262_v20 = vrot.slane %v2260_v11, 4 }
  0x81   : > { %v1629_v18 = vrot.slane %v1628_v10, 4  ;;  %v1662_v34 = vsel %vm3751_vm2, %v1657_v26, %v1661_v23  ;;  %v2255_v10 = vshll.u32 %v2947_v61, 16 }
  0x82   : > { %3199 = vmatpush3.bf16.msra.mxu0 %v3421_v3  ;;  %v3431_v3 = vld [vmem:[%s4059_s1 + $0x1b0] sm:$0xff]  }
  0x83   : > { %3223 = vmatpush3.bf16.msra.mxu1 %v3422_v6  ;;  %3200 = vmatprep.subr.bf16.mxu0 %v3423_v27  ;;  %v1647_v6 = vrot.slane %v1645_v59, 5  ;;  %v1634_v25 = vsel %vm3751_vm2, %v1629_v18, %v1633_v0  ;;  %v2207_v59 = vshll.u32 %v2940_v52, 16  ;;  %v3453_v18 = vld [vmem:[%s3686_s11 + $0x28] ss:$8 sps:$4 sm:$0xff]  }
  0x84   : > { %3224 = vmatprep.subr.bf16.mxu1 %v3424_v31 }
  0x85   : > { %v1648_v29 = vsel %vm3751_vm2, %v1643_v22, %v1647_v6  ;;  %v2246_v6 = vshrl.u32 %v2946_v60, 16  ;;  %v3456_v22 = vld [vmem:[%s3686_s11 + $0x70] ss:$8 sps:$4 sm:$0xff]  }
  0x86   : > { %3201 = vmatpush3.bf16.msra.mxu0 %v3423_v27  ;;  %v1675_v27 = vrot.slane %v1673_v16, 5  ;;  %v2856_v32 = vcombine.low %v1634_v25, %v1648_v29  ;;  %v2251_v16 = vrot.slane %v2249_v7, 5  ;;  %v2215_v25 = vrot.slane %v2213_v4, 5  ;;  %v2953_v4 = vld [vmem:[%s3686_s11 + $0x44] sm:$0x1] }
  0x87   : > { %3225 = vmatpush3.bf16.msra.mxu1 %v3424_v31  ;;  %3202 = vmatprep.subr.bf16.mxu0 %v3425_v39  ;;  %v3436_v31 = vld [vmem:[%s4059_s1 + $0x1e8] sm:$0xff]   ;;  %v2248_v15 = vrot.slane %v2246_v6, 4 }
  0x88   : > { %3226 = vmatprep.subr.bf16.mxu1 %v3426_v41  ;;  %v1676_v36 = vsel %vm3751_vm2, %v1671_v35, %v1675_v27  ;;  %v2257_v27 = vrot.slane %v2255_v10, 5 }
  0x89   : > { %v2857_v38 = vcombine.low %v1662_v34, %v1676_v36  ;;  %v2252_v26 = vor.u32 %v2251_v16, %v2248_v15  ;;  %v3454_v34 = vld [vmem:[%s3686_s11 + $0x38] ss:$8 sps:$4 sm:$0xff]  }
  0x8a   : > { %3203 = vmatpush3.bf16.msra.mxu0 %v3425_v39  ;;  %v3438_v39 = vld [vmem:[%s4059_s1 + $0x1e0] sm:$0xff]  }
  0x8b   : > { %3227 = vmatpush3.bf16.msra.mxu1 %v3426_v41  ;;  %3236 = vmatprep.subr.bf16.mxu0 %v3429_v45  ;;  %v3439_v41 = vld [vmem:[%s4059_s1 + $0x198] sm:$0xff]  }
  0x8c   : > { %3260 = vmatprep.subr.bf16.mxu1 %v3430_v50 }
  0x8d   : > { %3205 = vmatmul.mubr.bf16.vlgmr.msra.gmra.mxu0 %v3428_v56  ;;  %v2204_v56 = vshrl.u32 %v2940_v52, 16 }
  0x8e   : > { %3229 = vmatmul.mubr.bf16.vlgmr.msra.gmra.mxu1 %v2855_v51  ;;  %3237 = vmatpush3.bf16.msra.mxu0 %v3429_v45  ;;  %v3442_v45 = vld [vmem:[%s4059_s1 + $0x1d0] sm:$0xff]   ;;  %v2939_v51 = vld [vmem:[%s3686_s11 + $0xc] sm:$0x1] }
  0x8f   : > { %3261 = vmatpush3.bf16.msra.mxu1 %v3430_v50  ;;  %3238 = vmatprep.subr.bf16.mxu0 %v3431_v3  ;;  %v2938_v50 = vld [vmem:[%s3686_s11 + $0x8] sm:$0xf]  ;;  %v2199_v0 = vshll.u32 %v2939_v51, 16  ;;  %v2206_v1 = vrot.slane %v2204_v56, 4  ;;  %v3459_v51 = vld [vmem:[%s4059_s1 + $0x218] sm:$0xff]   ;;  %v3460_v56 = vld [vmem:[%s4059_s1 + $0x210] sm:$0xff]  }
  0x90   : > { %3262 = vmatprep.subr.bf16.mxu1 %v3432_v9  ;;  %3208 = vmatprep.mubr.bf16.mxu0 %v3433_v17  ;;  %v2190_v54 = vshrl.u32 %v2938_v50, 16  ;;  %v2193_v55 = vshll.u32 %v2938_v50, 16  ;;  %v2269_v17 = vshll.u32 %v2949_v5, 16 }
  0x91   : > { %3232 = vmatprep.mubr.bf16.mxu1 %v2856_v32  ;;  %v2201_v19 = vrot.slane %v2199_v0, 5 }
  0x92   : > { %3239 = vmatpush3.bf16.msra.mxu0 %v3431_v3  ;;  %v2192_v62 = vrot.slane %v2190_v54, 4  ;;  %v2195_v63 = vrot.slane %v2193_v55, 5  ;;  %v2209_v3 = vrot.slane %v2207_v59, 5  ;;  %v2271_v29 = vrot.slane %v2269_v17, 5 }
  0x93   : > { %3263 = vmatpush3.bf16.msra.mxu1 %v3432_v9  ;;  %3240 = vmatprep.subr.bf16.mxu0 %v3435_v21 }
  0x94   : > { %3264 = vmatprep.subr.bf16.mxu1 %v3436_v31  ;;  %v2196_v9 = vor.u32 %v2195_v63, %v2192_v62  ;;  %v2210_v14 = vor.u32 %v2209_v3, %v2206_v1  ;;  %v2945_v62 = vld [vmem:[%s3686_s11 + $0x24] sm:$0x1]  ;;  %v2951_v3 = vld [vmem:[%s3686_s11 + $0x3c] sm:$0x1] }
  0x95   : > { %3209 = vmatmul.mubr.bf16.gmra.mxu0 %v3434_v28  ;;  %v2283_v11 = vshll.u32 %v2951_v3, 16 }
  0x96   : > { %3241 = vmatpush3.bf16.msra.mxu0 %v3435_v21  ;;  %3233 = vmatmul.mubr.bf16.gmra.mxu1 %v2857_v38  ;;  %v2265_v21 = vrot.slane %v2263_v12, 5  ;;  %v2197_v23 = vrot.slane %v2196_v9, 4  ;;  %v2211_v24 = vrot.slane %v2210_v14, 4  ;;  %v3461_v9 = vld [vmem:[%s4059_s1 + $0x208] sm:$0xff]  }
  0x97   : > { %3265 = vmatpush3.bf16.msra.mxu1 %v3436_v31  ;;  %3242 = vmatprep.subr.bf16.mxu0 %v3437_v37  ;;  %v2253_v31 = vrot.slane %v2252_v26, 4 }
  0x98   : > { %3266 = vmatprep.subr.bf16.mxu1 %v3438_v39  ;;  %3252 = vmatprep.mubr.bf16.mxu0 %v3447_v40  ;;  %v2266_v28 = vor.u32 %v2265_v21, %v2262_v20  ;;  %v2202_v35 = vsel %vm3751_vm2, %v2197_v23, %v2201_v19  ;;  %v2216_v36 = vsel %vm3751_vm2, %v2211_v24, %v2215_v25  ;;  %v3458_v40 = vld [vmem:[%s4059_s1 + $0x220] sm:$0xff]   ;;  %v2285_v20 = vrot.slane %v2283_v11, 5 }
  0x99   : > { %3276 = vmatprep.mubr.bf16.mxu1 %v3449_v42  ;;  %v2258_v38 = vsel %vm3751_vm2, %v2253_v31, %v2257_v27  ;;  %v2944_v42 = vld [vmem:[%s3686_s11 + $0x20] sm:$0xf] }
  0x9a   : > { %3243 = vmatpush3.bf16.msra.mxu0 %v3437_v37  ;;  %v2267_v32 = vrot.slane %v2266_v28, 4  ;;  %v3457_v37 = vld [vmem:[%s3686_s11 + $0x80] ss:$8 sps:$4 sm:$0xff]   ;;  %v2235_v50 = vshll.u32 %v2944_v42, 16 }
  0x9b   : > { %3267 = vmatpush3.bf16.msra.mxu1 %v3438_v39  ;;  %3244 = vmatprep.subr.bf16.mxu0 %v3439_v41 }
  0x9c   : > { %3268 = vmatprep.subr.bf16.mxu1 %v3440_v43  ;;  %v2272_v39 = vsel %vm3751_vm2, %v2267_v32, %v2271_v29  ;;  %v2237_v61 = vrot.slane %v2235_v50, 5 }
  0x9e   : > { %3245 = vmatpush3.bf16.msra.mxu0 %v3439_v41  ;;  %v2942_v41 = vld [vmem:[%s3686_s11 + $0x18] sm:$0xf] }
  0x9f   : > { %3269 = vmatpush3.bf16.msra.mxu1 %v3440_v43  ;;  %3246 = vmatprep.subr.bf16.mxu0 %v3441_v44  ;;  %v2970_v43 = vcombine.low %v2202_v35, %v2216_v36 }
  0xa0   : > { %3270 = vmatprep.subr.bf16.mxu1 %v3442_v45 }
  0xa2   : > { %3247 = vmatpush3.bf16.msra.mxu0 %v3441_v44  ;;  %v2950_v44 = vld [vmem:[%s3686_s11 + $0x38] sm:$0xf] }
  0xa3   : > { %3271 = vmatpush3.bf16.msra.mxu1 %v3442_v45  ;;  %3248 = vmatprep.subr.bf16.mxu0 %v3443_v46  ;;  %v2952_v45 = vld [vmem:[%s3686_s11 + $0x40] sm:$0xf]  ;;  %v2274_v52 = vshrl.u32 %v2950_v44, 16  ;;  %v2277_v53 = vshll.u32 %v2950_v44, 16 }
  0xa4   : > { %3272 = vmatprep.subr.bf16.mxu1 %v3444_v47  ;;  %v2288_v54 = vshrl.u32 %v2952_v45, 16  ;;  %v2291_v55 = vshll.u32 %v2952_v45, 16 }
  0xa5   : > { %v2276_v63 = vrot.slane %v2274_v52, 4  ;;  %v2279_v0 = vrot.slane %v2277_v53, 5 }
  0xa6   : > { %3249 = vmatpush3.bf16.msra.mxu0 %v3443_v46  ;;  %v2972_v46 = vcombine.low %v2258_v38, %v2272_v39  ;;  %v2290_v1 = vrot.slane %v2288_v54, 4  ;;  %v2293_v2 = vrot.slane %v2291_v55, 5 }
  0xa7   : > { %3273 = vmatpush3.bf16.msra.mxu1 %v3444_v47  ;;  %3250 = vmatprep.subr.bf16.mxu0 %v3445_v48  ;;  %v2218_v47 = vshrl.u32 %v2942_v41, 16  ;;  %v2280_v10 = vor.u32 %v2279_v0, %v2276_v63 }
  0xa8   : > { %3274 = vmatprep.subr.bf16.mxu1 %v3446_v49  ;;  %v2294_v12 = vor.u32 %v2293_v2, %v2290_v1 }
  0xa9   : > { %v2281_v19 = vrot.slane %v2280_v10, 4 }
  0xaa   : > { %3251 = vmatpush3.bf16.msra.mxu0 %v3445_v48  ;;  %v2221_v48 = vshll.u32 %v2942_v41, 16  ;;  %v2295_v21 = vrot.slane %v2294_v12, 4 }
  0xab   : > { %3275 = vmatpush3.bf16.msra.mxu1 %v3446_v49  ;;  %3284 = vmatprep.subr.bf16.mxu0 %v3450_v58  ;;  %v2232_v49 = vshrl.u32 %v2944_v42, 16  ;;  %v2286_v25 = vsel %vm3751_vm2, %v2281_v19, %v2285_v20 }
  0xac   : > { %3308 = vmatprep.subr.bf16.mxu1 %v3450_v58  ;;  %v2223_v59 = vrot.slane %v2221_v48, 5 }
  0xad   : > { %3253 = vmatmul.mubr.bf16.vlgmr.msra.gmra.mxu0 %v3448_v57  ;;  %v2943_v57 = vld [vmem:[%s3686_s11 + $0x1c] sm:$0x1]  ;;  %v2234_v60 = vrot.slane %v2232_v49, 4 }
  0xae   : > { %3277 = vmatmul.mubr.bf16.vlgmr.msra.gmra.mxu1 %v3451_v8  ;;  %3285 = vmatpush3.bf16.msra.mxu0 %v3450_v58  ;;  %v2227_v6 = vshll.u32 %v2943_v57, 16  ;;  %v2241_v8 = vshll.u32 %v2945_v62, 16 }
  0xaf   : > { %3316 = vmatpush3.bf16.msra.mxu1 %v3450_v58  ;;  %3286 = vmatprep.subr.bf16.mxu0 %v3452_v13  ;;  %v2220_v58 = vrot.slane %v2218_v47, 4  ;;  %v2238_v7 = vor.u32 %v2237_v61, %v2234_v60 }
  0xb0   : > { %3309 = vmatprep.subr.bf16.mxu1 %v3452_v13  ;;  %3256 = vmatprep.mubr.bf16.mxu0 %v3453_v18  ;;  %v2229_v15 = vrot.slane %v2227_v6, 5  ;;  %v2243_v17 = vrot.slane %v2241_v8, 5  ;;  %v3462_v18 = vld [vmem:[%s4059_s1 + $0x200] sm:$0xff]  }
  0xb1   : > { %3280 = vmatprep.mubr.bf16.mxu1 %v3456_v22  ;;  %v2224_v5 = vor.u32 %v2223_v59, %v2220_v58  ;;  %v2239_v16 = vrot.slane %v2238_v7, 4 }
  0xb2   : > { %3287 = vmatpush3.bf16.msra.mxu0 %v3452_v13 }
  0xb3   : > { %3317 = vmatpush3.bf16.msra.mxu1 %v3452_v13  ;;  %3288 = vmatprep.subr.bf16.mxu0 %v3455_v30  ;;  %v2297_v13 = vshll.u32 %v2953_v4, 16  ;;  %v2225_v14 = vrot.slane %v2224_v5, 4  ;;  %v2244_v24 = vsel %vm3751_vm2, %v2239_v16, %v2243_v17 }
  0xb4   : > { %3310 = vmatprep.subr.bf16.mxu1 %v3455_v30 }
  0xb5   : > { %3257 = vmatmul.mubr.bf16.gmra.mxu0 %v3454_v34  ;;  %v2299_v22 = vrot.slane %v2297_v13, 5  ;;  %v2230_v23 = vsel %vm3751_vm2, %v2225_v14, %v2229_v15 }
  0xb6   : > { %3289 = vmatpush3.bf16.msra.mxu0 %v3455_v30  ;;  %3281 = vmatmul.mubr.bf16.gmra.mxu1 %v3457_v37  ;;  %v2971_v27 = vcombine.low %v2230_v23, %v2244_v24 }
  0xb7   : > { %3318 = vmatpush3.bf16.msra.mxu1 %v3455_v30  ;;  %3290 = vmatprep.subr.bf16.mxu0 %v3458_v40  ;;  %v2300_v26 = vsel %vm3751_vm2, %v2295_v21, %v2299_v22 }
  0xb8   : > { %3311 = vmatprep.subr.bf16.mxu1 %v3458_v40  ;;  %3300 = vmatprep.mubr.bf16.mxu0 %v2970_v43  ;;  %v2973_v28 = vcombine.low %v2286_v25, %v2300_v26 }
  0xb9   : > { %3304 = vmatprep.mubr.bf16.mxu1 %v2972_v46 }
  0xba   : > { %3291 = vmatpush3.bf16.msra.mxu0 %v3458_v40 }
  0xbb   : > { %3319 = vmatpush3.bf16.msra.mxu1 %v3458_v40  ;;  %3292 = vmatprep.subr.bf16.mxu0 %v3459_v51 }
  0xbc   : > { %3312 = vmatprep.subr.bf16.mxu1 %v3459_v51 }
  0xbe   : > { %3293 = vmatpush3.bf16.msra.mxu0 %v3459_v51 }
  0xbf   : > { %3320 = vmatpush3.bf16.msra.mxu1 %v3459_v51  ;;  %3294 = vmatprep.subr.bf16.mxu0 %v3460_v56 }
  0xc0   : > { %3313 = vmatprep.subr.bf16.mxu1 %v3460_v56 }
  0xc2   : > { %3295 = vmatpush3.bf16.msra.mxu0 %v3460_v56 }
  0xc3   : > { %3321 = vmatpush3.bf16.msra.mxu1 %v3460_v56  ;;  %3296 = vmatprep.subr.bf16.mxu0 %v3461_v9 }
  0xc4   : > { %3314 = vmatprep.subr.bf16.mxu1 %v3461_v9 }
  0xc6   : > { %3297 = vmatpush3.bf16.msra.mxu0 %v3461_v9 }
  0xc7   : > { %3322 = vmatpush3.bf16.msra.mxu1 %v3461_v9  ;;  %3298 = vmatprep.subr.bf16.mxu0 %v3462_v18 }
  0xc8   : > { %3315 = vmatprep.subr.bf16.mxu1 %v3462_v18 }
  0xca   : > { %3299 = vmatpush3.bf16.msra.mxu0 %v3462_v18 }
  0xcb   : > { %3323 = vmatpush3.bf16.msra.mxu1 %v3462_v18 }
  0xcd   : > { %3301 = vmatmul.mubr.bf16.vlgmr.msra.gmra.mxu0 %v2971_v27 }
  0xce   : > { %3305 = vmatmul.mubr.bf16.vlgmr.msra.gmra.mxu1 %v2973_v28 }
 0x10d   : > { %v3110_v29 = vpop.f32.mrf.mxu0 }
 0x10e   : > { %v3134_v30 = vpop.f32.mrf.mxu1 }
 0x10f   : > { %v754_v31 = vpop.f32.mrf.mxu0  ;;  %v900_v19 = vadd.f32 %v3134_v30, %v3110_v29 }
 0x110   : > { %v891_v32 = vpop.f32.mrf.mxu1 }
 0x111   : > { %v3111_v34 = vpop.f32.mrf.mxu0  ;;  %v892_v22 = vadd.f32 %v891_v32, %v754_v31 }
 0x112   : > { %v3135_v35 = vpop.f32.mrf.mxu1 }
 0x113   : > { %v757_v36 = vpop.f32.mrf.mxu0  ;;  %v903_v27 = vadd.f32 %v3135_v35, %v3111_v34 }
 0x114   : > { %v894_v37 = vpop.f32.mrf.mxu1 }
 0x115   : > { %v3114_v38 = vpop.f32.mrf.mxu0 }
 0x116   : > { %v3138_v39 = vpop.f32.mrf.mxu1 }
 0x117   : > { %v770_v40 = vpop.f32.mrf.mxu0  ;;  %v916_v20 = vadd.f32 %v3138_v39, %v3114_v38 }
 0x118   : > { %v907_v33 = vpop.f32.mrf.mxu1 }
 0x119   : > { %v3115_v41 = vpop.f32.mrf.mxu0  ;;  %v908_v25 = vadd.f32 %v907_v33, %v770_v40 }
 0x11a   : > { %v3139_v42 = vpop.f32.mrf.mxu1 }
 0x11b   : > { %v773_v43 = vpop.f32.mrf.mxu0 }
 0x11c   : > { %v910_v44 = vpop.f32.mrf.mxu1 }
 0x11d   : > { %v911_v30 = vadd.f32 %v910_v44, %v773_v43 }
 0x12d   : > { %v3158_v45 = vpop.f32.mrf.mxu0 }
 0x12e   : > { %v3182_v46 = vpop.f32.mrf.mxu1  ;;  %v1201_v23 = vadd.f32 %v3158_v45, %v900_v19 }
 0x12f   : > { %v1168_v47 = vpop.f32.mrf.mxu0 }
 0x130   : > { %v1339_v48 = vpop.f32.mrf.mxu1  ;;  %v1199_v28 = vadd.f32 %v1168_v47, %v892_v22 }
 0x131   : > { %v3159_v49 = vpop.f32.mrf.mxu0 }
 0x132   : > { %v3183_v50 = vpop.f32.mrf.mxu1 }
 0x133   : > { %v1171_v51 = vpop.f32.mrf.mxu0 }
 0x134   : > { %v3997_v52 = vpop.f32.mrf.mxu1 }
 0x135   : > { %4065 = vst [vmem:[#allocation3_spill] sm:$0xff] %v3997_v52  ;;  %v3162_v53 = vpop.f32.mrf.mxu0  ;;  %v1372_v52 = vadd.f32 %v3182_v46, %v1201_v23 }
 0x136   : > { %v3186_v54 = vpop.f32.mrf.mxu1  ;;  %v1205_v26 = vadd.f32 %v3162_v53, %v916_v20 }
 0x137   : > { %v1184_v55 = vpop.f32.mrf.mxu0 }
 0x138   : > { %v1355_v56 = vpop.f32.mrf.mxu1  ;;  %v1376_v38 = vadd.f32 %v3186_v54, %v1205_v26 }
 0x139   : > { %v3163_v57 = vpop.f32.mrf.mxu0 }
 0x13a   : > { %v3187_v58 = vpop.f32.mrf.mxu1 }
 0x13b   : > { %v1187_v59 = vpop.f32.mrf.mxu0 }
 0x13c   : > { %v1358_v60 = vpop.f32.mrf.mxu1  ;;  %v1204_v40 = vadd.f32 %v1187_v59, %v911_v30 }
 0x13e   : > { %v1375_v43 = vadd.f32 %v1358_v60, %v1204_v40 }
 0x14d   : > { %v3206_v61 = vpop.f32.mrf.mxu0 }
 0x14e   : > { %v3230_v62 = vpop.f32.mrf.mxu1  ;;  %v1543_v32 = vadd.f32 %v3206_v61, %v1372_v52 }
 0x14f   : > { %v1510_v63 = vpop.f32.mrf.mxu0 }
 0x150   : > { %v1792_v0 = vpop.f32.mrf.mxu1  ;;  %v1825_v46 = vadd.f32 %v3230_v62, %v1543_v32 }
 0x151   : > { %v3207_v1 = vpop.f32.mrf.mxu0 }
 0x152   : > { %v3999_v2 = vpop.f32.mrf.mxu1 }
 0x153   : > { %4066 = vst [vmem:[#allocation4_spill] sm:$0xff] %v3999_v2  ;;  %v1513_v3 = vpop.f32.mrf.mxu0 }
 0x154   : > { %v4001_v4 = vpop.f32.mrf.mxu1 }
 0x155   : > { %4067 = vst [vmem:[#allocation5_spill] sm:$0xff] %v4001_v4  ;;  %v3210_v5 = vpop.f32.mrf.mxu0  ;;  %v1203_v4 = vadd.f32 %v1184_v55, %v908_v25 }
 0x156   : > { %v3234_v6 = vpop.f32.mrf.mxu1  ;;  %v1547_v33 = vadd.f32 %v3210_v5, %v1376_v38 }
 0x157   : > { %v1526_v7 = vpop.f32.mrf.mxu0  ;;  %v1374_v45 = vadd.f32 %v1355_v56, %v1203_v4 }
 0x158   : > { %v1808_v8 = vpop.f32.mrf.mxu1  ;;  %v1829_v44 = vadd.f32 %v3234_v6, %v1547_v33 }
 0x159   : > { %v3211_v9 = vpop.f32.mrf.mxu0  ;;  %v1545_v53 = vadd.f32 %v1526_v7, %v1374_v45 }
 0x15a   : > { %v3235_v10 = vpop.f32.mrf.mxu1  ;;  %v4073_v61 = vld [vmem:[#allocation4_spill] sm:$0xff] }
 0x15b   : > { %v1529_v11 = vpop.f32.mrf.mxu0 }
 0x15c   : > { %v4003_v12 = vpop.f32.mrf.mxu1  ;;  %v1546_v59 = vadd.f32 %v1529_v11, %v1375_v43 }
 0x15d   : > { %4068 = vst [vmem:[#allocation6_spill] sm:$0xff] %v4003_v12  ;;  %v919_v12 = vadd.f32 %v3139_v42, %v3115_v41 }
 0x15f   : > { %v1206_v39 = vadd.f32 %v3163_v57, %v919_v12  ;;  %v1827_v57 = vadd.f32 %v1808_v8, %v1545_v53 }
 0x161   : > { %v1377_v47 = vadd.f32 %v3187_v58, %v1206_v39 }
 0x164   : > { %v4075_v12 = vld [vmem:[#allocation6_spill] sm:$0xff] }
 0x16d   : > { %v3254_v13 = vpop.f32.mrf.mxu0 }
 0x16e   : > { %v3278_v14 = vpop.f32.mrf.mxu1  ;;  %v1996_v55 = vadd.f32 %v3254_v13, %v1825_v46 }
 0x16f   : > { %v1963_v15 = vpop.f32.mrf.mxu0 }
 0x170   : > { %v4005_v16 = vpop.f32.mrf.mxu1  ;;  %v2167_v60 = vadd.f32 %v3278_v14, %v1996_v55 }
 0x171   : > { %4069 = vst [vmem:[#allocation7_spill] sm:$0xff] %v4005_v16  ;;  %v3255_v17 = vpop.f32.mrf.mxu0  ;;  %v895_v16 = vadd.f32 %v894_v37, %v757_v36  ;;  %v4072_v36 = vld [vmem:[#allocation3_spill] sm:$0xff] }
 0x172   : > { %v4007_v18 = vpop.f32.mrf.mxu1 }
 0x173   : > { %4070 = vst [vmem:[#allocation8_spill] sm:$0xff] %v4007_v18  ;;  %v4009_v21 = vpop.f32.mrf.mxu0  ;;  %v1202_v18 = vadd.f32 %v3159_v49, %v903_v27  ;;  %v1200_v31 = vadd.f32 %v1171_v51, %v895_v16 }
 0x174   : > { %4071 = vst [vmem:[#allocation9_spill] sm:$0xff] %v4009_v21  ;;  %v4011_v24 = vpop.f32.mrf.mxu1  ;;  %v1370_v21 = vadd.f32 %v1339_v48, %v1199_v28  ;;  %v1548_v48 = vadd.f32 %v3211_v9, %v1377_v47 }
 0x175   : > { %v3258_v2 = vpop.f32.mrf.mxu0  ;;  %v1373_v35 = vadd.f32 %v3183_v50, %v1202_v18  ;;  %v1371_v37 = vadd.f32 %v4072_v36, %v1200_v31 }
 0x176   : > { %v3282_v29 = vpop.f32.mrf.mxu1  ;;  %v1541_v41 = vadd.f32 %v1510_v63, %v1370_v21  ;;  %v2000_v50 = vadd.f32 %v3258_v2, %v1829_v44  ;;  %v1830_v4 = vadd.f32 %v3235_v10, %v1548_v48 }
 0x177   : > { %v1979_v34 = vpop.f32.mrf.mxu0  ;;  %v1544_v49 = vadd.f32 %v3207_v1, %v1373_v35  ;;  %v1542_v54 = vadd.f32 %v1513_v3, %v1371_v37  ;;  %v4074_v1 = vld [vmem:[#allocation5_spill] sm:$0xff] }
 0x178   : > { %v2150_v42 = vpop.f32.mrf.mxu1  ;;  %v1823_v52 = vadd.f32 %v1792_v0, %v1541_v41  ;;  %v1998_v5 = vadd.f32 %v1979_v34, %v1827_v57  ;;  %v1828_v0 = vadd.f32 %v4075_v12, %v1546_v59  ;;  %v2171_v3 = vadd.f32 %v3282_v29, %v2000_v50  ;;  %v4076_v8 = vld [vmem:[#allocation7_spill] sm:$0xff] }
 0x179   : > { %v3259_v51 = vpop.f32.mrf.mxu0  ;;  %v1826_v63 = vadd.f32 %v4073_v61, %v1544_v49  ;;  %v1824_v7 = vadd.f32 %v4074_v1, %v1542_v54 }
 0x17a   : > { %v3283_v56 = vpop.f32.mrf.mxu1  ;;  %v1994_v58 = vadd.f32 %v1963_v15, %v1823_v52  ;;  %v2001_v13 = vadd.f32 %v3259_v51, %v1830_v4  ;;  %v4078_v21 = vld [vmem:[#allocation8_spill] sm:$0xff] }
 0x17b   : > { %v1982_v62 = vpop.f32.mrf.mxu0  ;;  %v1997_v6 = vadd.f32 %v3255_v17, %v1826_v63  ;;  %v4077_v11 = vld [vmem:[#allocation9_spill] sm:$0xff]  ;;  %v2169_v17 = vadd.f32 %v2150_v42, %v1998_v5 }
 0x17c   : > { %v2153_v9 = vpop.f32.mrf.mxu1  ;;  %v2165_v10 = vadd.f32 %v4076_v8, %v1994_v58  ;;  %v1995_v15 = vadd.f32 %v4077_v11, %v1824_v7  ;;  %v1999_v18 = vadd.f32 %v1982_v62, %v1828_v0  ;;  %v2172_v26 = vadd.f32 %v3283_v56, %v2001_v13 }
 0x17d   : > { %v2168_v22 = vadd.f32 %v4078_v21, %v1997_v6 }
 0x17e   : > { %v2166_v29 = vadd.f32 %v4011_v24, %v1995_v15  ;;  %v2170_v39 = vadd.f32 %v2153_v9, %v1999_v18 }
 0x18d   : > { %v3302_v2 = vpop.f32.mrf.mxu0 }
 0x18e   : > { %v2449_v14 = vadd.f32 %v3302_v2, %v2167_v60  ;;  %v3306_v16 = vpop.f32.mrf.mxu1 }
 0x18f   : > { %v2453_v19 = vadd.f32 %v3306_v16, %v2171_v3  ;;  %v2416_v20 = vpop.f32.mrf.mxu0 }
 0x190   : > { %2457 = vst [vmem:[%s4021_s28 + $0x10] sm:$0xff] %v2449_v14  ;;  %v2447_v23 = vadd.f32 %v2416_v20, %v2165_v10  ;;  %v2432_v25 = vpop.f32.mrf.mxu1  ;;  %v2479_v42 = vmul.f32 %v2449_v14, %v2449_v14 }
 0x191   : > { %2461 = vst [vmem:[%s4021_s28 + $0x30] sm:$0xff] %v2453_v19  ;;  %v2451_v27 = vadd.f32 %v2432_v25, %v2169_v17  ;;  %v3303_v28 = vpop.f32.mrf.mxu0  ;;  %v2483_v52 = vmul.f32 %v2453_v19, %v2453_v19 }
 0x192   : > { %2455 = vst [vmem:[%s4021_s28] sm:$0xff] %v2447_v23  ;;  %v2450_v30 = vadd.f32 %v3303_v28, %v2168_v22  ;;  %v3307_v38 = vpop.f32.mrf.mxu1  ;;  %v2477_v34 = vmul.f32 %v2447_v23, %v2447_v23 }
 0x193   : > { %2459 = vst [vmem:[%s4021_s28 + $0x20] sm:$0xff] %v2451_v27  ;;  %v2454_v31 = vadd.f32 %v3307_v38, %v2172_v26  ;;  %v2419_v32 = vpop.f32.mrf.mxu0  ;;  %v2481_v46 = vmul.f32 %v2451_v27, %v2451_v27 }
 0x194   : > { %2458 = vst [vmem:[%s4021_s28 + $0x18] sm:$0xff] %v2450_v30  ;;  %v2448_v45 = vadd.f32 %v2419_v32, %v2166_v29  ;;  %v2435_v40 = vpop.f32.mrf.mxu1  ;;  %v2480_v53 = vmul.f32 %v2450_v30, %v2450_v30 }
 0x195   : > { %2462 = vst [vmem:[%s4021_s28 + $0x38] sm:$0xff] %v2454_v31  ;;  %v2452_v33 = vadd.f32 %v2435_v40, %v2170_v39  ;;  %v2484_v56 = vmul.f32 %v2454_v31, %v2454_v31 }
 0x196   : > { %2456 = vst [vmem:[%s4021_s28 + $0x8] sm:$0xff] %v2448_v45  ;;  %v2463_v35 = vadd.f32 %v2448_v45, %v2447_v23  ;;  %v2478_v41 = vmul.f32 %v2448_v45, %v2448_v45 }
 0x197   : > { %2460 = vst [vmem:[%s4021_s28 + $0x28] sm:$0xff] %v2452_v33  ;;  %v2482_v48 = vmul.f32 %v2452_v33, %v2452_v33 }
 0x198   : > { %v2464_v24 = vadd.f32 %v2463_v35, %v2449_v14  ;;  %v2485_v47 = vadd.f32 %v2478_v41, %v2477_v34 }
 0x19a   : > { %v2486_v36 = vadd.f32 %v2485_v47, %v2479_v42  ;;  %v2465_v37 = vadd.f32 %v2464_v24, %v2450_v30 }
 0x19c   : > { %v2466_v49 = vadd.f32 %v2465_v37, %v2451_v27  ;;  %v2487_v43 = vadd.f32 %v2486_v36, %v2480_v53 }
 0x19e   : > { %v2467_v44 = vadd.f32 %v2466_v49, %v2452_v33  ;;  %v2488_v51 = vadd.f32 %v2487_v43, %v2481_v46 }
 0x1a0   : > { %v2468_v54 = vadd.f32 %v2467_v44, %v2453_v19  ;;  %v2489_v55 = vadd.f32 %v2488_v51, %v2482_v48 }
 0x1a2   : > { %v2469_v57 = vadd.f32 %v2468_v54, %v2454_v31  ;;  %v2490_v59 = vadd.f32 %v2489_v55, %v2483_v52 }
 0x1a4   : > { %v2470_v50 = vrot.slane %v2469_v57, 4  ;;  %v2491_v61 = vadd.f32 %v2490_v59, %v2484_v56 }
 0x1a6   : > { %v2471_v63 = vadd.f32 %v2470_v50, %v2469_v57  ;;  %v2492_v58 = vrot.slane %v2491_v61, 4 }
 0x1a8   : > { %v2472_v4 = vrot.slane %v2471_v63, 2  ;;  %v2493_v5 = vadd.f32 %v2492_v58, %v2491_v61 }
 0x1aa   : > { %v2473_v62 = vadd.f32 %v2472_v4, %v2471_v63  ;;  %v2494_v1 = vrot.slane %v2493_v5, 2 }
 0x1ac   : > { %v2474_v7 = vrot.slane %v2473_v62, 1  ;;  %v2495_v60 = vadd.f32 %v2494_v1, %v2493_v5 }
 0x1ae   : > { %v2475_v6 = vadd.f32 %v2474_v7, %v2473_v62  ;;  %v2496_v9 = vrot.slane %v2495_v60, 1 }
 0x1b0   : > { %2476 = vst [vmem:[%s590_s5] sm:$0x1] %v2475_v6  ;;  %v2497_v12 = vadd.f32 %v2496_v9, %v2495_v60 }
 0x1b2   : > { %2498 = vst [vmem:[%s596_s7] sm:$0x1] %v2497_v12 }
 0x1b3 PF: > { %s15_s19 = sadd.s32 1, %s3501_s19   ;;  %s4079_s15 = smov %s3489_s16 }
 0x1b4   : > { %p12_p11 = scmp.ge.s32.totalorder %s15_s19, 4   ;;  %s4080_s16 = smov %s3563_s23 }
 0x1b5   : > { %s4081_s17 = smov %s3497_s18  ;;  %s4082_s18 = smov %s4084_s20 }
 0x1b6   :  { %14 = sbr.rel (!%p12_p11) target bundleno = 3 (0x3), region = 144 }

// kernel: resblock_pallas.4
= control target key start
LH: loop header
LB: loop body
LE: loop exit
PB: predicated region body
PF: predicated region fallthrough
CT: control target
= control target key end

     0   :  { %s6271_s15 = smov 0   ;;  %s6273_s16 = smov 0   ;;  %s8913_s0 = inlined_call_operand.vmem [shape: bf16[1,2,18,18,4], index: 0, kind: input, shape index: {}]   ;;  %s8914_s1 = inlined_call_operand.vmem [shape: bf16[9,4,128], index: 1, kind: input, shape index: {}]   ;;  %s8915_s2 = inlined_call_operand.vmem [shape: f32[512,128], index: 2, kind: output, shape index: {0}]   ;;  %s8916_s3 = inlined_call_operand.vmem [shape: f32[2,1,128], index: 3, kind: output, shape index: {1}]   ;;  %s8917_s4 = inlined_call_operand.vmem [shape: f32[2,1,128], index: 4, kind: output, shape index: {2}]  }
   0x1   :  { %s6275_s17 = smov 0  }
   0x2 LB: > { %s27_s18 = sadd.s32 1, %s6240_s16  ;;  %p5134_p0 = scmp.ge.s32.totalorder %s6244_s17, 1  ;;  %s6244_s17 = sphi %s6275_s17, %s15_s17   ;;  %s6240_s16 = sphi %s6273_s16, %s9193_s16   ;;  %s6236_s15 = sphi %s6271_s15, %s9192_s15  }
   0x3   : > { %p29_p1 = scmp.ge.s32.totalorder %s27_s18, 2  ;;  %p194_p2 = scmp.lt.s32.totalorder %s6244_s17, 3 }
   0x5   : > { %s9195_s18 = smov (%p29_p1, %s27_s18), 0  ;;  %p195_p3 = pnand %p5134_p0, %p194_p2 }
   0x7   : > { %198 = sbr.rel (%p195_p3) target bundleno = 575 (0x23f), region = 28 }
   0xc   : > { %v5138_v0 = vld [vmem:[%s8914_s1 + $0x2] sm:$0x3]  ;;  %vm805_vm0 = vcmask 1041408   ;;  %p239_p4 = scmp.lt.s32.totalorder %s6236_s15, 1  ;;  %v302_v2 = vld [vmem:[%s8914_s1] sm:$0x3] }
   0xd   : > { %6138 = vmatprep.subr.msk.bf16.mxu1 %vm805_vm0, %v5138_v0  ;;  %6137 = vmatprep.subr.msk.bf16.mxu0 %vm805_vm0, %v5138_v0  ;;  %v807_v1 = vsel %vm805_vm0, %v5138_v0, 0  ;;  %v5219_v3 = vld [vmem:[%s8914_s1 + $0x4] sm:$0x3]  ;;  %vm319_vm1 = vsmask.f32 3328  ;;  %v6316_v4 = vsel %vm805_vm0, %v302_v2, 0 }
   0xe   : > { %6136 = vmatpush3.bf16.msra.mxu1 %v807_v1  ;;  %5830 = vmatpush3.bf16.msra.mxu0 %v807_v1  ;;  %s6302_s23 = scalar_select %p239_p4, %s6236_s15, 1  ;;  %vm320_vm2 = vsmask.f32 7440  ;;  %vm756_vm3 = vcmask 31744   ;;  %v6342_v16 = vsel %vm805_vm0, %v5219_v3, 0  ;;  %vm1310_vm5 = vcmask 1042432  }
   0xf   : > { %6139 = vmatprep.subr.msk.bf16.mxu1 %vm805_vm0, %v302_v2  ;;  %6140 = vmatprep.subr.msk.bf16.mxu0 %vm805_vm0, %v5219_v3  ;;  %vm6357_vm4 = vmor %vm319_vm1, %vm320_vm2  ;;  %vm1311_vm6 = vcmask 1046532   ;;  %s5136_s20 = sshll.u32 %s6236_s15, 5 }
  0x10   : > { %s6147_s26 = smul.u32 216, %s6302_s23  ;;  %vm6643_vm7 = vmor %vm1310_vm5, %vm1311_vm6  ;;  %p249_p5 = scmp.lt.s32.totalorder %s5136_s20, 63 }
  0x11   : > { %s262_s27 = scalar_lea.vmem %s8916_s3, %s6302_s23  ;;  %s268_s30 = scalar_lea.vmem %s8917_s4, %s6302_s23 }
  0x12   : > { %s6313_s29 = scalar_lea.vmem %s8913_s0, %s6147_s26  ;;  %s9197_s20 = smov (!%p249_p5, %s5136_s20), 63 }
  0x13   : > { %v6319_v5 = vld [vmem:[%s6313_s29] sm:$0xf]  ;;  %v6322_v6 = vld [vmem:[%s6313_s29 + $0x4] sm:$0xf]  ;;  %v6325_v7 = vld [vmem:[%s6313_s29 + $0x8] sm:$0x1] }
  0x14   : > { %v323_v8 = vshrl.u32 %v6319_v5, 16  ;;  %v326_v9 = vshll.u32 %v6319_v5, 16  ;;  %v332_v10 = vshll.u32 %v6322_v6, 16  ;;  %v336_v11 = vshrl.u32 %v6322_v6, 16  ;;  %v6332_v12 = vld [vmem:[%s6313_s29 + $0x60] sm:$0xf] }
  0x15   : > { %v342_v13 = vshll.u32 %v6325_v7, 16  ;;  %v6336_v14 = vld [vmem:[%s6313_s29 + $0x64] sm:$0xf]  ;;  %v6339_v15 = vld [vmem:[%s6313_s29 + $0x68] sm:$0x1]  ;;  %v515_v22 = vshrl.u32 %v6332_v12, 16 }
  0x16   : > { %v325_v17 = vrot.slane %v323_v8, 4  ;;  %v328_v18 = vrot.slane %v326_v9, 5  ;;  %v334_v19 = vrot.slane %v332_v10, 5  ;;  %v338_v20 = vrot.slane %v336_v11, 4  ;;  %v6350_v29 = vld [vmem:[%s6313_s29 + $0xc] sm:$0xf] }
  0x17   : > { %v344_v21 = vrot.slane %v342_v13, 5  ;;  %v518_v23 = vshll.u32 %v6332_v12, 16  ;;  %v524_v24 = vshll.u32 %v6336_v14, 16  ;;  %v528_v27 = vshrl.u32 %v6336_v14, 16  ;;  %v6353_v30 = vld [vmem:[%s6313_s29 + $0x10] sm:$0xf] }
  0x18   : > { %v329_v25 = vor.u32 %v328_v18, %v325_v17  ;;  %v339_v26 = vor.u32 %v338_v20, %v334_v19  ;;  %v534_v28 = vshll.u32 %v6339_v15, 16  ;;  %v517_v33 = vrot.slane %v515_v22, 4  ;;  %v6363_v41 = vld [vmem:[%s6313_s29 + $0x14] sm:$0x1]  ;;  %v6374_v53 = vld [vmem:[%s6313_s29 + $0x6c] sm:$0xf] }
  0x19   : > { %v520_v34 = vrot.slane %v518_v23, 5  ;;  %v526_v35 = vrot.slane %v524_v24, 5  ;;  %v530_v38 = vrot.slane %v528_v27, 4  ;;  %v347_v42 = vshrl.u32 %v6350_v29, 16  ;;  %v6378_v58 = vld [vmem:[%s6313_s29 + $0x70] sm:$0xf] }
  0x1a   : > { %v330_v36 = vrot.slane %v329_v25, 4  ;;  %v340_v37 = vrot.slane %v339_v26, 4  ;;  %v536_v39 = vrot.slane %v534_v28, 5  ;;  %v350_v43 = vshll.u32 %v6350_v29, 16  ;;  %v6386_v63 = vld [vmem:[%s6313_s29 + $0x74] sm:$0x1] }
  0x1b   : > { %v521_v40 = vor.u32 %v520_v34, %v517_v33  ;;  %v356_v44 = vshll.u32 %v6353_v30, 16  ;;  %v531_v47 = vor.u32 %v530_v38, %v526_v35  ;;  %v360_v48 = vshrl.u32 %v6353_v30, 16  ;;  %v6392_v8 = vld [vmem:[%s6313_s29 + $0x18] sm:$0xf]  ;;  %v6405_v25 = vld [vmem:[%s6313_s29 + $0x20] sm:$0x1] }
  0x1c   : > { %v335_v45 = vsel %vm6357_vm4, %v330_v36, %v334_v19  ;;  %v345_v46 = vsel %vm6357_vm4, %v340_v37, %v344_v21  ;;  %v349_v51 = vrot.slane %v347_v42, 4  ;;  %v352_v52 = vrot.slane %v350_v43, 5  ;;  %v6399_v21 = vld [vmem:[%s6313_s29 + $0x1c] sm:$0xf]  ;;  %s5137_s15 = sshll.u32 %s9197_s20, 3 }
  0x1d   : > { %v5139_v49 = vcombine.low %v335_v45, %v345_v46  ;;  %v522_v50 = vrot.slane %v521_v40, 4  ;;  %v532_v54 = vrot.slane %v531_v47, 4  ;;  %v358_v55 = vrot.slane %v356_v44, 5  ;;  %v6418_v40 = vld [vmem:[%s8914_s1 + $0x8] sm:$0x3]  ;;  %s8776_s24 = scalar_lea.vmem %s8915_s2, %s5137_s15 }
  0x1e   : > { %v362_v56 = vrot.slane %v360_v48, 4  ;;  %v366_v57 = vshll.u32 %v6363_v41, 16  ;;  %v353_v60 = vor.u32 %v352_v52, %v349_v51  ;;  %v539_v3 = vshrl.u32 %v6374_v53, 16  ;;  %v6423_v46 = vld [vmem:[%s6313_s29 + $0x7c] sm:$0xf] }
  0x1f   : > { %5831 = vmatprep.mubr.msk.bf16.mxu0 %vm756_vm3, %v5139_v49  ;;  %v527_v59 = vsel %vm6357_vm4, %v522_v50, %v526_v35  ;;  %v537_v0 = vsel %vm6357_vm4, %v532_v54, %v536_v39  ;;  %v542_v11 = vshll.u32 %v6374_v53, 16  ;;  %v548_v13 = vshll.u32 %v6378_v58, 16  ;;  %v6412_v35 = vld [vmem:[%s6313_s29 + $0x78] sm:$0xf] }
  0x20   : > { %v363_v1 = vor.u32 %v362_v56, %v358_v55  ;;  %v368_v2 = vrot.slane %v366_v57, 5  ;;  %v5147_v9 = vcombine.low %v527_v59, %v537_v0  ;;  %v354_v10 = vrot.slane %v353_v60, 4  ;;  %v6430_v56 = vld [vmem:[%s6313_s29 + $0x80] sm:$0x1] }
  0x21   : > { %v541_v18 = vrot.slane %v539_v3, 4  ;;  %v552_v19 = vshrl.u32 %v6378_v58, 16  ;;  %v558_v20 = vshll.u32 %v6386_v63, 16  ;;  %v544_v23 = vrot.slane %v542_v11, 5  ;;  %8953 = vst [vmem:[#allocation2_spill] sm:$0xff] %v6430_v56 }
  0x22   : > { %v364_v17 = vrot.slane %v363_v1, 4  ;;  %5847 = vmatprep.mubr.msk.bf16.mxu1 %vm756_vm3, %v5147_v9  ;;  %v359_v22 = vsel %vm6357_vm4, %v354_v10, %v358_v55  ;;  %v550_v24 = vrot.slane %v548_v13, 5  ;;  %v371_v26 = vshrl.u32 %v6392_v8, 16  ;;  %v6436_v1 = vld [vmem:[%s6313_s29 + $0x24] sm:$0xf] }
  0x23   : > { %v554_v28 = vrot.slane %v552_v19, 4  ;;  %v560_v33 = vrot.slane %v558_v20, 5  ;;  %v374_v34 = vshll.u32 %v6392_v8, 16  ;;  %v545_v37 = vor.u32 %v544_v23, %v541_v18  ;;  %v6444_v10 = vld [vmem:[%s6313_s29 + $0x28] sm:$0xf] }
  0x24   : > { %v369_v27 = vsel %vm6357_vm4, %v364_v17, %v368_v2  ;;  %v373_v38 = vrot.slane %v371_v26, 4  ;;  %v380_v39 = vshll.u32 %v6399_v21, 16  ;;  %v384_v44 = vshrl.u32 %v6399_v21, 16  ;;  %v6450_v19 = vld [vmem:[%s8914_s1 + $0x6] sm:$0x3] }
  0x25   : > { %v5140_v36 = vcombine.low %v359_v22, %v369_v27  ;;  %v555_v42 = vor.u32 %v554_v28, %v550_v24  ;;  %v376_v43 = vrot.slane %v374_v34, 5  ;;  %v390_v45 = vshll.u32 %v6405_v25, 16 }
  0x26   : > { %v546_v47 = vrot.slane %v545_v37, 4  ;;  %v382_v48 = vrot.slane %v380_v39, 5  ;;  %v563_v49 = vshrl.u32 %v6412_v35, 16  ;;  %v566_v50 = vshll.u32 %v6412_v35, 16 }
  0x27   : > { %5832 = vmatmul.mubr.msk.bf16.vlgmr.msra.gmra.mxu0 %vm756_vm3, %v5140_v36  ;;  %v556_v51 = vrot.slane %v555_v42, 4  ;;  %v377_v52 = vor.u32 %v376_v43, %v373_v38  ;;  %v386_v54 = vrot.slane %v384_v44, 4  ;;  %v392_v55 = vrot.slane %v390_v45, 5  ;;  %v6462_v36 = vld [vmem:[%s6313_s29 + $0x84] sm:$0xf] }
  0x28   : > { %5898 = vmatpush3.bf16.msra.mxu0 %v6342_v16  ;;  %v551_v57 = vsel %vm6357_vm4, %v546_v47, %v550_v24  ;;  %v565_v59 = vrot.slane %v563_v49, 4  ;;  %v568_v60 = vrot.slane %v566_v50, 5  ;;  %v572_v0 = vshll.u32 %v6423_v46, 16  ;;  %v6455_v24 = vld [vmem:[%s6313_s29 + $0x2c] sm:$0x1] }
  0x29   : > { %6142 = vmatprep.subr.msk.bf16.mxu0 %vm805_vm0, %v6418_v40  ;;  %v561_v16 = vsel %vm6357_vm4, %v556_v51, %v560_v33  ;;  %v378_v2 = vrot.slane %v377_v52, 4  ;;  %v387_v3 = vor.u32 %v386_v54, %v382_v48  ;;  %v576_v9 = vshrl.u32 %v6423_v46, 16  ;;  %v6469_v43 = vld [vmem:[%s6313_s29 + $0x88] sm:$0xf]  ;;  %v6477_v51 = vld [vmem:[%s6313_s29 + $0x8c] sm:$0x1] }
  0x2a   : > { %v5148_v11 = vcombine.low %v551_v57, %v561_v16  ;;  %v569_v13 = vor.u32 %v568_v60, %v565_v59  ;;  %v574_v17 = vrot.slane %v572_v0, 5  ;;  %v582_v18 = vshll.u32 %v6430_v56, 16  ;;  %8954 = vst [vmem:[#allocation3_spill] sm:$0xff] %v6477_v51  ;;  %v6485_v60 = vld [vmem:[%s6313_s29 + $0x30] sm:$0xf] }
  0x2b   : > { %v383_v20 = vsel %vm6357_vm4, %v378_v2, %v382_v48  ;;  %v388_v22 = vrot.slane %v387_v3, 4  ;;  %v578_v23 = vrot.slane %v576_v9, 4  ;;  %v395_v26 = vshrl.u32 %v6436_v1, 16  ;;  %v6490_v9 = vld [vmem:[%s6313_s29 + $0x34] sm:$0xf] }
  0x2c   : > { %5848 = vmatmul.mubr.msk.bf16.vlgmr.msra.gmra.mxu1 %vm756_vm3, %v5148_v11  ;;  %v570_v27 = vrot.slane %v569_v13, 4  ;;  %v584_v28 = vrot.slane %v582_v18, 5  ;;  %v398_v33 = vshll.u32 %v6436_v1, 16  ;;  %v404_v34 = vshll.u32 %v6444_v10, 16 }
  0x2d   : > { %5864 = vmatpush3.bf16.msra.mxu1 %v6316_v4  ;;  %v393_v37 = vsel %vm6357_vm4, %v388_v22, %v392_v55  ;;  %v579_v38 = vor.u32 %v578_v23, %v574_v17  ;;  %v397_v39 = vrot.slane %v395_v26, 4  ;;  %v408_v42 = vshrl.u32 %v6444_v10, 16 }
  0x2e   : > { %v5141_v44 = vcombine.low %v383_v20, %v393_v37  ;;  %v575_v45 = vsel %vm6357_vm4, %v570_v27, %v574_v17  ;;  %v400_v47 = vrot.slane %v398_v33, 5  ;;  %v406_v48 = vrot.slane %v404_v34, 5  ;;  %6141 = vmatprep.subr.msk.bf16.mxu1 %vm805_vm0, %v6450_v19  ;;  %v6498_v33 = vld [vmem:[%s6313_s29 + $0x38] sm:$0x1] }
  0x2f   : > { %v580_v4 = vrot.slane %v579_v38, 4  ;;  %v410_v49 = vrot.slane %v408_v42, 4  ;;  %v414_v50 = vshll.u32 %v6455_v24, 16  ;;  %v587_v52 = vshrl.u32 %v6462_v36, 16  ;;  %v6503_v38 = vld [vmem:[%s6313_s29 + $0x90] sm:$0xf] }
  0x30   : > { %5835 = vmatprep.mubr.msk.bf16.mxu0 %vm756_vm3, %v5141_v44  ;;  %v401_v54 = vor.u32 %v400_v47, %v397_v39  ;;  %v590_v55 = vshll.u32 %v6462_v36, 16  ;;  %v596_v57 = vshll.u32 %v6469_v43, 16  ;;  %v600_v59 = vshrl.u32 %v6469_v43, 16  ;;  %8955 = vst [vmem:[#allocation4_spill] sm:$0xff] %v6503_v38  ;;  %v6508_v47 = vld [vmem:[%s6313_s29 + $0x94] sm:$0xf] }
  0x31   : > { %v585_v0 = vsel %vm6357_vm4, %v580_v4, %v584_v28  ;;  %v411_v16 = vor.u32 %v410_v49, %v406_v48  ;;  %v416_v2 = vrot.slane %v414_v50, 5  ;;  %v589_v3 = vrot.slane %v587_v52, 4  ;;  %8956 = vst [vmem:[#allocation5_spill] sm:$0xff] %v6508_v47 }
  0x32   : > { %v5149_v11 = vcombine.low %v575_v45, %v585_v0  ;;  %v402_v13 = vrot.slane %v401_v54, 4  ;;  %v592_v17 = vrot.slane %v590_v55, 5  ;;  %v598_v18 = vrot.slane %v596_v57, 5 }
  0x33   : > { %v412_v20 = vrot.slane %v411_v16, 4  ;;  %v602_v22 = vrot.slane %v600_v59, 4  ;;  %v606_v23 = vshll.u32 %v6477_v51, 16  ;;  %v419_v26 = vshrl.u32 %v6485_v60, 16  ;;  %v6517_v16 = vld [vmem:[%s6313_s29 + $0x98] sm:$0x1] }
  0x34   : > { %5851 = vmatprep.mubr.msk.bf16.mxu1 %vm756_vm3, %v5149_v11  ;;  %v407_v27 = vsel %vm6357_vm4, %v402_v13, %v406_v48  ;;  %v593_v28 = vor.u32 %v592_v17, %v589_v3  ;;  %v422_v34 = vshll.u32 %v6485_v60, 16  ;;  %v428_v37 = vshll.u32 %v6490_v9, 16  ;;  %8957 = vst [vmem:[#allocation6_spill] sm:$0xff] %v6517_v16  ;;  %v6522_v11 = vld [vmem:[%s6313_s29 + $0x3c] sm:$0xf] }
  0x35   : > { %v417_v39 = vsel %vm6357_vm4, %v412_v20, %v416_v2  ;;  %v603_v42 = vor.u32 %v602_v22, %v598_v18  ;;  %v608_v44 = vrot.slane %v606_v23, 5  ;;  %v421_v45 = vrot.slane %v419_v26, 4  ;;  %v6527_v23 = vld [vmem:[%s6313_s29 + $0x40] sm:$0xf]  ;;  %v1263_v51 = vld [vmem:[%s6313_s29 + $0xc] sm:$0xe] }
  0x36   : > { %v5142_v48 = vcombine.low %v407_v27, %v417_v39  ;;  %v594_v4 = vrot.slane %v593_v28, 4  ;;  %v424_v49 = vrot.slane %v422_v34, 5  ;;  %v430_v50 = vrot.slane %v428_v37, 5 }
  0x37   : > { %v604_v52 = vrot.slane %v603_v42, 4  ;;  %v432_v54 = vshrl.u32 %v6490_v9, 16  ;;  %v438_v55 = vshll.u32 %v6498_v33, 16  ;;  %v611_v57 = vshrl.u32 %v6503_v38, 16 }
  0x38   : > { %5836 = vmatmul.mubr.msk.bf16.gmra.mxu0 %vm756_vm3, %v5142_v48  ;;  %v599_v59 = vsel %vm6357_vm4, %v594_v4, %v598_v18  ;;  %v425_v0 = vor.u32 %v424_v49, %v421_v45  ;;  %v614_v2 = vshll.u32 %v6503_v38, 16  ;;  %v620_v3 = vshll.u32 %v6508_v47, 16  ;;  %v6536_v48 = vld [vmem:[%s6313_s29 + $0x44] sm:$0x1] }
  0x39   : > { %v609_v13 = vsel %vm6357_vm4, %v604_v52, %v608_v44  ;;  %v434_v17 = vrot.slane %v432_v54, 4  ;;  %v440_v20 = vrot.slane %v438_v55, 5  ;;  %v613_v22 = vrot.slane %v611_v57, 4  ;;  %v6541_v52 = vld [vmem:[%s6313_s29 + $0x9c] sm:$0xf] }
  0x3a   : > { %v5150_v18 = vcombine.low %v599_v59, %v609_v13  ;;  %v426_v26 = vrot.slane %v425_v0, 4  ;;  %v616_v27 = vrot.slane %v614_v2, 5  ;;  %v622_v28 = vrot.slane %v620_v3, 5  ;;  %8958 = vst [vmem:[#allocation7_spill] sm:$0xff] %v6541_v52  ;;  %v6545_v13 = vld [vmem:[%s6313_s29 + $0xa0] sm:$0xf] }
  0x3b   : > { %v435_v34 = vor.u32 %v434_v17, %v430_v50  ;;  %v624_v37 = vshrl.u32 %v6508_v47, 16  ;;  %v630_v39 = vshll.u32 %v6517_v16, 16  ;;  %v443_v42 = vshrl.u32 %v6522_v11, 16  ;;  %8959 = vst [vmem:[#allocation8_spill] sm:$0xff] %v6545_v13 }
  0x3c   : > { %5852 = vmatmul.mubr.msk.bf16.gmra.mxu1 %vm756_vm3, %v5150_v18  ;;  %v431_v44 = vsel %vm6357_vm4, %v426_v26, %v430_v50  ;;  %v617_v45 = vor.u32 %v616_v27, %v613_v22  ;;  %v446_v4 = vshll.u32 %v6522_v11, 16  ;;  %v452_v49 = vshll.u32 %v6527_v23, 16  ;;  %v6551_v26 = vld [vmem:[%s6313_s29 + $0xa4] sm:$0x1] }
  0x3d   : > { %v436_v54 = vrot.slane %v435_v34, 4  ;;  %v626_v55 = vrot.slane %v624_v37, 4  ;;  %v632_v57 = vrot.slane %v630_v39, 5  ;;  %v445_v59 = vrot.slane %v443_v42, 4  ;;  %8960 = vst [vmem:[#allocation9_spill] sm:$0xff] %v6551_v26 }
  0x3e   : > { %v618_v0 = vrot.slane %v617_v45, 4  ;;  %v448_v2 = vrot.slane %v446_v4, 5  ;;  %v454_v3 = vrot.slane %v452_v49, 5  ;;  %v456_v50 = vshrl.u32 %v6527_v23, 16  ;;  %v6555_v34 = vld [vmem:[%s6313_s29 + $0x48] sm:$0xf] }
  0x3f   : > { %v441_v17 = vsel %vm6357_vm4, %v436_v54, %v440_v20  ;;  %v627_v22 = vor.u32 %v626_v55, %v622_v28  ;;  %v462_v18 = vshll.u32 %v6536_v48, 16  ;;  %v635_v27 = vshrl.u32 %v6541_v52, 16 }
  0x40   : > { %v5143_v37 = vcombine.low %v431_v44, %v441_v17  ;;  %v623_v39 = vsel %vm6357_vm4, %v618_v0, %v622_v28  ;;  %v449_v42 = vor.u32 %v448_v2, %v445_v59  ;;  %v458_v45 = vrot.slane %v456_v50, 4  ;;  %v6564_v17 = vld [vmem:[%s6313_s29 + $0x4c] sm:$0xf]  ;;  %v6570_v2 = vld [vmem:[%s6313_s29 + $0x50] sm:$0x1] }
  0x41   : > { %v628_v4 = vrot.slane %v627_v22, 4  ;;  %v464_v49 = vrot.slane %v462_v18, 5  ;;  %v637_v20 = vrot.slane %v635_v27, 4  ;;  %v638_v54 = vshll.u32 %v6541_v52, 16 }
  0x42   : > { %5839 = vmatprep.mubr.msk.bf16.mxu0 %vm756_vm3, %v5143_v37  ;;  %v450_v55 = vrot.slane %v449_v42, 4  ;;  %v459_v62 = vor.u32 %v458_v45, %v454_v3  ;;  %v644_v32 = vshll.u32 %v6545_v13, 16  ;;  %v648_v44 = vshrl.u32 %v6545_v13, 16  ;;  %v6576_v42 = vld [vmem:[%s6313_s29 + $0xa8] sm:$0xf] }
  0x43   : > { %v633_v28 = vsel %vm6357_vm4, %v628_v4, %v632_v57  ;;  %v640_v59 = vrot.slane %v638_v54, 5  ;;  %v654_v0 = vshll.u32 %v6551_v26, 16  ;;  %v467_v50 = vshrl.u32 %v6555_v34, 16  ;;  %8961 = vst [vmem:[#allocation10_spill] sm:$0xff] %v6576_v42 }
  0x44   : > { %v5151_v22 = vcombine.low %v623_v39, %v633_v28  ;;  %v455_v18 = vsel %vm6357_vm4, %v450_v55, %v454_v3  ;;  %v460_v27 = vrot.slane %v459_v62, 4  ;;  %v646_v37 = vrot.slane %v644_v32, 5 }
  0x45   : > { %v641_v45 = vor.u32 %v640_v59, %v637_v20  ;;  %v650_v61 = vrot.slane %v648_v44, 4  ;;  %v656_v57 = vrot.slane %v654_v0, 5  ;;  %v469_v4 = vrot.slane %v467_v50, 4  ;;  %v6586_v44 = vld [vmem:[%s6313_s29 + $0xac] sm:$0xf] }
  0x46   : > { %5855 = vmatprep.mubr.msk.bf16.mxu1 %vm756_vm3, %v5151_v22  ;;  %v465_v54 = vsel %vm6357_vm4, %v460_v27, %v464_v49  ;;  %v470_v39 = vshll.u32 %v6555_v34, 16  ;;  %v476_v28 = vshll.u32 %v6564_v17, 16  ;;  %v480_v62 = vshrl.u32 %v6564_v17, 16  ;;  %8962 = vst [vmem:[#allocation11_spill] sm:$0xff] %v6586_v44  ;;  %v6589_v22 = vld [vmem:[%s6313_s29 + $0xb0] sm:$0x1] }
  0x47   : > { %v5144_v3 = vcombine.low %v455_v18, %v465_v54  ;;  %v642_v32 = vrot.slane %v641_v45, 4  ;;  %v651_v55 = vor.u32 %v650_v61, %v646_v37  ;;  %v486_v20 = vshll.u32 %v6570_v2, 16  ;;  %8963 = vst [vmem:[#allocation12_spill] sm:$0xff] %v6589_v22 }
  0x48   : > { %v472_v59 = vrot.slane %v470_v39, 5  ;;  %v478_v0 = vrot.slane %v476_v28, 5  ;;  %v482_v50 = vrot.slane %v480_v62, 4  ;;  %v659_v49 = vshrl.u32 %v6576_v42, 16  ;;  %v6598_v62 = vld [vmem:[%s6313_s29 + $0x54] sm:$0xf] }
  0x49   : > { %5840 = vmatmul.mubr.msk.bf16.gmra.mxu0 %vm756_vm3, %v5144_v3  ;;  %v647_v18 = vsel %vm6357_vm4, %v642_v32, %v646_v37  ;;  %v652_v27 = vrot.slane %v651_v55, 4  ;;  %v488_v61 = vrot.slane %v486_v20, 5  ;;  %v662_v45 = vshll.u32 %v6576_v42, 16  ;;  %v6605_v55 = vld [vmem:[%s6313_s29 + $0x58] sm:$0xf] }
  0x4a   : > { %v473_v54 = vor.u32 %v472_v59, %v469_v4  ;;  %v483_v56 = vor.u32 %v482_v50, %v478_v0  ;;  %v661_v39 = vrot.slane %v659_v49, 4  ;;  %v668_v28 = vshll.u32 %v6586_v44, 16  ;;  %v6608_v49 = vld [vmem:[%s6313_s29 + $0x5c] sm:$0x1] }
  0x4b   : > { %v657_v3 = vsel %vm6357_vm4, %v652_v27, %v656_v57  ;;  %v664_v26 = vrot.slane %v662_v45, 5  ;;  %v672_v37 = vshrl.u32 %v6586_v44, 16  ;;  %v678_v32 = vshll.u32 %v6589_v22, 16  ;;  %v1262_v22 = vld [vmem:[%s6313_s29] sm:$0xe] }
  0x4c   : > { %v5152_v4 = vcombine.low %v647_v18, %v657_v3  ;;  %v474_v20 = vrot.slane %v473_v54, 4  ;;  %v484_v59 = vrot.slane %v483_v56, 4  ;;  %v670_v50 = vrot.slane %v668_v28, 5  ;;  %v6619_v54 = vld [vmem:[%s6313_s29 + $0xb4] sm:$0xf] }
  0x4d   : > { %v665_v42 = vor.u32 %v664_v26, %v661_v39  ;;  %v674_v52 = vrot.slane %v672_v37, 4  ;;  %v680_v13 = vrot.slane %v678_v32, 5  ;;  %v491_v57 = vshrl.u32 %v6598_v62, 16  ;;  %8964 = vst [vmem:[#allocation13_spill] sm:$0xff] %v6619_v54  ;;  %v6622_v37 = vld [vmem:[%s6313_s29 + $0xb8] sm:$0xf] }
  0x4e   : > { %5856 = vmatmul.mubr.msk.bf16.gmra.mxu1 %vm756_vm3, %v5152_v4  ;;  %v479_v27 = vsel %vm6357_vm4, %v474_v20, %v478_v0  ;;  %v489_v18 = vsel %vm6357_vm4, %v484_v59, %v488_v61  ;;  %v494_v56 = vshll.u32 %v6598_v62, 16  ;;  %v500_v45 = vshll.u32 %v6605_v55, 16  ;;  %v6627_v61 = vld [vmem:[%s6313_s29 + $0xbc] sm:$0x1] }
  0x4f   : > { %v5145_v26 = vcombine.low %v479_v27, %v489_v18  ;;  %v666_v39 = vrot.slane %v665_v42, 4  ;;  %v675_v28 = vor.u32 %v674_v52, %v670_v50  ;;  %v493_v3 = vrot.slane %v491_v57, 4 }
  0x50   : > { %v496_v32 = vrot.slane %v494_v56, 5  ;;  %v502_v4 = vrot.slane %v500_v45, 5  ;;  %v504_v0 = vshrl.u32 %v6605_v55, 16  ;;  %v510_v20 = vshll.u32 %v6608_v49, 16 }
  0x51   : > { %5843 = vmatprep.mubr.msk.bf16.mxu0 %vm756_vm3, %v5145_v26  ;;  %v671_v59 = vsel %vm6357_vm4, %v666_v39, %v670_v50  ;;  %v676_v27 = vrot.slane %v675_v28, 4  ;;  %v683_v52 = vshrl.u32 %v6619_v54, 16  ;;  %v686_v42 = vshll.u32 %v6619_v54, 16 }
  0x52   : > { %v497_v57 = vor.u32 %v496_v32, %v493_v3  ;;  %v506_v18 = vrot.slane %v504_v0, 4  ;;  %v512_v56 = vrot.slane %v510_v20, 5  ;;  %v692_v45 = vshll.u32 %v6622_v37, 16 }
  0x53   : > { %v681_v44 = vsel %vm6357_vm4, %v676_v27, %v680_v13  ;;  %v685_v16 = vrot.slane %v683_v52, 4  ;;  %v688_v26 = vrot.slane %v686_v42, 5  ;;  %v696_v38 = vshrl.u32 %v6622_v37, 16 }
  0x54   : > { %v5153_v50 = vcombine.low %v671_v59, %v681_v44  ;;  %v498_v39 = vrot.slane %v497_v57, 4  ;;  %v507_v28 = vor.u32 %v506_v18, %v502_v4  ;;  %v694_v47 = vrot.slane %v692_v45, 5  ;;  %v1264_v57 = vld [vmem:[%s6313_s29 + $0x18] sm:$0xe] }
  0x55   : > { %v689_v54 = vor.u32 %v688_v26, %v685_v16  ;;  %v698_v3 = vrot.slane %v696_v38, 4  ;;  %v702_v32 = vshll.u32 %v6627_v61, 16  ;;  %v5203_v13 = vrot.slane %v1262_v22, 9 }
  0x56   : > { %5859 = vmatprep.mubr.msk.bf16.mxu1 %vm756_vm3, %v5153_v50  ;;  %v503_v44 = vsel %vm6357_vm4, %v498_v39, %v502_v4  ;;  %v508_v20 = vrot.slane %v507_v28, 4  ;;  %v1315_v59 = vrot.slane %v6322_v6, 5  ;;  %v5172_v38 = vcombine.low %v6350_v29, %v6353_v30 }
  0x57   : > { %v690_v16 = vrot.slane %v689_v54, 4  ;;  %v699_v27 = vor.u32 %v698_v3, %v694_v47  ;;  %v704_v52 = vrot.slane %v702_v32, 5  ;;  %v5204_v42 = vrot.slane %v1263_v51, 9 }
  0x58   : > { %v513_v18 = vsel %vm6357_vm4, %v508_v20, %v512_v56  ;;  %v1316_v22 = vsel %vm6643_vm7, %v5203_v13, %v1315_v59  ;;  %v1317_v45 = vrot.slane %v1315_v59, 4  ;;  %v8967_v4 = vrot.slane %v6353_v30, 5 }
  0x59   : > { %v5146_v50 = vcombine.low %v503_v44, %v513_v18  ;;  %v695_v54 = vsel %vm6357_vm4, %v690_v16, %v694_v47  ;;  %v700_v39 = vrot.slane %v699_v27, 4  ;;  %v5171_v51 = vcombine.low %v6319_v5, %v6322_v6  ;;  %v1265_v27 = vld [vmem:[%s6313_s29 + $0x24] sm:$0xe] }
  0x5a   : > { %v1324_v26 = vrot.slane %v8967_v4, 4  ;;  %v8968_v28 = vrot.slane %v6325_v7, 5  ;;  %v8969_v3 = vmov %v8967_v4  ;;  %v5173_v13 = vcombine.low %v6392_v8, %v6399_v21  ;;  %v1267_v4 = vld [vmem:[%s6313_s29 + $0x3c] sm:$0xe] }
  0x5b   : > { %v1323_v32 = vsel %vm6643_vm7, %v5204_v42, %v8969_v3  ;;  %v5205_v44 = vrot.slane %v1264_v57, 9  ;;  %5844 = vmatmul.mubr.msk.bf16.gmra.mxu0 %vm756_vm3, %v5146_v50  ;;  %v705_v47 = vsel %vm6357_vm4, %v700_v39, %v704_v52  ;;  %v8970_v6 = vrot.slane %v6363_v41, 5  ;;  %v1266_v42 = vld [vmem:[%s6313_s29 + $0x30] sm:$0xe]  ;;  %v1268_v39 = vld [vmem:[%s6313_s29 + $0x48] sm:$0xe] }
  0x5c   : > { %v1319_v56 = vsel %vm6643_vm7, %v1317_v45, %v8968_v28  ;;  %v1329_v20 = vrot.slane %v6399_v21, 5  ;;  %v5154_v59 = vcombine.low %v695_v54, %v705_v47  ;;  %v1332_v16 = vrot.slane %v6405_v25, 5  ;;  %v1269_v47 = vld [vmem:[%s6313_s29 + $0x54] sm:$0xe]  ;;  %v6938_v21 = vld [vmem:[%s6313_s29 + $0x2c] sm:$0x1] }
  0x5d   : > { %v5220_v5 = vcombine.low %v1316_v22, %v1319_v56  ;;  %v1326_v7 = vsel %vm6643_vm7, %v1324_v26, %v8970_v6  ;;  %v1883_v52 = vsel %vm805_vm0, %v6450_v19, 0  ;;  %v1336_v18 = vrot.slane %v6444_v10, 5 }
  0x5e   : > { %v1330_v41 = vsel %vm6643_vm7, %v5205_v44, %v1329_v20  ;;  %v1331_v57 = vrot.slane %v1329_v20, 4  ;;  %5860 = vmatmul.mubr.msk.bf16.gmra.mxu1 %vm756_vm3, %v5154_v59  ;;  %v5221_v22 = vcombine.low %v1323_v32, %v1326_v7  ;;  %v2609_v25 = vsel %vm805_vm0, %v6418_v40, 0 }
  0x5f   : > { %5899 = vmatprep.mubr.msk.bf16.mxu0 %vm756_vm3, %v5220_v5  ;;  %v1343_v45 = vrot.slane %v6490_v9, 5  ;;  %5865 = vmatprep.mubr.msk.bf16.mxu1 %vm756_vm3, %v5171_v51  ;;  %v5206_v26 = vrot.slane %v1265_v27, 9  ;;  %v1339_v50 = vrot.slane %v6455_v24, 5  ;;  %v5207_v54 = vrot.slane %v1266_v42, 9  ;;  %v6710_v24 = vld [vmem:[%s8914_s1 + $0xc] sm:$0x3] }
  0x60   : > { %v1333_v19 = vsel %vm6643_vm7, %v1331_v57, %v1332_v16  ;;  %v1338_v56 = vrot.slane %v1336_v18, 4  ;;  %v1346_v32 = vrot.slane %v6498_v33, 5  ;;  %v5208_v44 = vrot.slane %v1267_v4, 9 }
  0x61   : > { %v5222_v28 = vcombine.low %v1330_v41, %v1333_v19  ;;  %v1345_v3 = vrot.slane %v1343_v45, 4  ;;  %v1350_v40 = vrot.slane %v6527_v23, 5  ;;  %v1374_v5 = vrot.slane %v6339_v15, 5 }
  0x62   : > { %v1353_v51 = vrot.slane %v6536_v48, 5  ;;  %v5209_v6 = vrot.slane %v1268_v39, 9  ;;  %v1357_v7 = vrot.slane %v6564_v17, 5  ;;  %v5174_v33 = vcombine.low %v6436_v1, %v6444_v10  ;;  %v1270_v1 = vld [vmem:[%s6313_s29 + $0x60] sm:$0xe] }
  0x63   : > { %5900 = vmatmul.mubr.msk.bf16.vlgmr.msra.gmra.mxu0 %vm756_vm3, %v5221_v22  ;;  %v1337_v20 = vsel %vm6643_vm7, %v5206_v26, %v1336_v18  ;;  %v1352_v59 = vrot.slane %v1350_v40, 4  ;;  %v1360_v16 = vrot.slane %v6570_v2, 5  ;;  %v1340_v48 = vsel %vm6643_vm7, %v1338_v56, %v1339_v50  ;;  %v6738_v22 = vld [vmem:[%s8914_s1 + $0xa] sm:$0x3]  ;;  %v6763_v50 = vld [vmem:[%s6313_s29 + $0x6c] sm:$0xe] }
  0x64   : > { %5966 = vmatpush3.bf16.msra.mxu0 %v2609_v25  ;;  %5903 = vmatprep.mubr.msk.bf16.mxu0 %vm756_vm3, %v5222_v28  ;;  %v1344_v27 = vsel %vm6643_vm7, %v5207_v54, %v1343_v45  ;;  %v1347_v42 = vsel %vm6643_vm7, %v1345_v3, %v1346_v32  ;;  %v1359_v41 = vrot.slane %v1357_v7, 4  ;;  %v6728_v10 = vsel %vm6643_vm7, %v5208_v44, %v1350_v40  ;;  %v1273_v39 = vld [vmem:[%s6313_s29 + $0x84] sm:$0xe]  ;;  %v6792_v44 = vld [vmem:[%s6313_s29 + $0x78] sm:$0xe] }
  0x65   : > { %v6732_v2 = vsel %vm6643_vm7, %v5209_v6, %v1357_v7  ;;  %v5210_v57 = vrot.slane %v1269_v47, 9  ;;  %v1364_v18 = vrot.slane %v6605_v55, 5  ;;  %6144 = vmatprep.subr.msk.bf16.mxu0 %vm805_vm0, %v6710_v24  ;;  %v6748_v25 = vsel %vm6643_vm7, %v1352_v59, %v1353_v51  ;;  %v1274_v40 = vld [vmem:[%s6313_s29 + $0x90] sm:$0xe] }
  0x66   : > { %5866 = vmatmul.mubr.msk.bf16.vlgmr.msra.gmra.mxu1 %vm756_vm3, %v5172_v38  ;;  %v6752_v45 = vsel %vm6643_vm7, %v1359_v41, %v1360_v16  ;;  %v1367_v4 = vrot.slane %v6608_v49, 5  ;;  %v1371_v19 = vrot.slane %v6336_v14, 5  ;;  %v5223_v29 = vcombine.low %v1337_v20, %v1340_v48  ;;  %v8971_v48 = vld [vmem:[#allocation3_spill] sm:$0xff] }
  0x67   : > { %5932 = vmatpush3.bf16.msra.mxu1 %v1883_v52  ;;  %5869 = vmatprep.mubr.msk.bf16.mxu1 %vm756_vm3, %v5173_v13  ;;  %v5175_v30 = vcombine.low %v6485_v60, %v6490_v9  ;;  %v1366_v38 = vrot.slane %v1364_v18, 4  ;;  %v5211_v26 = vrot.slane %v1270_v1, 9  ;;  %v5224_v49 = vcombine.low %v1344_v27, %v1347_v42  ;;  %v1275_v42 = vld [vmem:[%s6313_s29 + $0x9c] sm:$0xe] }
  0x68   : > { %v5176_v52 = vcombine.low %v6522_v11, %v6527_v23  ;;  %v5177_v8 = vcombine.low %v6555_v34, %v6564_v17  ;;  %6143 = vmatprep.subr.msk.bf16.mxu1 %vm805_vm0, %v6738_v22  ;;  %v5225_v60 = vcombine.low %v6728_v10, %v6748_v25  ;;  %v5226_v9 = vcombine.low %v6732_v2, %v6752_v45  ;;  %v8972_v10 = vld [vmem:[#allocation5_spill] sm:$0xff]  ;;  %v8973_v2 = vld [vmem:[#allocation4_spill] sm:$0xff] }
  0x69   : > { %v1373_v54 = vrot.slane %v1371_v19, 4  ;;  %v6782_v28 = vsel %vm6643_vm7, %v5210_v57, %v1364_v18  ;;  %v6786_v56 = vsel %vm6643_vm7, %v1366_v38, %v1367_v4  ;;  %v5212_v32 = vrot.slane %v6763_v50, 9  ;;  %v1276_v18 = vld [vmem:[%s6313_s29 + $0xa8] sm:$0xe]  ;;  %v8975_v38 = vld [vmem:[#allocation8_spill] sm:$0xff] }
  0x6a   : > { %v6798_v47 = vsel %vm6643_vm7, %v5211_v26, %v1371_v19  ;;  %v1378_v51 = vrot.slane %v6378_v58, 5  ;;  %v1381_v6 = vrot.slane %v6386_v63, 5  ;;  %v5214_v59 = vrot.slane %v1273_v39, 9  ;;  %v8974_v19 = vld [vmem:[#allocation6_spill] sm:$0xff]  ;;  %v8976_v26 = vld [vmem:[#allocation7_spill] sm:$0xff] }
  0x6b   : > { %5904 = vmatmul.mubr.msk.bf16.gmra.mxu0 %vm756_vm3, %v5223_v29  ;;  %v1392_v16 = vrot.slane %v6469_v43, 5  ;;  %v1395_v27 = vrot.slane %v8971_v48, 5  ;;  %v5227_v41 = vcombine.low %v6782_v28, %v6786_v56  ;;  %v6816_v63 = vsel %vm6643_vm7, %v1373_v54, %v1374_v5  ;;  %v8978_v48 = vld [vmem:[#allocation11_spill] sm:$0xff] }
  0x6c   : > { %5907 = vmatprep.mubr.msk.bf16.mxu0 %vm756_vm3, %v5224_v49  ;;  %v5213_v1 = vrot.slane %v6792_v44, 9  ;;  %v5215_v4 = vrot.slane %v1274_v40, 9  ;;  %v1399_v15 = vrot.slane %v8972_v10, 5  ;;  %v1380_v5 = vrot.slane %v1378_v51, 4  ;;  %v5317_v57 = vld [vmem:[%s6313_s29 + $0xc] sm:$0xf] }
  0x6d   : > { %v6825_v25 = vsel %vm6643_vm7, %v5214_v59, %v1392_v16  ;;  %v1394_v45 = vrot.slane %v1392_v16, 4  ;;  %v1402_v29 = vrot.slane %v8974_v19, 5  ;;  %v5216_v49 = vrot.slane %v1275_v42, 9  ;;  %v8977_v59 = vld [vmem:[#allocation9_spill] sm:$0xff]  ;;  %v8979_v42 = vld [vmem:[#allocation10_spill] sm:$0xff] }
  0x6e   : > { %5870 = vmatmul.mubr.msk.bf16.gmra.mxu1 %vm756_vm3, %v5174_v33  ;;  %v1385_v33 = vrot.slane %v6423_v46, 5  ;;  %v6839_v39 = vsel %vm6643_vm7, %v5215_v4, %v1399_v15  ;;  %v1401_v44 = vrot.slane %v1399_v15, 4  ;;  %v1406_v40 = vrot.slane %v8975_v38, 5  ;;  %v8980_v15 = vld [vmem:[#allocation12_spill] sm:$0xff] }
  0x6f   : > { %5873 = vmatprep.mubr.msk.bf16.mxu1 %vm756_vm3, %v5175_v30  ;;  %v6835_v54 = vsel %vm6643_vm7, %v1394_v45, %v1395_v27  ;;  %v1409_v16 = vrot.slane %v8977_v59, 5  ;;  %v5217_v45 = vrot.slane %v1276_v18, 9  ;;  %v1413_v4 = vrot.slane %v8978_v48, 5 }
  0x70   : > { %v6849_v27 = vsel %vm6643_vm7, %v1401_v44, %v1402_v29  ;;  %v1416_v50 = vrot.slane %v8980_v15, 5  ;;  %v6859_v19 = vsel %vm6643_vm7, %v5216_v49, %v1406_v40  ;;  %v1408_v7 = vrot.slane %v1406_v40, 4  ;;  %v8981_v29 = vld [vmem:[#allocation13_spill] sm:$0xff]  ;;  %v8982_v15 = vld [vmem:[#allocation2_spill] sm:$0xff]  ;;  %v6874_v49 = vld [vmem:[%s6313_s29 + $0x10] sm:$0xf] }
  0x71   : > { %v6866_v18 = vsel %vm6643_vm7, %v5212_v32, %v1378_v51  ;;  %v6871_v59 = vsel %vm6643_vm7, %v5217_v45, %v1413_v4  ;;  %v1415_v30 = vrot.slane %v1413_v4, 4  ;;  %v5320_v40 = vld [vmem:[%s6313_s29 + $0x18] sm:$0xf]  ;;  %v1387_v20 = vrot.slane %v1385_v33, 4 }
  0x72   : > { %v2127_v44 = vshrl.u32 %v5317_v57, 16  ;;  %v2130_v32 = vshll.u32 %v5317_v57, 16  ;;  %v5228_v51 = vcombine.low %v6798_v47, %v6816_v63  ;;  %v6889_v45 = vsel %vm6643_vm7, %v1380_v5, %v1381_v6  ;;  %v1277_v57 = vld [vmem:[%s6313_s29 + $0xb4] sm:$0xe]  ;;  %v6910_v47 = vld [vmem:[%s6313_s29 + $0x14] sm:$0x1] }
  0x73   : > { %5908 = vmatmul.mubr.msk.bf16.gmra.mxu0 %vm756_vm3, %v5225_v60  ;;  %v1388_v60 = vrot.slane %v8982_v15, 5  ;;  %v6904_v11 = vsel %vm6643_vm7, %v5213_v1, %v1385_v33  ;;  %v2136_v6 = vshll.u32 %v6874_v49, 16  ;;  %v5321_v63 = vld [vmem:[%s6313_s29 + $0x1c] sm:$0xf]  ;;  %v2140_v17 = vshrl.u32 %v6874_v49, 16 }
  0x74   : > { %5911 = vmatprep.mubr.msk.bf16.mxu0 %vm756_vm3, %v5226_v9  ;;  %v6879_v9 = vsel %vm6643_vm7, %v1408_v7, %v1409_v16  ;;  %v6895_v7 = vsel %vm6643_vm7, %v1415_v30, %v1416_v50  ;;  %v2129_v5 = vrot.slane %v2127_v44, 4  ;;  %v2132_v34 = vrot.slane %v2130_v32, 5  ;;  %v5323_v15 = vld [vmem:[%s6313_s29 + $0x24] sm:$0xf]  ;;  %v6923_v44 = vld [vmem:[%s6313_s29 + $0x28] sm:$0xf] }
  0x75   : > { %v2151_v50 = vshrl.u32 %v5320_v40, 16  ;;  %v1389_v1 = vsel %vm6643_vm7, %v1387_v20, %v1388_v60  ;;  %v5218_v33 = vrot.slane %v1277_v57, 9  ;;  %v6918_v30 = vrot.slane %v2136_v6, 5 }
  0x76   : > { %5874 = vmatmul.mubr.msk.bf16.gmra.mxu1 %vm756_vm3, %v5176_v52  ;;  %v1420_v52 = vrot.slane %v6622_v37, 5  ;;  %v2154_v16 = vshll.u32 %v5320_v40, 16  ;;  %v1423_v23 = vrot.slane %v6627_v61, 5  ;;  %v2142_v4 = vrot.slane %v2140_v17, 4 }
  0x77   : > { %5877 = vmatprep.mubr.msk.bf16.mxu1 %vm756_vm3, %v5177_v8  ;;  %v5322_v8 = vld [vmem:[%s6313_s29 + $0x20] sm:$0x1]  ;;  %v2153_v3 = vrot.slane %v2151_v50, 4  ;;  %v2160_v13 = vshll.u32 %v5321_v63, 16  ;;  %v2146_v20 = vshll.u32 %v6910_v47, 16  ;;  %v2164_v57 = vshrl.u32 %v5321_v63, 16 }
  0x78   : > { %v1422_v32 = vrot.slane %v1420_v52, 4  ;;  %v2156_v60 = vrot.slane %v2154_v16, 5  ;;  %v5229_v61 = vcombine.low %v6866_v18, %v6889_v45  ;;  %v5230_v40 = vcombine.low %v6904_v11, %v1389_v1 }
  0x79   : > { %v2133_v6 = vor.u32 %v2132_v34, %v2129_v5  ;;  %v6934_v17 = vrot.slane %v2160_v13, 5  ;;  %v2143_v28 = vor.u32 %v2142_v4, %v6918_v30  ;;  %v2170_v50 = vshll.u32 %v5322_v8, 16  ;;  %v6961_v5 = vld [vmem:[%s6313_s29 + $0x34] sm:$0xf] }
  0x7a   : > { %v2157_v56 = vor.u32 %v2156_v60, %v2153_v3  ;;  %v6946_v18 = vsel %vm6643_vm7, %v5218_v33, %v1420_v52  ;;  %v2175_v13 = vshrl.u32 %v5323_v15, 16  ;;  %v2178_v45 = vshll.u32 %v5323_v15, 16  ;;  %v5326_v52 = vld [vmem:[%s6313_s29 + $0x30] sm:$0xf] }
  0x7b   : > { %5912 = vmatmul.mubr.msk.bf16.gmra.mxu0 %vm756_vm3, %v5227_v41  ;;  %v2166_v41 = vrot.slane %v2164_v57, 4  ;;  %v2184_v11 = vshll.u32 %v6923_v44, 16  ;;  %v8984_v3 = vcombine.low %v6332_v12, %v6336_v14  ;;  %v6955_v4 = vsel %vm6643_vm7, %v1422_v32, %v1423_v23 }
  0x7c   : > { %5915 = vmatprep.mubr.msk.bf16.mxu0 %vm756_vm3, %v5228_v51  ;;  %v8983_v51 = vcombine.low %v6598_v62, %v6605_v55  ;;  %v2148_v62 = vrot.slane %v2146_v20, 5  ;;  %v2188_v63 = vshrl.u32 %v6923_v44, 16  ;;  %v2134_v34 = vrot.slane %v2133_v6, 4 }
  0x7d   : > { %v2167_v55 = vor.u32 %v2166_v41, %v6934_v17  ;;  %v2177_v8 = vrot.slane %v2175_v13, 4  ;;  %v2180_v1 = vrot.slane %v2178_v45, 5  ;;  %v6963_v33 = vrot.slane %v2184_v11, 5  ;;  %v6969_v41 = vld [vmem:[%s6313_s29 + $0x38] sm:$0x1] }
  0x7e   : > { %5878 = vmatmul.mubr.msk.bf16.gmra.mxu1 %vm756_vm3, %v8983_v51  ;;  %v2144_v12 = vrot.slane %v2143_v28, 4  ;;  %v2158_v14 = vrot.slane %v2157_v56, 4  ;;  %v2172_v16 = vrot.slane %v2170_v50, 5  ;;  %v2190_v23 = vrot.slane %v2188_v63, 4  ;;  %v5329_v13 = vld [vmem:[%s6313_s29 + $0x3c] sm:$0xf] }
  0x7f   : > { %5881 = vmatprep.mubr.msk.bf16.mxu1 %vm756_vm3, %v8984_v3  ;;  %v2168_v15 = vrot.slane %v2167_v55, 4  ;;  %v2194_v32 = vshll.u32 %v6938_v21, 16  ;;  %v2199_v20 = vshrl.u32 %v5326_v52, 16  ;;  %v2202_v60 = vshll.u32 %v5326_v52, 16 }
  0x80   : > { %v2181_v57 = vor.u32 %v2180_v1, %v2177_v8  ;;  %v2191_v6 = vor.u32 %v2190_v23, %v6963_v33  ;;  %v2208_v28 = vshll.u32 %v6961_v5, 16  ;;  %v2212_v56 = vshrl.u32 %v6961_v5, 16  ;;  %v5332_v8 = vld [vmem:[%s6313_s29 + $0x48] sm:$0xf]  ;;  %v6996_v1 = vld [vmem:[%s6313_s29 + $0x4c] sm:$0xf] }
  0x81   : > { %v2201_v50 = vrot.slane %v2199_v20, 4  ;;  %v2204_v51 = vrot.slane %v2202_v60, 5  ;;  %v8985_v3 = vcombine.low %v6374_v53, %v6378_v58  ;;  %v5235_v55 = vcombine.low %v6946_v18, %v6955_v4 }
  0x82   : > { %v6975_v45 = vrot.slane %v2208_v28, 5  ;;  %v2214_v11 = vrot.slane %v2212_v56, 4  ;;  %v2149_v63 = vsel %vm6357_vm4, %v2144_v12, %v2148_v62  ;;  %v2163_v52 = vsel %vm6357_vm4, %v2158_v14, %v6934_v17 }
  0x83   : > { %5916 = vmatmul.mubr.msk.bf16.gmra.mxu0 %vm756_vm3, %v5229_v61  ;;  %v6978_v61 = vld [vmem:[%s6313_s29 + $0x40] sm:$0xf]  ;;  %v8986_v53 = vcombine.low %v6412_v35, %v6423_v46  ;;  %v2173_v58 = vsel %vm6357_vm4, %v2168_v15, %v2172_v16  ;;  %v2182_v23 = vrot.slane %v2181_v57, 4  ;;  %v2205_v20 = vor.u32 %v2204_v51, %v2201_v50  ;;  %v7030_v50 = vld [vmem:[%s6313_s29 + $0x44] sm:$0x1] }
  0x84   : > { %5919 = vmatprep.mubr.msk.bf16.mxu0 %vm756_vm3, %v5230_v40  ;;  %v2139_v40 = vsel %vm6357_vm4, %v2134_v34, %v6918_v30  ;;  %v2192_v30 = vrot.slane %v2191_v6, 4  ;;  %v2196_v34 = vrot.slane %v2194_v32, 5  ;;  %v2218_v62 = vshll.u32 %v6969_v41, 16  ;;  %v5335_v51 = vld [vmem:[%s6313_s29 + $0x54] sm:$0xf] }
  0x85   : > { %v2223_v12 = vshrl.u32 %v5329_v13, 16  ;;  %v2226_v17 = vshll.u32 %v5329_v13, 16  ;;  %v7007_v14 = vsel %vm805_vm0, %v6738_v22, 0  ;;  %v2215_v35 = vor.u32 %v2214_v11, %v6975_v45 }
  0x86   : > { %5882 = vmatmul.mubr.msk.bf16.gmra.mxu1 %vm756_vm3, %v8985_v3  ;;  %v2232_v46 = vshll.u32 %v6978_v61, 16  ;;  %v2236_v16 = vshrl.u32 %v6978_v61, 16  ;;  %v7012_v15 = vcombine.low %v2139_v40, %v2149_v63  ;;  %v7016_v32 = vsel %vm805_vm0, %v6710_v24, 0  ;;  %v7039_v40 = vld [vmem:[%s6313_s29 + $0x58] sm:$0xf] }
  0x87   : > { %5885 = vmatprep.mubr.msk.bf16.mxu1 %vm756_vm3, %v8986_v53  ;;  %v2247_v60 = vshrl.u32 %v5332_v8, 16  ;;  %v2250_v57 = vshll.u32 %v5332_v8, 16  ;;  %v8987_v6 = vcombine.low %v6825_v25, %v6835_v54  ;;  %v7022_v22 = vcombine.low %v2163_v52, %v2173_v58  ;;  %v7044_v8 = vld [vmem:[%s6313_s29 + $0x50] sm:$0x1] }
  0x88   : > { %v2187_v28 = vsel %vm6357_vm4, %v2182_v23, %v6963_v33  ;;  %v2197_v56 = vsel %vm6357_vm4, %v2192_v30, %v2196_v34  ;;  %v2256_v24 = vshll.u32 %v6996_v1, 16  ;;  %v8988_v25 = vcombine.low %v6839_v39, %v6849_v27  ;;  %v5338_v34 = vld [vmem:[%s6313_s29 + $0x60] sm:$0xf] }
  0x89   : > { %v2206_v54 = vrot.slane %v2205_v20, 4  ;;  %v2220_v13 = vrot.slane %v2218_v62, 5  ;;  %v2225_v11 = vrot.slane %v2223_v12, 4  ;;  %v2228_v3 = vrot.slane %v2226_v17, 5 }
  0x8a   : > { %v2216_v33 = vrot.slane %v2215_v35, 4  ;;  %v7041_v63 = vrot.slane %v2232_v46, 5  ;;  %v2238_v52 = vrot.slane %v2236_v16, 4  ;;  %v2260_v53 = vshrl.u32 %v6996_v1, 16  ;;  %v7061_v35 = vld [vmem:[%s6313_s29 + $0x5c] sm:$0x1] }
  0x8b   : > { %5920 = vmatmul.mubr.msk.bf16.gmra.mxu0 %vm756_vm3, %v8987_v6  ;;  %v8989_v39 = vcombine.low %v6462_v36, %v6469_v43  ;;  %v2249_v27 = vrot.slane %v2247_v60, 4  ;;  %v2252_v58 = vrot.slane %v2250_v57, 5  ;;  %v2271_v23 = vshrl.u32 %v5335_v51, 16 }
  0x8c   : > { %5923 = vmatprep.mubr.msk.bf16.mxu0 %vm756_vm3, %v8988_v25  ;;  %v2274_v30 = vshll.u32 %v5335_v51, 16  ;;  %v8990_v20 = vcombine.low %v8973_v2, %v8972_v10  ;;  %v7056_v62 = vcombine.low %v2187_v28, %v2197_v56  ;;  %v7058_v12 = vrot.slane %v2256_v24, 5  ;;  %v7074_v28 = vld [vmem:[%s6313_s29 + $0x64] sm:$0xf] }
  0x8d   : > { %v2262_v17 = vrot.slane %v2260_v53, 4  ;;  %v2280_v36 = vshll.u32 %v7039_v40, 16  ;;  %v2242_v43 = vshll.u32 %v7030_v50, 16  ;;  %v2273_v46 = vrot.slane %v2271_v23, 4 }
  0x8e   : > { %5886 = vmatmul.mubr.msk.bf16.gmra.mxu1 %vm756_vm3, %v8989_v39  ;;  %v2276_v16 = vrot.slane %v2274_v30, 5  ;;  %v2284_v60 = vshrl.u32 %v7039_v40, 16  ;;  %v2211_v10 = vsel %vm6357_vm4, %v2206_v54, %v6975_v45  ;;  %v2221_v2 = vsel %vm6357_vm4, %v2216_v33, %v2220_v13  ;;  %v7096_v30 = vld [vmem:[%s6313_s29 + $0x68] sm:$0x1] }
  0x8f   : > { %5889 = vmatprep.mubr.msk.bf16.mxu1 %vm756_vm3, %v8990_v20  ;;  %v2229_v57 = vor.u32 %v2228_v3, %v2225_v11  ;;  %v7071_v6 = vrot.slane %v2280_v36, 5  ;;  %v2239_v56 = vor.u32 %v2238_v52, %v7041_v63  ;;  %v2253_v24 = vor.u32 %v2252_v58, %v2249_v27  ;;  %v5341_v3 = vld [vmem:[%s6313_s29 + $0x6c] sm:$0xf]  ;;  %v7093_v27 = vld [vmem:[%s6313_s29 + $0x70] sm:$0xf] }
  0x90   : > { %v2266_v51 = vshll.u32 %v7044_v8, 16  ;;  %v2286_v25 = vrot.slane %v2284_v60, 4  ;;  %v8991_v53 = vcombine.low %v6859_v19, %v6879_v9  ;;  %v2263_v45 = vor.u32 %v2262_v17, %v7058_v12 }
  0x91   : > { %v2277_v54 = vor.u32 %v2276_v16, %v2273_v46  ;;  %v2295_v13 = vshrl.u32 %v5338_v34, 16  ;;  %v2298_v11 = vshll.u32 %v5338_v34, 16  ;;  %v8992_v33 = vcombine.low %v6871_v59, %v6895_v7  ;;  %v5344_v16 = vld [vmem:[%s6313_s29 + $0x78] sm:$0xf] }
  0x92   : > { %v2287_v52 = vor.u32 %v2286_v25, %v7071_v6  ;;  %v2290_v39 = vshll.u32 %v7061_v35, 16  ;;  %v2304_v19 = vshll.u32 %v7074_v28, 16  ;;  %v2308_v9 = vshrl.u32 %v7074_v28, 16 }
  0x93   : > { %5924 = vmatmul.mubr.msk.bf16.gmra.mxu0 %vm756_vm3, %v8991_v53  ;;  %v2230_v58 = vrot.slane %v2229_v57, 4  ;;  %v2244_v23 = vrot.slane %v2242_v43, 5  ;;  %v2297_v34 = vrot.slane %v2295_v13, 4  ;;  %v2300_v20 = vrot.slane %v2298_v11, 5 }
  0x94   : > { %5927 = vmatprep.mubr.msk.bf16.mxu0 %vm756_vm3, %v8992_v33  ;;  %v8993_v59 = vcombine.low %v8976_v26, %v8975_v38  ;;  %v7102_v7 = vcombine.low %v2211_v10, %v2221_v2  ;;  %v2240_v17 = vrot.slane %v2239_v56, 4  ;;  %v2254_v36 = vrot.slane %v2253_v24, 4  ;;  %v7112_v2 = vld [vmem:[%s6313_s29 + $0x7c] sm:$0xf] }
  0x95   : > { %v7104_v46 = vrot.slane %v2304_v19, 5  ;;  %v8994_v43 = vcombine.low %v8979_v42, %v8978_v48  ;;  %v2264_v60 = vrot.slane %v2263_v45, 4  ;;  %v2268_v57 = vrot.slane %v2266_v51, 5  ;;  %8995 = vst [vmem:[#allocation3_spill] sm:$0xff] %v7112_v2  ;;  %v5347_v19 = vld [vmem:[%s6313_s29 + $0x84] sm:$0xf] }
  0x96   : > { %5890 = vmatmul.mubr.msk.bf16.gmra.mxu1 %vm756_vm3, %v8993_v59  ;;  %v2278_v25 = vrot.slane %v2277_v54, 4  ;;  %v2310_v38 = vrot.slane %v2308_v9, 4  ;;  %v2288_v26 = vrot.slane %v2287_v52, 4  ;;  %v2292_v53 = vrot.slane %v2290_v39, 5 }
  0x97   : > { %5893 = vmatprep.mubr.msk.bf16.mxu1 %vm756_vm3, %v8994_v43  ;;  %v2301_v13 = vor.u32 %v2300_v20, %v2297_v34  ;;  %v2319_v10 = vshrl.u32 %v5341_v3, 16  ;;  %v2235_v56 = vsel %vm6357_vm4, %v2230_v58, %v7041_v63  ;;  %v2322_v24 = vshll.u32 %v5341_v3, 16  ;;  %v6188_v63 = vld [vmem:[%s6313_s29 + $0xc] sm:$0xff]   ;;  %v7146_v34 = vld [vmem:[%s6313_s29 + $0x88] sm:$0xf] }
  0x98   : > { %v2328_v48 = vshll.u32 %v7093_v27, 16  ;;  %v2332_v42 = vshrl.u32 %v7093_v27, 16  ;;  %v2245_v51 = vsel %vm6357_vm4, %v2240_v17, %v2244_v23  ;;  %v2259_v45 = vsel %vm6357_vm4, %v2254_v36, %v7058_v12  ;;  %8996 = vst [vmem:[#allocation5_spill] sm:$0xff] %v7146_v34  ;;  %v7155_v36 = vld [vmem:[%s6313_s29 + $0x74] sm:$0x1] }
  0x99   : > { %v2311_v54 = vor.u32 %v2310_v38, %v7104_v46  ;;  %v2314_v11 = vshll.u32 %v7096_v30, 16  ;;  %v2269_v3 = vsel %vm6357_vm4, %v2264_v60, %v2268_v57  ;;  %v2283_v33 = vsel %vm6357_vm4, %v2278_v25, %v7071_v6  ;;  %8998 = vst [vmem:[#allocation4_spill] sm:$0xff] %v7155_v36  ;;  %v7165_v38 = vld [vmem:[%s6313_s29 + $0x80] sm:$0x1] }
  0x9a   : > { %v2343_v52 = vshrl.u32 %v5344_v16, 16  ;;  %v2346_v12 = vshll.u32 %v5344_v16, 16  ;;  %v2293_v18 = vsel %vm6357_vm4, %v2288_v26, %v2292_v53  ;;  %v2302_v4 = vrot.slane %v2301_v13, 4  ;;  %8999 = vst [vmem:[#allocation6_spill] sm:$0xff] %v7165_v38  ;;  %v7168_v26 = vld [vmem:[%s6313_s29 + $0x8c] sm:$0x1] }
  0x9b   : > { %5928 = vmatmul.mubr.msk.bf16.gmra.mxu0 %vm756_vm3, %v5235_v55  ;;  %v2321_v55 = vrot.slane %v2319_v10, 4  ;;  %v2352_v39 = vshll.u32 %v7112_v2, 16  ;;  %v2324_v9 = vrot.slane %v2322_v24, 5  ;;  %v7142_v58 = vrot.slane %v2328_v48, 5  ;;  %9000 = vst [vmem:[#allocation8_spill] sm:$0xff] %v7168_v26  ;;  %v6189_v10 = vld [vmem:[%s6313_s29 + $0x18] sm:$0xff]  }
  0x9c   : > { %5967 = vmatprep.mubr.msk.bf16.mxu0 %vm756_vm3, %v7012_v15  ;;  %v2334_v23 = vrot.slane %v2332_v42, 4  ;;  %v2356_v6 = vshrl.u32 %v7112_v2, 16  ;;  %v8997_v15 = vcombine.low %v8981_v29, %v6622_v37  ;;  %v7152_v20 = vcombine.low %v2235_v56, %v2245_v51  ;;  %v5350_v51 = vld [vmem:[%s6313_s29 + $0x90] sm:$0xf] }
  0x9d   : > { %v2312_v59 = vrot.slane %v2311_v54, 4  ;;  %v2316_v17 = vrot.slane %v2314_v11, 5  ;;  %v2345_v16 = vrot.slane %v2343_v52, 4  ;;  %v2348_v43 = vrot.slane %v2346_v12, 5 }
  0x9e   : > { %5894 = vmatmul.mubr.msk.bf16.gmra.mxu1 %vm756_vm3, %v8997_v15  ;;  %v7158_v60 = vrot.slane %v2352_v39, 5  ;;  %v2358_v57 = vrot.slane %v2356_v6, 4  ;;  %v2367_v25 = vshrl.u32 %v5347_v19, 16  ;;  %v7160_v37 = vcombine.low %v2259_v45, %v2269_v3  ;;  %v7179_v45 = vld [vmem:[%s6313_s29 + $0x94] sm:$0xf] }
  0x9f   : > { %5933 = vmatprep.mubr.msk.bf16.mxu1 %vm756_vm3, %v6188_v63  ;;  %v7162_v29 = vcombine.low %v2283_v33, %v2293_v18  ;;  %v2370_v53 = vshll.u32 %v5347_v19, 16  ;;  %v2376_v13 = vshll.u32 %v7146_v34, 16  ;;  %v2307_v56 = vsel %vm6357_vm4, %v2302_v4, %v7104_v46  ;;  %9001 = vst [vmem:[#allocation7_spill] sm:$0xff] %v7179_v45  ;;  %v7187_v33 = vld [vmem:[%s8914_s1 + $0x10] sm:$0x3]  ;;  %v6190_v46 = vld [vmem:[%s6313_s29 + $0x24] sm:$0xff]  }
  0xa0   : > { %v2325_v24 = vor.u32 %v2324_v9, %v2321_v55  ;;  %v2335_v48 = vor.u32 %v2334_v23, %v7142_v58  ;;  %v2338_v42 = vshll.u32 %v7155_v36, 16  ;;  %v2369_v54 = vrot.slane %v2367_v25, 4  ;;  %9002 = vst [vmem:[#allocation9_spill] sm:$0xff] %v7187_v33 }
  0xa1   : > { %v2372_v11 = vrot.slane %v2370_v53, 5  ;;  %v7181_v63 = vrot.slane %v2376_v13, 5  ;;  %v2380_v3 = vshrl.u32 %v7146_v34, 16  ;;  %v2317_v52 = vsel %vm6357_vm4, %v2312_v59, %v2316_v17 }
  0xa2   : > { %v2349_v12 = vor.u32 %v2348_v43, %v2345_v16  ;;  %v2359_v18 = vor.u32 %v2358_v57, %v7158_v60  ;;  %v2362_v4 = vshll.u32 %v7165_v38, 16  ;;  %v2391_v19 = vshrl.u32 %v5350_v51, 16  ;;  %v7221_v57 = vld [vmem:[%s6313_s29 + $0xa0] sm:$0xf] }
  0xa3   : > { %5968 = vmatmul.mubr.msk.bf16.vlgmr.msra.gmra.mxu0 %vm756_vm3, %v7022_v22  ;;  %v2373_v55 = vor.u32 %v2372_v11, %v2369_v54  ;;  %v2382_v39 = vrot.slane %v2380_v3, 4  ;;  %v2394_v9 = vshll.u32 %v5350_v51, 16  ;;  %v5353_v22 = vld [vmem:[%s6313_s29 + $0x9c] sm:$0xf]  ;;  %v7200_v23 = vrot.slane %v2325_v24, 4  ;;  %9004 = vst [vmem:[#allocation10_spill] sm:$0xff] %v7221_v57 }
  0xa4   : > { %6034 = vmatpush3.bf16.msra.mxu0 %v7016_v32  ;;  %5971 = vmatprep.mubr.msk.bf16.mxu0 %vm756_vm3, %v7056_v62  ;;  %v7202_v6 = vrot.slane %v2338_v42, 5  ;;  %v2386_v15 = vshll.u32 %v7168_v26, 16  ;;  %v2400_v59 = vshll.u32 %v7179_v45, 16  ;;  %v7209_v32 = vld [vmem:[%s8914_s1 + $0xe] sm:$0x3]  ;;  %v7214_v62 = vcombine.low %v2307_v56, %v2317_v52 }
  0xa5   : > { %9003 = vst [vmem:[#allocation11_spill] sm:$0xff] %v7209_v32  ;;  %6146 = vmatprep.subr.msk.bf16.mxu0 %vm805_vm0, %v7187_v33  ;;  %v7216_v17 = vrot.slane %v2335_v48, 4  ;;  %v2383_v16 = vor.u32 %v2382_v39, %v7181_v63  ;;  %v2404_v43 = vshrl.u32 %v7179_v45, 16  ;;  %v7225_v25 = vrot.slane %v2349_v12, 4  ;;  %v7234_v56 = vld [vmem:[%s6313_s29 + $0x98] sm:$0x1] }
  0xa6   : > { %5934 = vmatmul.mubr.msk.bf16.vlgmr.msra.gmra.mxu1 %vm756_vm3, %v6189_v10  ;;  %v7227_v53 = vrot.slane %v2359_v18, 4  ;;  %v7229_v13 = vrot.slane %v2362_v4, 5  ;;  %v7231_v10 = vrot.slane %v2373_v55, 4  ;;  %9005 = vst [vmem:[#allocation12_spill] sm:$0xff] %v7234_v56  ;;  %v2393_v24 = vrot.slane %v2391_v19, 4  ;;  %v6192_v19 = vld [vmem:[%s6313_s29 + $0x3c] sm:$0xff]  }
  0xa7   : > { %6000 = vmatpush3.bf16.msra.mxu1 %v7007_v14  ;;  %5937 = vmatprep.mubr.msk.bf16.mxu1 %vm756_vm3, %v6190_v46  ;;  %v2396_v48 = vrot.slane %v2394_v9, 5  ;;  %v2415_v42 = vshrl.u32 %v5353_v22, 16  ;;  %v2418_v51 = vshll.u32 %v5353_v22, 16  ;;  %v6191_v14 = vld [vmem:[%s6313_s29 + $0x30] sm:$0xff]   ;;  %v7243_v11 = vrot.slane %v2386_v15, 5 }
  0xa8   : > { %6145 = vmatprep.subr.msk.bf16.mxu1 %vm805_vm0, %v7209_v32  ;;  %v7245_v3 = vrot.slane %v2400_v59, 5  ;;  %v2424_v46 = vshll.u32 %v7221_v57, 16  ;;  %v5356_v52 = vld [vmem:[%s6313_s29 + $0xa8] sm:$0xf]  ;;  %v7249_v12 = vrot.slane %v2383_v16, 4  ;;  %v2406_v18 = vrot.slane %v2404_v43, 4 }
  0xa9   : > { %v2410_v4 = vshll.u32 %v7234_v56, 16  ;;  %v2428_v55 = vshrl.u32 %v7221_v57, 16  ;;  %v7254_v39 = vld [vmem:[%s6313_s29 + $0xac] sm:$0xf]  ;;  %v2397_v59 = vor.u32 %v2396_v48, %v2393_v24  ;;  %v7278_v16 = vld [vmem:[%s6313_s29 + $0xa4] sm:$0x1] }
  0xaa   : > { %9006 = vst [vmem:[#allocation13_spill] sm:$0xff] %v7254_v39  ;;  %9007 = vst [vmem:[#allocation2_spill] sm:$0xff] %v7278_v16  ;;  %v2417_v43 = vrot.slane %v2415_v42, 4  ;;  %v2420_v22 = vrot.slane %v2418_v51, 5  ;;  %v2439_v54 = vshrl.u32 %v5356_v52, 16  ;;  %v7280_v9 = vrot.slane %v2424_v46, 5 }
  0xab   : > { %5972 = vmatmul.mubr.msk.bf16.gmra.mxu0 %vm756_vm3, %v7102_v7  ;;  %v2430_v32 = vrot.slane %v2428_v55, 4  ;;  %v2442_v15 = vshll.u32 %v5356_v52, 16  ;;  %v2448_v33 = vshll.u32 %v7254_v39, 16  ;;  %v5359_v57 = vld [vmem:[%s6313_s29 + $0xb4] sm:$0xf]  ;;  %v2407_v24 = vor.u32 %v2406_v18, %v7245_v3 }
  0xac   : > { %5975 = vmatprep.mubr.msk.bf16.mxu0 %vm756_vm3, %v7152_v20  ;;  %v2389_v20 = vsel %vm6357_vm4, %v7249_v12, %v7243_v11  ;;  %v7290_v48 = vrot.slane %v2410_v4, 5  ;;  %v7293_v42 = vld [vmem:[%s6313_s29 + $0xb0] sm:$0x1]  ;;  %v2441_v51 = vrot.slane %v2439_v54, 4  ;;  %v7296_v46 = vld [vmem:[%s6313_s29 + $0xb8] sm:$0xf]  ;;  %v2421_v18 = vor.u32 %v2420_v22, %v2417_v43 }
  0xad   : > { %9008 = vst [vmem:[#allocation14_spill] sm:$0xff] %v7293_v42  ;;  %9009 = vst [vmem:[#allocation15_spill] sm:$0xff] %v7296_v46  ;;  %v2444_v52 = vrot.slane %v2442_v15, 5  ;;  %v7300_v55 = vrot.slane %v2448_v33, 5  ;;  %v2452_v11 = vshrl.u32 %v7254_v39, 16  ;;  %v7303_v12 = vrot.slane %v2397_v59, 4 }
  0xae   : > { %5938 = vmatmul.mubr.msk.bf16.gmra.mxu1 %vm756_vm3, %v6191_v14  ;;  %v2434_v14 = vshll.u32 %v7278_v16, 16  ;;  %v7306_v4 = vld [vmem:[%s6313_s29 + $0xbc] sm:$0x1]  ;;  %v2463_v54 = vshrl.u32 %v5359_v57, 16  ;;  %v2466_v7 = vshll.u32 %v5359_v57, 16  ;;  %v2431_v56 = vor.u32 %v2430_v32, %v7280_v9  ;;  %v6193_v16 = vld [vmem:[%s6313_s29 + $0x48] sm:$0xff]  }
  0xaf   : > { %5941 = vmatprep.mubr.msk.bf16.mxu1 %vm756_vm3, %v6192_v19  ;;  %v2454_v45 = vrot.slane %v2452_v11, 4  ;;  %v2458_v19 = vshll.u32 %v7293_v42, 16  ;;  %v2472_v15 = vshll.u32 %v7296_v46, 16  ;;  %v5362_v33 = vld [vmem:[%s6313_s29 + $0xc0] sm:$0xf]  ;;  %v2445_v26 = vor.u32 %v2444_v52, %v2441_v51  ;;  %v6194_v57 = vld [vmem:[%s6313_s29 + $0x54] sm:$0xff]  }
  0xb0   : > { %v2465_v39 = vrot.slane %v2463_v54, 4  ;;  %v2468_v34 = vrot.slane %v2466_v7, 5  ;;  %v2476_v59 = vshrl.u32 %v7296_v46, 16  ;;  %v7315_v22 = vld [vmem:[%s6313_s29 + $0xc4] sm:$0xf]  ;;  %v2408_v43 = vrot.slane %v2407_v24, 4 }
  0xb1   : > { %v2436_v32 = vrot.slane %v2434_v14, 5  ;;  %v2455_v11 = vor.u32 %v2454_v45, %v7300_v55  ;;  %v2474_v42 = vrot.slane %v2472_v15, 5  ;;  %v2482_v7 = vshll.u32 %v7306_v4, 16  ;;  %v7327_v45 = vld [vmem:[%s6313_s29 + $0xc8] sm:$0x1] }
  0xb2   : > { %v2469_v51 = vor.u32 %v2468_v34, %v2465_v39  ;;  %v2478_v52 = vrot.slane %v2476_v59, 4  ;;  %v2487_v54 = vshrl.u32 %v5362_v33, 16  ;;  %v2422_v46 = vrot.slane %v2421_v18, 4 }
  0xb3   : > { %5976 = vmatmul.mubr.msk.bf16.gmra.mxu0 %vm756_vm3, %v7160_v37  ;;  %v2432_v38 = vrot.slane %v2431_v56, 4  ;;  %v2490_v2 = vshll.u32 %v5362_v33, 16  ;;  %v2496_v37 = vshll.u32 %v7315_v22, 16  ;;  %v2446_v24 = vrot.slane %v2445_v26, 4 }
  0xb4   : > { %5979 = vmatprep.mubr.msk.bf16.mxu0 %vm756_vm3, %v7162_v29  ;;  %v2460_v14 = vrot.slane %v2458_v19, 5  ;;  %v2479_v36 = vor.u32 %v2478_v52, %v2474_v42  ;;  %v2489_v15 = vrot.slane %v2487_v54, 4  ;;  %v2456_v34 = vrot.slane %v2455_v11, 4 }
  0xb5   : > { %v2492_v29 = vrot.slane %v2490_v2, 5  ;;  %v7330_v39 = vrot.slane %v2496_v37, 5  ;;  %v2500_v56 = vshrl.u32 %v7315_v22, 16  ;;  %v9010_v26 = vsel %vm6357_vm4, %v7216_v17, %v7202_v6 }
  0xb6   : > { %5942 = vmatmul.mubr.msk.bf16.gmra.mxu1 %vm756_vm3, %v6193_v16  ;;  %v9011_v16 = vsel %vm6357_vm4, %v7200_v23, %v7142_v58  ;;  %v2470_v19 = vrot.slane %v2469_v51, 4  ;;  %v2480_v33 = vrot.slane %v2479_v36, 4  ;;  %v2484_v2 = vrot.slane %v2482_v7, 5  ;;  %v6195_v23 = vld [vmem:[%s6313_s29 + $0x60] sm:$0xff]  }
  0xb7   : > { %5945 = vmatprep.mubr.msk.bf16.mxu1 %vm756_vm3, %v6194_v57  ;;  %v5374_v18 = vcombine.low %v9011_v16, %v9010_v26  ;;  %v9012_v59 = vsel %vm6357_vm4, %v7227_v53, %v7229_v13  ;;  %v9013_v6 = vsel %vm6357_vm4, %v7225_v25, %v7158_v60  ;;  %v2493_v57 = vor.u32 %v2492_v29, %v2489_v15  ;;  %v5400_v13 = vld [vmem:[%s6313_s29 + $0x24] sm:$0xe]  ;;  %v5403_v26 = vld [vmem:[%s6313_s29 + $0x48] sm:$0xe] }
  0xb8   : > { %v5375_v17 = vcombine.low %v9013_v6, %v9012_v59  ;;  %v2502_v11 = vrot.slane %v2500_v56, 4  ;;  %v2506_v58 = vshll.u32 %v7327_v45, 16  ;;  %v9014_v36 = vsel %vm6357_vm4, %v7231_v10, %v7181_v63  ;;  %v6196_v63 = vld [vmem:[%s6313_s29 + $0x6c] sm:$0xff]   ;;  %v5404_v6 = vld [vmem:[%s6313_s29 + $0x54] sm:$0xe] }
  0xb9   : > { %v5376_v51 = vcombine.low %v9014_v36, %v2389_v20  ;;  %v2403_v53 = vsel %vm6357_vm4, %v7303_v12, %v7245_v3  ;;  %v2413_v60 = vsel %vm6357_vm4, %v2408_v43, %v7290_v48  ;;  %v2427_v25 = vsel %vm6357_vm4, %v2422_v46, %v7280_v9  ;;  %v7383_v12 = vld [vmem:[%s6313_s29 + $0xc] sm:$0xe] }
  0xba   : > { %v2437_v10 = vsel %vm6357_vm4, %v2432_v38, %v2436_v32  ;;  %v2451_v3 = vsel %vm6357_vm4, %v2446_v24, %v7300_v55  ;;  %v2461_v20 = vsel %vm6357_vm4, %v2456_v34, %v2460_v14  ;;  %v2503_v48 = vor.u32 %v2502_v11, %v7330_v39  ;;  %v5401_v55 = vld [vmem:[%s6313_s29 + $0x30] sm:$0xe]  ;;  %v5402_v14 = vld [vmem:[%s6313_s29 + $0x3c] sm:$0xe] }
  0xbb   : > { %5980 = vmatmul.mubr.msk.bf16.gmra.mxu0 %vm756_vm3, %v7214_v62  ;;  %v2475_v62 = vsel %vm6357_vm4, %v2470_v19, %v2474_v42  ;;  %v2485_v38 = vsel %vm6357_vm4, %v2480_v33, %v2484_v2  ;;  %v7390_v9 = vrot.slane %v2493_v57, 4  ;;  %v2870_v46 = vrot.slane %v6874_v49, 5  ;;  %v6197_v57 = vld [vmem:[%s6313_s29 + $0x78] sm:$0xff]  }
  0xbc   : > { %5983 = vmatprep.mubr.msk.bf16.mxu0 %vm756_vm3, %v5374_v18  ;;  %v7394_v43 = vcombine.low %v2403_v53, %v2413_v60  ;;  %v7396_v32 = vrot.slane %v2503_v48, 4  ;;  %v7398_v52 = vrot.slane %v2506_v58, 5  ;;  %v5416_v7 = vrot.slane %v5400_v13, 9  ;;  %v6198_v53 = vld [vmem:[%s6313_s29 + $0x84] sm:$0xff]   ;;  %v5405_v13 = vld [vmem:[%s6313_s29 + $0x60] sm:$0xe] }
  0xbd   : > { %v7401_v54 = vcombine.low %v2427_v25, %v2437_v10  ;;  %v7403_v42 = vcombine.low %v2451_v3, %v2461_v20  ;;  %v5414_v37 = vrot.slane %v7383_v12, 9  ;;  %v2884_v24 = vrot.slane %v6923_v44, 5  ;;  %v6204_v49 = vld [vmem:[%s6313_s29 + $0x18] sm:$0xff]  }
  0xbe   : > { %5946 = vmatmul.mubr.msk.bf16.gmra.mxu1 %vm756_vm3, %v6195_v23  ;;  %v7409_v15 = vcombine.low %v2475_v62, %v2485_v38  ;;  %v2873_v34 = vrot.slane %v6910_v47, 5  ;;  %v2887_v29 = vrot.slane %v6938_v21, 5  ;;  %v5417_v56 = vrot.slane %v5401_v55, 9  ;;  %v5407_v55 = vld [vmem:[%s6313_s29 + $0x78] sm:$0xe] }
  0xbf   : > { %5949 = vmatprep.mubr.msk.bf16.mxu1 %vm756_vm3, %v6196_v63  ;;  %v2499_v16 = vsel %vm6357_vm4, %v7390_v9, %v7330_v39  ;;  %v7420_v44 = vrot.slane %v2870_v46, 4  ;;  %v7424_v18 = vsel %vm6643_vm7, %v5416_v7, %v2884_v24  ;;  %v2886_v19 = vrot.slane %v2884_v24, 4 }
  0xc0   : > { %v2509_v21 = vsel %vm6357_vm4, %v7396_v32, %v7398_v52  ;;  %v2891_v33 = vrot.slane %v6961_v5, 5  ;;  %v2894_v2 = vrot.slane %v6969_v41, 5  ;;  %v5418_v59 = vrot.slane %v5402_v14, 9  ;;  %v6203_v52 = vld [vmem:[%s6313_s29 + $0xc0] sm:$0xff]  }
  0xc1   : > { %v7436_v11 = vsel %vm6643_vm7, %v2886_v19, %v2887_v29  ;;  %v2898_v58 = vrot.slane %v6978_v61, 5  ;;  %v2901_v23 = vrot.slane %v7030_v50, 5  ;;  %v5419_v36 = vrot.slane %v5403_v26, 9  ;;  %v5408_v19 = vld [vmem:[%s6313_s29 + $0x84] sm:$0xe] }
  0xc2   : > { %v5433_v5 = vcombine.low %v7424_v18, %v7436_v11  ;;  %v7446_v41 = vsel %vm6643_vm7, %v5417_v56, %v2891_v33  ;;  %v2893_v60 = vrot.slane %v2891_v33, 4  ;;  %v2905_v25 = vrot.slane %v6996_v1, 5 }
  0xc3   : > { %5984 = vmatmul.mubr.msk.bf16.gmra.mxu0 %vm756_vm3, %v5375_v17  ;;  %v7453_v61 = vsel %vm6643_vm7, %v5418_v59, %v2898_v58  ;;  %v2900_v50 = vrot.slane %v2898_v58, 4  ;;  %v2908_v17 = vrot.slane %v7044_v8, 5  ;;  %v5420_v63 = vrot.slane %v5404_v6, 9  ;;  %v9015_v59 = vld [vmem:[#allocation4_spill] sm:$0xff] }
  0xc4   : > { %5987 = vmatprep.mubr.msk.bf16.mxu0 %vm756_vm3, %v5376_v51  ;;  %v7458_v10 = vsel %vm6643_vm7, %v2893_v60, %v2894_v2  ;;  %v7462_v3 = vsel %vm6643_vm7, %v5419_v36, %v2905_v25  ;;  %v2907_v1 = vrot.slane %v2905_v25, 4  ;;  %v2912_v20 = vrot.slane %v7039_v40, 5  ;;  %v5406_v51 = vld [vmem:[%s6313_s29 + $0x6c] sm:$0xe]  ;;  %v6199_v58 = vld [vmem:[%s6313_s29 + $0x90] sm:$0xff]  }
  0xc5   : > { %v5434_v48 = vcombine.low %v7446_v41, %v7458_v10  ;;  %v7471_v8 = vsel %vm6643_vm7, %v2900_v50, %v2901_v23  ;;  %v2915_v62 = vrot.slane %v7061_v35, 5  ;;  %v5421_v38 = vrot.slane %v5405_v13, 9  ;;  %v9016_v36 = vld [vmem:[#allocation3_spill] sm:$0xff]  ;;  %v5409_v60 = vld [vmem:[%s6313_s29 + $0x90] sm:$0xe]  ;;  %v9017_v50 = vld [vmem:[#allocation6_spill] sm:$0xff] }
  0xc6   : > { %5950 = vmatmul.mubr.msk.bf16.gmra.mxu1 %vm756_vm3, %v6197_v57  ;;  %v5435_v40 = vcombine.low %v7453_v61, %v7471_v8  ;;  %v7480_v7 = vsel %vm6643_vm7, %v2907_v1, %v2908_v17  ;;  %v7484_v24 = vsel %vm6643_vm7, %v5420_v63, %v2912_v20  ;;  %v2914_v14 = vrot.slane %v2912_v20, 4 }
  0xc7   : > { %5953 = vmatprep.mubr.msk.bf16.mxu1 %vm756_vm3, %v6198_v53  ;;  %v5436_v35 = vcombine.low %v7462_v3, %v7480_v7  ;;  %v2919_v29 = vrot.slane %v7074_v28, 5  ;;  %v2922_v56 = vrot.slane %v7096_v30, 5  ;;  %v5422_v26 = vrot.slane %v5406_v51, 9  ;;  %v9018_v51 = vld [vmem:[#allocation5_spill] sm:$0xff]  ;;  %v5540_v3 = vld [vmem:[%s6313_s29 + $0x48] sm:$0xf] }
  0xc8   : > { %v7493_v33 = vsel %vm6643_vm7, %v2914_v14, %v2915_v62  ;;  %v2926_v2 = vrot.slane %v7093_v27, 5  ;;  %v2929_v6 = vrot.slane %v9015_v59, 5  ;;  %v5423_v57 = vrot.slane %v5407_v55, 9  ;;  %v6200_v27 = vld [vmem:[%s6313_s29 + $0x9c] sm:$0xff]   ;;  %v9026_v55 = vld [vmem:[#allocation15_spill] sm:$0xff] }
  0xc9   : > { %v5437_v23 = vcombine.low %v7484_v24, %v7493_v33  ;;  %v7502_v28 = vsel %vm6643_vm7, %v5421_v38, %v2919_v29  ;;  %v2921_v30 = vrot.slane %v2919_v29, 4  ;;  %v2933_v53 = vrot.slane %v9016_v36, 5  ;;  %v5410_v38 = vld [vmem:[%s6313_s29 + $0x9c] sm:$0xe]  ;;  %v9021_v36 = vld [vmem:[#allocation12_spill] sm:$0xff] }
  0xca   : > { %v7511_v25 = vsel %vm6643_vm7, %v5422_v26, %v2926_v2  ;;  %v2928_v13 = vrot.slane %v2926_v2, 4  ;;  %v2936_v17 = vrot.slane %v9017_v50, 5  ;;  %v5424_v63 = vrot.slane %v5408_v19, 9  ;;  %v5411_v26 = vld [vmem:[%s6313_s29 + $0xa8] sm:$0xe] }
  0xcb   : > { %5988 = vmatmul.mubr.msk.bf16.gmra.mxu0 %vm756_vm3, %v7394_v43  ;;  %v7518_v1 = vsel %vm6643_vm7, %v2921_v30, %v2922_v56  ;;  %v7522_v43 = vsel %vm6643_vm7, %v5423_v57, %v2933_v53  ;;  %v2935_v20 = vrot.slane %v2933_v53, 4  ;;  %v2940_v62 = vrot.slane %v9018_v51, 5  ;;  %v5413_v57 = vld [vmem:[%s6313_s29 + $0xc0] sm:$0xe]  ;;  %v6201_v19 = vld [vmem:[%s6313_s29 + $0xa8] sm:$0xff]  }
  0xcc   : > { %5991 = vmatprep.mubr.msk.bf16.mxu0 %vm756_vm3, %v7401_v54  ;;  %v7530_v14 = vsel %vm6643_vm7, %v2928_v13, %v2929_v6  ;;  %v9019_v54 = vld [vmem:[#allocation8_spill] sm:$0xff]  ;;  %v5425_v56 = vrot.slane %v5409_v60, 9  ;;  %v2950_v53 = vrot.slane %v9021_v36, 5  ;;  %v5426_v60 = vrot.slane %v5410_v38, 9  ;;  %v9024_v38 = vld [vmem:[#allocation13_spill] sm:$0xff] }
  0xcd   : > { %v2943_v29 = vrot.slane %v9019_v54, 5  ;;  %v7539_v2 = vsel %vm6643_vm7, %v2935_v20, %v2936_v17  ;;  %v7543_v59 = vsel %vm6643_vm7, %v5424_v63, %v2940_v62  ;;  %v2942_v6 = vrot.slane %v2940_v62, 4  ;;  %v5412_v13 = vld [vmem:[%s6313_s29 + $0xb4] sm:$0xe]  ;;  %v9022_v17 = vld [vmem:[#allocation10_spill] sm:$0xff] }
  0xce   : > { %5954 = vmatmul.mubr.msk.bf16.gmra.mxu1 %vm756_vm3, %v6199_v58  ;;  %v9020_v58 = vld [vmem:[#allocation7_spill] sm:$0xff]  ;;  %v2954_v63 = vrot.slane %v9022_v17, 5  ;;  %v9023_v20 = vld [vmem:[#allocation2_spill] sm:$0xff]  ;;  %v5427_v62 = vrot.slane %v5411_v26, 9  ;;  %v2961_v36 = vrot.slane %v9024_v38, 5  ;;  %v5428_v26 = vrot.slane %v5412_v13, 9 }
  0xcf   : > { %5957 = vmatprep.mubr.msk.bf16.mxu1 %vm756_vm3, %v6200_v27  ;;  %v2947_v30 = vrot.slane %v9020_v58, 5  ;;  %v7553_v50 = vsel %vm6643_vm7, %v2942_v6, %v2943_v29  ;;  %v2957_v51 = vrot.slane %v9023_v20, 5  ;;  %v9025_v17 = vld [vmem:[#allocation14_spill] sm:$0xff]  ;;  %v6202_v27 = vld [vmem:[%s6313_s29 + $0xb4] sm:$0xff]   ;;  %v2874_v39 = vsel %vm6643_vm7, %v7420_v44, %v2873_v34  ;;  %v7770_v7 = vld [vmem:[%s6313_s29 + $0x4c] sm:$0xf] }
  0xd0   : > { %v7568_v29 = vsel %vm6643_vm7, %v5426_v60, %v2954_v63  ;;  %v2956_v6 = vrot.slane %v2954_v63, 4  ;;  %v2964_v20 = vrot.slane %v9025_v17, 5  ;;  %v2963_v38 = vrot.slane %v2961_v36, 4  ;;  %v6221_v44 = vld [vmem:[%s6313_s29 + $0x20] sm:$0x1] }
  0xd1   : > { %v7561_v54 = vsel %vm6643_vm7, %v5425_v56, %v2947_v30  ;;  %v2949_v58 = vrot.slane %v2947_v30, 4  ;;  %v7580_v30 = vsel %vm6643_vm7, %v5427_v62, %v2961_v36  ;;  %v2968_v60 = vrot.slane %v9026_v55, 5 }
  0xd2   : > { %v5429_v63 = vrot.slane %v5413_v57, 9  ;;  %v7596_v55 = vsel %vm6643_vm7, %v2963_v38, %v2964_v20  ;;  %v2975_v57 = vrot.slane %v7315_v22, 5  ;;  %v2871_v22 = vsel %vm6643_vm7, %v5414_v37, %v2870_v46  ;;  %v6206_v38 = vld [vmem:[%s6313_s29 + $0x30] sm:$0xff]  }
  0xd3   : > { %5992 = vmatmul.mubr.msk.bf16.gmra.mxu0 %vm756_vm3, %v7403_v42  ;;  %v7576_v56 = vsel %vm6643_vm7, %v2949_v58, %v2950_v53  ;;  %v7589_v42 = vsel %vm6643_vm7, %v2956_v6, %v2957_v51  ;;  %v2971_v53 = vrot.slane %v7306_v4, 5  ;;  %v2970_v58 = vrot.slane %v2968_v60, 4 }
  0xd4   : > { %5995 = vmatprep.mubr.msk.bf16.mxu0 %vm756_vm3, %v7409_v15  ;;  %v7600_v15 = vsel %vm6643_vm7, %v5428_v26, %v2968_v60  ;;  %v2978_v51 = vrot.slane %v7327_v45, 5  ;;  %v5399_v45 = vld [vmem:[%s6313_s29 + $0x18] sm:$0xe]  ;;  %v7640_v9 = vsel %vm6643_vm7, %v5429_v63, %v2975_v57  ;;  %v2977_v46 = vrot.slane %v2975_v57, 4  ;;  %v6205_v26 = vld [vmem:[%s6313_s29 + $0x24] sm:$0xff]  }
  0xd5   : > { %v7628_v32 = vsel %vm6643_vm7, %v2970_v58, %v2971_v53  ;;  %v5415_v37 = vrot.slane %v5399_v45, 9  ;;  %v5431_v34 = vcombine.low %v2871_v22, %v2874_v39  ;;  %v9027_v60 = vld [vmem:[#allocation9_spill] sm:$0xff] }
  0xd6   : > { %5958 = vmatmul.mubr.msk.bf16.gmra.mxu1 %vm756_vm3, %v6201_v19  ;;  %v5381_v19 = vcombine.low %v2499_v16, %v2509_v21  ;;  %v7645_v47 = vsel %vm6643_vm7, %v2977_v46, %v2978_v51  ;;  %v2880_v21 = vrot.slane %v6221_v44, 5  ;;  %v4634_v53 = vsel %vm805_vm0, %v9027_v60, 0  ;;  %v5528_v63 = vld [vmem:[%s6313_s29 + $0x18] sm:$0xf]  ;;  %v5529_v57 = vld [vmem:[%s6313_s29 + $0x1c] sm:$0xf] }
  0xd7   : > { %5961 = vmatprep.mubr.msk.bf16.mxu1 %vm756_vm3, %v6202_v27  ;;  %v6220_v27 = vld [vmem:[%s6313_s29 + $0x1c] sm:$0xf]  ;;  %v5531_v51 = vld [vmem:[%s6313_s29 + $0x24] sm:$0xf]  ;;  %v3682_v45 = vshrl.u32 %v5528_v63, 16  ;;  %v3691_v39 = vshll.u32 %v5529_v57, 16 }
  0xd8   : > { %v2877_v36 = vrot.slane %v6220_v27, 5  ;;  %v3685_v27 = vshll.u32 %v5528_v63, 16  ;;  %v3706_v46 = vshrl.u32 %v5531_v51, 16  ;;  %v6208_v44 = vld [vmem:[%s6313_s29 + $0x48] sm:$0xff]   ;;  %v5609_v60 = vld [vmem:[%s6313_s29 + $0x18] sm:$0xe] }
  0xd9   : > { %v7686_v63 = vld [vmem:[%s6313_s29 + $0x2c] sm:$0x1] }
  0xda   : > { %v2879_v16 = vrot.slane %v2877_v36, 4  ;;  %v2878_v17 = vsel %vm6643_vm7, %v5415_v37, %v2877_v36  ;;  %v7670_v36 = vld [vmem:[%s6313_s29 + $0x28] sm:$0xf]  ;;  %v6207_v37 = vld [vmem:[%s6313_s29 + $0x3c] sm:$0xff]   ;;  %v3708_v18 = vrot.slane %v3706_v46, 4 }
  0xdb   : > { %5996 = vmatmul.mubr.msk.bf16.gmra.mxu0 %vm756_vm3, %v5381_v19  ;;  %v9028_v19 = vld [vmem:[#allocation11_spill] sm:$0xff] }
  0xdc   : > { %6035 = vmatprep.mubr.msk.bf16.mxu0 %vm756_vm3, %v6204_v49  ;;  %v2881_v20 = vsel %vm6643_vm7, %v2879_v16, %v2880_v21  ;;  %v4164_v22 = vsel %vm805_vm0, %v9028_v19, 0  ;;  %v3695_v49 = vshrl.u32 %v5529_v57, 16  ;;  %v3719_v16 = vshrl.u32 %v7670_v36, 16  ;;  %v5530_v21 = vld [vmem:[%s6313_s29 + $0x20] sm:$0x1] }
  0xdd   : > { %v5432_v58 = vcombine.low %v2878_v17, %v2881_v20  ;;  %v3684_v17 = vrot.slane %v3682_v45, 4  ;;  %v3687_v20 = vrot.slane %v3685_v27, 5  ;;  %v5534_v19 = vld [vmem:[%s6313_s29 + $0x30] sm:$0xf]  ;;  %v3701_v45 = vshll.u32 %v5530_v21, 16 }
  0xde   : > { %5962 = vmatmul.mubr.msk.bf16.gmra.mxu1 %vm756_vm3, %v6203_v52  ;;  %v3709_v52 = vshll.u32 %v5531_v51, 16  ;;  %v3721_v51 = vrot.slane %v3719_v16, 4  ;;  %v5625_v27 = vrot.slane %v5609_v60, 9  ;;  %v4428_v46 = vrot.slane %v5530_v21, 5  ;;  %v5610_v16 = vld [vmem:[%s6313_s29 + $0x24] sm:$0xe] }
  0xdf   : > { %6001 = vmatprep.mubr.msk.bf16.mxu1 %vm756_vm3, %v5431_v34  ;;  %v3715_v34 = vshll.u32 %v7670_v36, 16  ;;  %v6209_v21 = vld [vmem:[%s6313_s29 + $0x54] sm:$0xff]   ;;  %v3733_v10 = vshll.u32 %v5534_v19, 16  ;;  %v6210_v60 = vld [vmem:[%s6313_s29 + $0x60] sm:$0xff]  }
  0xe0   : > { %v3711_v11 = vrot.slane %v3709_v52, 5  ;;  %v3725_v52 = vshll.u32 %v7686_v63, 16 }
  0xe3   : > { %6036 = vmatmul.mubr.msk.bf16.vlgmr.msra.gmra.mxu0 %vm756_vm3, %v6205_v26  ;;  %v7682_v26 = vrot.slane %v3691_v39, 5 }
  0xe4   : > { %6102 = vmatpush3.bf16.msra.mxu0 %v4634_v53  ;;  %6039 = vmatprep.mubr.msk.bf16.mxu0 %vm756_vm3, %v6206_v38  ;;  %v3697_v38 = vrot.slane %v3695_v49, 4  ;;  %v4425_v53 = vrot.slane %v5529_v57, 5  ;;  %v7696_v57 = vld [vmem:[%s6313_s29 + $0x34] sm:$0xf] }
  0xe6   : > { %6002 = vmatmul.mubr.msk.bf16.vlgmr.msra.gmra.mxu1 %vm756_vm3, %v5432_v58  ;;  %v7691_v58 = vrot.slane %v3715_v34, 5  ;;  %v3698_v39 = vor.u32 %v3697_v38, %v7682_v26  ;;  %v4427_v49 = vrot.slane %v4425_v53, 4  ;;  %v3712_v34 = vor.u32 %v3711_v11, %v3708_v18 }
  0xe7   : > { %6068 = vmatpush3.bf16.msra.mxu1 %v4164_v22  ;;  %6005 = vmatprep.mubr.msk.bf16.mxu1 %vm756_vm3, %v5433_v5  ;;  %v7689_v5 = vpop.f32.mrf.mxu0  ;;  %v3688_v22 = vor.u32 %v3687_v20, %v3684_v17  ;;  %v3730_v17 = vshrl.u32 %v5534_v19, 16  ;;  %v3743_v38 = vshrl.u32 %v7696_v57, 16  ;;  %v7721_v61 = vsel %vm6643_vm7, %v5625_v27, %v4425_v53  ;;  %v5537_v19 = vld [vmem:[%s6313_s29 + $0x3c] sm:$0xf] }
  0xe8   : > { %v3722_v41 = vor.u32 %v3721_v51, %v7691_v58  ;;  %v3699_v8 = vrot.slane %v3698_v39, 4  ;;  %v3727_v11 = vrot.slane %v3725_v52, 5  ;;  %v5626_v51 = vrot.slane %v5610_v16, 9  ;;  %v7735_v39 = vld [vmem:[%s6313_s29 + $0x38] sm:$0x1] }
  0xe9   : > { %v7713_v20 = vpop.f32.mrf.mxu0  ;;  %v3689_v18 = vrot.slane %v3688_v22, 4  ;;  %v3713_v12 = vrot.slane %v3712_v34, 4  ;;  %v4435_v22 = vrot.slane %v7686_v63, 5  ;;  %v3745_v52 = vrot.slane %v3743_v38, 4 }
  0xea   : > { %v3723_v27 = vrot.slane %v3722_v41, 4  ;;  %v3754_v34 = vshrl.u32 %v5537_v19, 16  ;;  %v3757_v16 = vshll.u32 %v5537_v19, 16  ;;  %v7748_v41 = vld [vmem:[%s6313_s29 + $0x40] sm:$0xf] }
  0xeb   : > { %6040 = vmatmul.mubr.msk.bf16.gmra.mxu0 %vm756_vm3, %v6207_v37  ;;  %v7732_v53 = vpop.f32.mrf.mxu0  ;;  %v3694_v63 = vsel %vm6357_vm4, %v3689_v18, %v7682_v26  ;;  %v3718_v26 = vsel %vm6357_vm4, %v3713_v12, %v7691_v58  ;;  %v5611_v18 = vld [vmem:[%s6313_s29 + $0x30] sm:$0xe]  ;;  %v3763_v24 = vshll.u32 %v7748_v41, 16  ;;  %v3767_v33 = vshrl.u32 %v7748_v41, 16 }
  0xec   : > { %6043 = vmatprep.mubr.msk.bf16.mxu0 %vm756_vm3, %v6208_v44  ;;  %v7704_v37 = vpop.f32.mrf.mxu1  ;;  %v4432_v44 = vrot.slane %v7670_v36, 5  ;;  %v3703_v36 = vrot.slane %v3701_v45, 5  ;;  %v3732_v45 = vrot.slane %v3730_v17, 4  ;;  %v3728_v58 = vsel %vm6357_vm4, %v3723_v27, %v3727_v11 }
  0xed   : > { %9029 = vst [vmem:[#allocation4_spill] sm:$0xff] %v7704_v37  ;;  %v7777_v12 = vpop.f32.mrf.mxu0  ;;  %v3759_v19 = vrot.slane %v3757_v16, 5  ;;  %v3791_v11 = vshrl.u32 %v7770_v7, 16 }
  0xee   : > { %6006 = vmatmul.mubr.msk.bf16.gmra.mxu1 %vm756_vm3, %v5434_v48  ;;  %v3739_v48 = vshll.u32 %v7696_v57, 16  ;;  %v7728_v6 = vpop.f32.mrf.mxu1  ;;  %v4434_v4 = vrot.slane %v4432_v44, 4  ;;  %v3704_v17 = vsel %vm6357_vm4, %v3699_v8, %v3703_v36  ;;  %v4439_v36 = vrot.slane %v7696_v57, 5  ;;  %v6212_v8 = vld [vmem:[%s6313_s29 + $0x78] sm:$0xff]  }
  0xef   : > { %6009 = vmatprep.mubr.msk.bf16.mxu1 %vm756_vm3, %v5435_v40  ;;  %v7725_v40 = vsel %vm6643_vm7, %v4427_v49, %v4428_v46  ;;  %9030 = vst [vmem:[#allocation3_spill] sm:$0xff] %v7728_v6  ;;  %v3735_v49 = vrot.slane %v3733_v10, 5  ;;  %v7791_v27 = vcombine.low %v3694_v63, %v3704_v17  ;;  %v7793_v57 = vcombine.low %v3718_v26, %v3728_v58  ;;  %v7807_v17 = vld [vmem:[%s6313_s29 + $0x58] sm:$0xf]  ;;  %v7813_v58 = vld [vmem:[%s6313_s29 + $0x44] sm:$0x1] }
  0xf0   : > { %v7737_v46 = vrot.slane %v3739_v48, 5  ;;  %v7754_v10 = vpop.f32.mrf.mxu1  ;;  %v7761_v48 = vsel %vm6643_vm7, %v5626_v51, %v4432_v44  ;;  %v7765_v38 = vsel %vm6643_vm7, %v4434_v4, %v4435_v22  ;;  %v3756_v51 = vrot.slane %v3754_v34, 4  ;;  %v5543_v34 = vld [vmem:[%s6313_s29 + $0x54] sm:$0xf] }
  0xf1   : > { %9031 = vst [vmem:[#allocation6_spill] sm:$0xff] %v7754_v10  ;;  %v3736_v44 = vor.u32 %v3735_v49, %v3732_v45  ;;  %v3781_v22 = vshll.u32 %v5540_v3, 16  ;;  %v4441_v13 = vrot.slane %v4439_v36, 4  ;;  %v4442_v63 = vrot.slane %v7735_v39, 5  ;;  %v5612_v49 = vld [vmem:[%s6313_s29 + $0x3c] sm:$0xe] }
  0xf2   : > { %v3746_v4 = vor.u32 %v3745_v52, %v7737_v46  ;;  %v7789_v45 = vpop.f32.mrf.mxu1  ;;  %v5627_v52 = vrot.slane %v5611_v18, 9  ;;  %v3760_v18 = vor.u32 %v3759_v19, %v3756_v51  ;;  %v9034_v6 = vcombine.low %v7502_v28, %v7518_v1 }
  0xf3   : > { %6044 = vmatmul.mubr.msk.bf16.gmra.mxu0 %vm756_vm3, %v6209_v21  ;;  %v3787_v21 = vshll.u32 %v7770_v7, 16  ;;  %9032 = vst [vmem:[#allocation5_spill] sm:$0xff] %v7789_v45  ;;  %v3783_v45 = vrot.slane %v3781_v22, 5  ;;  %v3802_v51 = vshrl.u32 %v5543_v34, 16  ;;  %v3805_v19 = vshll.u32 %v5543_v34, 16 }
  0xf4   : > { %6047 = vmatprep.mubr.msk.bf16.mxu0 %vm756_vm3, %v6210_v60  ;;  %v3749_v60 = vshll.u32 %v7735_v39, 16  ;;  %v7810_v26 = vrot.slane %v3746_v4, 4  ;;  %v3793_v39 = vrot.slane %v3791_v11, 4  ;;  %v7848_v22 = vsel %vm6643_vm7, %v4441_v13, %v4442_v63 }
  0xf5   : > { %v7818_v10 = vrot.slane %v3787_v21, 5  ;;  %v9036_v21 = vcombine.low %v7511_v25, %v7530_v14  ;;  %v4446_v25 = vrot.slane %v7748_v41, 5  ;;  %v6214_v14 = vld [vmem:[%s6313_s29 + $0x90] sm:$0xff]   ;;  %v5628_v1 = vrot.slane %v5612_v49, 9  ;;  %v5546_v41 = vld [vmem:[%s6313_s29 + $0x60] sm:$0xf] }
  0xf6   : > { %6010 = vmatmul.mubr.msk.bf16.gmra.mxu1 %vm756_vm3, %v5436_v35  ;;  %v6211_v35 = vld [vmem:[%s6313_s29 + $0x6c] sm:$0xff]   ;;  %v7803_v62 = vrot.slane %v3749_v60, 5  ;;  %v3804_v37 = vrot.slane %v3802_v51, 4 }
  0xf7   : > { %6013 = vmatprep.mubr.msk.bf16.mxu1 %vm756_vm3, %v5437_v23  ;;  %v3778_v23 = vshrl.u32 %v5540_v3, 16  ;;  %v7801_v3 = vrot.slane %v3736_v44, 4  ;;  %v3769_v44 = vrot.slane %v3767_v33, 4  ;;  %v3815_v33 = vshrl.u32 %v7807_v17, 16 }
  0xf8   : > { %v7799_v16 = vpop.f32.mrf.mxu0  ;;  %v3794_v13 = vor.u32 %v3793_v39, %v7818_v10  ;;  %v4453_v39 = vrot.slane %v7770_v7, 5  ;;  %v9040_v7 = vcombine.low %v7522_v43, %v7539_v2  ;;  %v9042_v43 = vcombine.low %v7543_v59, %v7553_v50  ;;  %v6215_v2 = vld [vmem:[%s6313_s29 + $0x9c] sm:$0xff]  }
  0xf9   : > { %9033 = vst [vmem:[#allocation8_spill] sm:$0xff] %v7799_v16  ;;  %v3780_v60 = vrot.slane %v3778_v23, 4  ;;  %v6213_v23 = vld [vmem:[%s6313_s29 + $0x84] sm:$0xff]   ;;  %v7875_v16 = vld [vmem:[%s6313_s29 + $0x5c] sm:$0x1]  ;;  %v4460_v59 = vrot.slane %v7807_v17, 5 }
  0xfa   : > { %v7836_v28 = vpop.f32.mrf.mxu0 }
  0xfb   : > { %6048 = vmatmul.mubr.msk.bf16.gmra.mxu0 %vm756_vm3, %v6211_v35  ;;  %v7815_v35 = vrot.slane %v3763_v24, 5  ;;  %v3811_v24 = vshll.u32 %v7807_v17, 16  ;;  %9037 = vst [vmem:[#allocation12_spill] sm:$0xff] %v7836_v28  ;;  %v3807_v28 = vrot.slane %v3805_v19, 5 }
  0xfc   : > { %6051 = vmatprep.mubr.msk.bf16.mxu0 %vm756_vm3, %v6212_v8  ;;  %v7824_v4 = vpop.f32.mrf.mxu1  ;;  %v7827_v8 = vld [vmem:[%s6313_s29 + $0x50] sm:$0x1]  ;;  %v7868_v49 = vpop.f32.mrf.mxu0 }
  0xfd   : > { %9035 = vst [vmem:[#allocation7_spill] sm:$0xff] %v7824_v4  ;;  %v3770_v34 = vor.u32 %v3769_v44, %v7815_v35  ;;  %v7858_v4 = vrot.slane %v3760_v18, 4  ;;  %v7865_v11 = vrot.slane %v3811_v24, 5  ;;  %v3817_v44 = vrot.slane %v3815_v33, 4  ;;  %9039 = vst [vmem:[#allocation2_spill] sm:$0xff] %v7868_v49 }
  0xfe   : > { %6014 = vmatmul.mubr.msk.bf16.gmra.mxu1 %vm756_vm3, %v9034_v6  ;;  %v7844_v6 = vsel %vm6643_vm7, %v5627_v52, %v4439_v36  ;;  %v3784_v36 = vor.u32 %v3783_v45, %v3780_v60  ;;  %v3797_v52 = vshll.u32 %v7827_v8, 16  ;;  %v7863_v63 = vpop.f32.mrf.mxu1  ;;  %v4448_v18 = vrot.slane %v4446_v25, 4  ;;  %v5613_v24 = vld [vmem:[%s6313_s29 + $0x48] sm:$0xe] }
  0xff   : > { %6017 = vmatprep.mubr.msk.bf16.mxu1 %vm756_vm3, %v9036_v21  ;;  %v3773_v21 = vshll.u32 %v7813_v58, 16  ;;  %9038 = vst [vmem:[#allocation10_spill] sm:$0xff] %v7863_v63  ;;  %v4449_v60 = vrot.slane %v7813_v58, 5  ;;  %v3771_v51 = vrot.slane %v3770_v34, 4  ;;  %v3826_v33 = vshrl.u32 %v5546_v41, 16 }
 0x100   : > { %v7881_v63 = vsel %vm6643_vm7, %v5628_v1, %v4446_v25  ;;  %v3785_v45 = vrot.slane %v3784_v36, 4  ;;  %v3795_v49 = vrot.slane %v3794_v13, 4  ;;  %v3799_v58 = vrot.slane %v3797_v52, 5  ;;  %v7896_v36 = vld [vmem:[%s6313_s29 + $0x64] sm:$0xf]  ;;  %v7903_v13 = vpop.f32.mrf.mxu0 }
 0x101   : > { %v3775_v19 = vrot.slane %v3773_v21, 5  ;;  %v3766_v34 = vsel %vm6357_vm4, %v7858_v4, %v7815_v35  ;;  %v3808_v21 = vor.u32 %v3807_v28, %v3804_v37  ;;  %v3818_v1 = vor.u32 %v3817_v44, %v7865_v11  ;;  %9043 = vst [vmem:[#allocation14_spill] sm:$0xff] %v7903_v13  ;;  %v5614_v28 = vld [vmem:[%s6313_s29 + $0x54] sm:$0xe]  ;;  %v6219_v13 = vld [vmem:[%s6313_s29 + $0xcc] sm:$0xff]  }
 0x102   : > { %v3821_v25 = vshll.u32 %v7875_v16, 16  ;;  %v7907_v52 = vsel %vm6643_vm7, %v4448_v18, %v4449_v60  ;;  %v5629_v35 = vrot.slane %v5613_v24, 9  ;;  %v4455_v37 = vrot.slane %v4453_v39, 4 }
 0x103   : > { %6052 = vmatmul.mubr.msk.bf16.gmra.mxu0 %vm756_vm3, %v6213_v23  ;;  %v3829_v23 = vshll.u32 %v5546_v41, 16  ;;  %v4456_v4 = vrot.slane %v7827_v8, 5  ;;  %v6216_v41 = vld [vmem:[%s6313_s29 + $0xa8] sm:$0xff]   ;;  %v3776_v44 = vsel %vm6357_vm4, %v3771_v51, %v3775_v19  ;;  %v3828_v50 = vrot.slane %v3826_v33, 4 }
 0x104   : > { %6055 = vmatprep.mubr.msk.bf16.mxu0 %vm756_vm3, %v6214_v14  ;;  %v7887_v14 = vpop.f32.mrf.mxu1  ;;  %v3800_v18 = vsel %vm6357_vm4, %v3795_v49, %v3799_v58  ;;  %v3835_v60 = vshll.u32 %v7896_v36, 16  ;;  %v3839_v8 = vshrl.u32 %v7896_v36, 16  ;;  %v3819_v51 = vrot.slane %v3818_v1, 4  ;;  %v7925_v33 = vld [vmem:[%s6313_s29 + $0x68] sm:$0x1] }
 0x105   : > { %9041 = vst [vmem:[#allocation13_spill] sm:$0xff] %v7887_v14  ;;  %v3809_v14 = vrot.slane %v3808_v21, 4  ;;  %v3823_v17 = vrot.slane %v3821_v25, 5  ;;  %v5630_v19 = vrot.slane %v5614_v28, 9  ;;  %v9046_v49 = vsel %vm6357_vm4, %v7810_v26, %v7803_v62  ;;  %v5549_v25 = vld [vmem:[%s6313_s29 + $0x6c] sm:$0xf] }
 0x106   : > { %6018 = vmatmul.mubr.msk.bf16.gmra.mxu1 %vm756_vm3, %v9040_v7  ;;  %v3831_v7 = vrot.slane %v3829_v23, 5  ;;  %v7922_v24 = vpop.f32.mrf.mxu1  ;;  %v7946_v21 = vsel %vm6643_vm7, %v5629_v35, %v4453_v39  ;;  %v7950_v1 = vsel %vm6643_vm7, %v4455_v37, %v4456_v4  ;;  %v7953_v62 = vcombine.low %v3766_v34, %v3776_v44  ;;  %v5615_v4 = vld [vmem:[%s6313_s29 + $0x60] sm:$0xe]  ;;  %v5555_v44 = vld [vmem:[%s6313_s29 + $0x84] sm:$0xf] }
 0x107   : > { %6021 = vmatprep.mubr.msk.bf16.mxu1 %vm756_vm3, %v9042_v43  ;;  %v3790_v43 = vsel %vm6357_vm4, %v3785_v45, %v7818_v10  ;;  %9044 = vst [vmem:[#allocation15_spill] sm:$0xff] %v7922_v24  ;;  %v9047_v45 = vsel %vm6357_vm4, %v7801_v3, %v7737_v46  ;;  %v4462_v46 = vrot.slane %v4460_v59, 4  ;;  %v4463_v3 = vrot.slane %v7875_v16, 5 }
 0x108   : > { %v7940_v23 = vcombine.low %v9047_v45, %v9046_v49  ;;  %9048 = vst [vmem:[#allocation11_spill] sm:$0xff] %v7953_v62  ;;  %v3832_v26 = vor.u32 %v3831_v7, %v3828_v50  ;;  %v7960_v28 = vcombine.low %v3790_v43, %v3800_v18  ;;  %v7962_v39 = vrot.slane %v3835_v60, 5 }
 0x109   : > { %v7928_v10 = vpop.f32.mrf.mxu0  ;;  %v7964_v35 = vrot.slane %v3839_v8, 4  ;;  %v3845_v37 = vshll.u32 %v7925_v33, 16  ;;  %v9050_v34 = vcombine.low %v7561_v54, %v7576_v56  ;;  %v3814_v50 = vsel %vm6357_vm4, %v3809_v14, %v7865_v11  ;;  %v5552_v54 = vld [vmem:[%s6313_s29 + $0x78] sm:$0xf] }
 0x10a   : > { %9045 = vst [vmem:[#allocation9_spill] sm:$0xff] %v7928_v10  ;;  %9049 = vst [vmem:[#allocation16_spill] sm:$0xff] %v7960_v28  ;;  %v3824_v7 = vsel %vm6357_vm4, %v3819_v51, %v3823_v17  ;;  %v7984_v43 = vsel %vm6643_vm7, %v5630_v19, %v4460_v59  ;;  %v9052_v56 = vcombine.low %v7568_v29, %v7589_v42  ;;  %v3850_v60 = vshrl.u32 %v5549_v25, 16  ;;  %v7996_v51 = vld [vmem:[%s6313_s29 + $0x7c] sm:$0xf]  ;;  %v6218_v59 = vld [vmem:[%s6313_s29 + $0xc0] sm:$0xff]  }
 0x10b   : > { %6056 = vmatmul.mubr.msk.bf16.gmra.mxu0 %vm756_vm3, %v6215_v2  ;;  %v7958_v2 = vld [vmem:[%s6313_s29 + $0x70] sm:$0xf]  ;;  %v7991_v18 = vpop.f32.mrf.mxu0  ;;  %v3853_v8 = vshll.u32 %v5549_v25, 16  ;;  %v8001_v17 = vsel %vm6643_vm7, %v4462_v46, %v4463_v3  ;;  %v8003_v29 = vrot.slane %v3832_v26, 4  ;;  %v5631_v42 = vrot.slane %v5615_v4, 9 }
 0x10c   : > { %6059 = vmatprep.mubr.msk.bf16.mxu0 %vm756_vm3, %v6216_v41  ;;  %v6217_v41 = vld [vmem:[%s6313_s29 + $0xb4] sm:$0xff]   ;;  %9053 = vst [vmem:[#allocation18_spill] sm:$0xff] %v7991_v18  ;;  %v3859_v11 = vshll.u32 %v7958_v2, 16  ;;  %v3863_v14 = vshrl.u32 %v7958_v2, 16  ;;  %v4467_v19 = vrot.slane %v7896_v36, 5  ;;  %v8006_v49 = vcombine.low %v3814_v50, %v3824_v7 }
 0x10d   : > { %v3842_v45 = vor.u32 %v7964_v35, %v7962_v39  ;;  %v8010_v25 = vrot.slane %v3845_v37, 5  ;;  %v3874_v46 = vshrl.u32 %v5552_v54, 16  ;;  %v3877_v3 = vshll.u32 %v5552_v54, 16  ;;  %v8022_v4 = vld [vmem:[%s6313_s29 + $0x88] sm:$0xf]  ;;  %v8025_v35 = vpop.f32.mrf.mxu0 }
 0x10e   : > { %6022 = vmatmul.mubr.msk.bf16.gmra.mxu1 %vm756_vm3, %v9050_v34  ;;  %v7972_v16 = vpop.f32.mrf.mxu1  ;;  %9054 = vst [vmem:[#allocation19_spill] sm:$0xff] %v8006_v49  ;;  %v4470_v34 = vrot.slane %v7925_v33, 5  ;;  %v3883_v36 = vshll.u32 %v7996_v51, 16  ;;  %v3887_v26 = vshrl.u32 %v7996_v51, 16  ;;  %9056 = vst [vmem:[#allocation21_spill] sm:$0xff] %v8025_v35  ;;  %v3852_v33 = vrot.slane %v3850_v60, 4 }
 0x10f   : > { %9051 = vst [vmem:[#allocation17_spill] sm:$0xff] %v7972_v16  ;;  %6025 = vmatprep.mubr.msk.bf16.mxu1 %vm756_vm3, %v9052_v56  ;;  %v8014_v56 = vld [vmem:[%s6313_s29 + $0x74] sm:$0x1]  ;;  %v3855_v37 = vrot.slane %v3853_v8, 5  ;;  %v8027_v50 = vrot.slane %v3859_v11, 5  ;;  %v3865_v7 = vrot.slane %v3863_v14, 4  ;;  %v9057_v54 = vcombine.low %v7580_v30, %v7596_v55  ;;  %v8055_v49 = vpop.f32.mrf.mxu0 }
 0x110   : > { %v8017_v58 = vpop.f32.mrf.mxu1  ;;  %v4469_v16 = vrot.slane %v4467_v19, 4  ;;  %v8040_v60 = vld [vmem:[%s6313_s29 + $0x80] sm:$0x1]  ;;  %v8043_v8 = vld [vmem:[%s6313_s29 + $0x6c] sm:$0xe]  ;;  %v3898_v11 = vshrl.u32 %v5555_v44, 16 }
 0x111   : > { %9055 = vst [vmem:[#allocation20_spill] sm:$0xff] %v8017_v58  ;;  %v8036_v58 = vsel %vm6643_vm7, %v5631_v42, %v4467_v19  ;;  %v3901_v14 = vshll.u32 %v5555_v44, 16  ;;  %v3911_v24 = vshrl.u32 %v8022_v4, 16  ;;  %v3876_v19 = vrot.slane %v3874_v46, 4  ;;  %9059 = vst [vmem:[#allocation23_spill] sm:$0xff] %v8055_v49 }
 0x112   : > { %v8051_v42 = vpop.f32.mrf.mxu1  ;;  %v3879_v35 = vrot.slane %v3877_v3, 5  ;;  %v8053_v18 = vrot.slane %v3883_v36, 5  ;;  %v3889_v10 = vrot.slane %v3887_v26, 4  ;;  %v9060_v44 = vcombine.low %v7600_v15, %v7628_v32  ;;  %v8074_v32 = vld [vmem:[%s6313_s29 + $0x8c] sm:$0x1] }
 0x113   : > { %6060 = vmatmul.mubr.msk.bf16.gmra.mxu0 %vm756_vm3, %v6217_v41  ;;  %v3869_v41 = vshll.u32 %v8014_v56, 16  ;;  %9058 = vst [vmem:[#allocation22_spill] sm:$0xff] %v8051_v42  ;;  %v3856_v30 = vor.u32 %v3855_v37, %v3852_v33  ;;  %v3866_v55 = vor.u32 %v3865_v7, %v8027_v50  ;;  %v3893_v46 = vshll.u32 %v8040_v60, 16  ;;  %v5617_v33 = vld [vmem:[%s6313_s29 + $0x78] sm:$0xe] }
 0x114   : > { %6063 = vmatprep.mubr.msk.bf16.mxu0 %vm756_vm3, %v6218_v59  ;;  %v3907_v59 = vshll.u32 %v8022_v4, 16  ;;  %v8065_v3 = vrot.slane %v3842_v45, 4  ;;  %v8069_v36 = vsel %vm6643_vm7, %v4469_v16, %v4470_v34  ;;  %v5632_v26 = vrot.slane %v8043_v8, 9  ;;  %v8079_v42 = vpop.f32.mrf.mxu1  ;;  %v5558_v8 = vld [vmem:[%s6313_s29 + $0x90] sm:$0xf] }
 0x115   : > { %v4481_v15 = vrot.slane %v7996_v51, 5  ;;  %v3900_v37 = vrot.slane %v3898_v11, 4  ;;  %v3903_v7 = vrot.slane %v3901_v14, 5  ;;  %9061 = vst [vmem:[#allocation24_spill] sm:$0xff] %v8079_v42  ;;  %v3871_v45 = vrot.slane %v3869_v41, 5 }
 0x116   : > { %6026 = vmatmul.mubr.msk.bf16.gmra.mxu1 %vm756_vm3, %v9057_v54  ;;  %v4474_v54 = vrot.slane %v7958_v2, 5  ;;  %v8077_v2 = vrot.slane %v3907_v59, 5  ;;  %v4477_v49 = vrot.slane %v8014_v56, 5  ;;  %v3880_v16 = vor.u32 %v3879_v35, %v3876_v19  ;;  %v8088_v59 = vld [vmem:[%s6313_s29 + $0x94] sm:$0xf] }
 0x117   : > { %6029 = vmatprep.mubr.msk.bf16.mxu1 %vm756_vm3, %v9060_v44  ;;  %v3913_v44 = vrot.slane %v3911_v24, 4  ;;  %v3890_v34 = vor.u32 %v3889_v10, %v8053_v18  ;;  %v3857_v51 = vrot.slane %v3856_v30, 4  ;;  %v3867_v11 = vrot.slane %v3866_v55, 4 }
 0x118   : > { %v4476_v62 = vrot.slane %v4474_v54, 4  ;;  %v3895_v14 = vrot.slane %v3893_v46, 5  ;;  %v9062_v24 = vcombine.low %v7721_v61, %v7725_v40  ;;  %v5633_v56 = vrot.slane %v5617_v33, 9 }
 0x119   : > { %v4483_v35 = vrot.slane %v4481_v15, 4  ;;  %v4484_v10 = vrot.slane %v8040_v60, 5  ;;  %v3917_v41 = vshll.u32 %v8074_v32, 16  ;;  %v3914_v30 = vor.u32 %v3913_v44, %v8077_v2 }
 0x11a   : > { %v3922_v55 = vshrl.u32 %v5558_v8, 16  ;;  %v3925_v46 = vshll.u32 %v5558_v8, 16  ;;  %v9064_v61 = vcombine.low %v7640_v9, %v7645_v47  ;;  %v3881_v40 = vrot.slane %v3880_v16, 4 }
 0x11b   : > { %v8084_v28 = vpop.f32.mrf.mxu0  ;;  %6064 = vmatmul.mubr.msk.bf16.gmra.mxu0 %vm756_vm3, %v6219_v13  ;;  %v3904_v13 = vor.u32 %v3903_v7, %v3900_v37  ;;  %v3891_v33 = vrot.slane %v3890_v34, 4  ;;  %v3931_v60 = vshll.u32 %v8088_v59, 16  ;;  %v3848_v37 = vsel %vm6357_vm4, %v8065_v3, %v8010_v25 }
 0x11c   : > { %6103 = vmatprep.mubr.msk.bf16.mxu0 %vm756_vm3, %v9062_v24  ;;  %v3935_v24 = vshrl.u32 %v8088_v59, 16  ;;  %v3862_v9 = vsel %vm6357_vm4, %v3857_v51, %v8027_v50  ;;  %v8120_v47 = vsel %vm6643_vm7, %v5632_v26, %v4474_v54  ;;  %v8124_v7 = vsel %vm6643_vm7, %v4476_v62, %v4477_v49  ;;  %v5618_v54 = vld [vmem:[%s6313_s29 + $0x84] sm:$0xe]  ;;  %v9103_v31 = vld [vmem:[#allocation24_spill] sm:$0xff] }
 0x11d   : > { %v8096_v19 = vpop.f32.mrf.mxu0  ;;  %v8132_v25 = vsel %vm6643_vm7, %v5633_v56, %v4481_v15  ;;  %v8136_v50 = vsel %vm6643_vm7, %v4483_v35, %v4484_v10  ;;  %v3919_v3 = vrot.slane %v3917_v41, 5  ;;  %v3905_v62 = vrot.slane %v3904_v13, 4  ;;  %v8160_v13 = vld [vmem:[%s6313_s29 + $0x98] sm:$0x1] }
 0x11e   : > { %9063 = vst [vmem:[#allocation25_spill] sm:$0xff] %v8096_v19  ;;  %v8099_v42 = vpop.f32.mrf.mxu1  ;;  %6030 = vmatmul.mubr.msk.bf16.gmra.mxu1 %vm756_vm3, %v9064_v61  ;;  %v3915_v49 = vrot.slane %v3914_v30, 4  ;;  %v3924_v16 = vrot.slane %v3922_v55, 4  ;;  %v3927_v34 = vrot.slane %v3925_v46, 5  ;;  %v3886_v15 = vsel %vm6357_vm4, %v3881_v40, %v8053_v18  ;;  %v5561_v30 = vld [vmem:[%s6313_s29 + $0x9c] sm:$0xf] }
 0x11f   : > { %v8107_v19 = vpop.f32.mrf.mxu0  ;;  %6069 = vmatprep.mubr.msk.bf16.mxu1 %vm756_vm3, %v7791_v27  ;;  %v3872_v27 = vsel %vm6357_vm4, %v3867_v11, %v3871_v45  ;;  %v3896_v45 = vsel %vm6357_vm4, %v3891_v33, %v3895_v14  ;;  %v8148_v51 = vrot.slane %v3931_v60, 5  ;;  %v3937_v11 = vrot.slane %v3935_v24, 4  ;;  %v8191_v24 = vld [vmem:[%s6313_s29 + $0xa0] sm:$0xf] }
 0x120   : > { %v8126_v44 = vpop.f32.mrf.mxu1  ;;  %v9065_v35 = vcombine.low %v7761_v48, %v7765_v38  ;;  %v5647_v10 = vcombine.low %v7984_v43, %v8001_v17  ;;  %v5648_v41 = vcombine.low %v8036_v58, %v8069_v36  ;;  %v5634_v18 = vrot.slane %v5618_v54, 9 }
 0x121   : > { %v8139_v26 = vpop.f32.mrf.mxu0  ;;  %v4488_v14 = vrot.slane %v8022_v4, 5  ;;  %v9066_v48 = vcombine.low %v7844_v6, %v7848_v22  ;;  %v9067_v38 = vsel %vm6357_vm4, %v8003_v29, %v7962_v39  ;;  %v8176_v61 = vcombine.low %v3862_v9, %v3872_v27  ;;  %v5619_v29 = vld [vmem:[%s6313_s29 + $0x90] sm:$0xe]  ;;  %v9074_v4 = vld [vmem:[#allocation2_spill] sm:$0xff] }
 0x122   : > { %v8141_v8 = vpop.f32.mrf.mxu1  ;;  %v8174_v46 = vcombine.low %v9067_v38, %v3848_v37  ;;  %v8182_v60 = vcombine.low %v3886_v15, %v3896_v45  ;;  %v3910_v6 = vsel %vm6357_vm4, %v3905_v62, %v8077_v2  ;;  %v3920_v22 = vsel %vm6357_vm4, %v3915_v49, %v3919_v3 }
 0x123   : > { %v5901_v56 = vpop.f32.mrf.mxu0  ;;  %6104 = vmatmul.mubr.msk.bf16.vlgmr.msra.gmra.mxu0 %vm756_vm3, %v9065_v35  ;;  %v3928_v39 = vor.u32 %v3927_v34, %v3924_v16  ;;  %v3938_v9 = vor.u32 %v3937_v11, %v8148_v51  ;;  %v3941_v27 = vshll.u32 %v8160_v13, 16  ;;  %v3946_v54 = vshrl.u32 %v5561_v30, 16 }
 0x124   : > { %v8163_v55 = vpop.f32.mrf.mxu1  ;;  %6107 = vmatprep.mubr.msk.bf16.mxu0 %vm756_vm3, %v9066_v48  ;;  %v3949_v15 = vshll.u32 %v5561_v30, 16  ;;  %v8202_v3 = vsel %vm6643_vm7, %v5634_v18, %v4488_v14  ;;  %v4490_v62 = vrot.slane %v4488_v14, 4  ;;  %v4491_v49 = vrot.slane %v8074_v32, 5 }
 0x125   : > { %v1560_v33 = vpop.f32.mrf.mxu0  ;;  %v5635_v16 = vrot.slane %v5619_v29, 9  ;;  %v4495_v34 = vrot.slane %v8088_v59, 5  ;;  %v3955_v11 = vshll.u32 %v8191_v24, 16  ;;  %v3959_v35 = vshrl.u32 %v8191_v24, 16 }
 0x126   : > { %v5867_v37 = vpop.f32.mrf.mxu1  ;;  %6070 = vmatmul.mubr.msk.bf16.vlgmr.msra.gmra.mxu1 %vm756_vm3, %v7793_v57  ;;  %v8211_v48 = vcombine.low %v3910_v6, %v3920_v22  ;;  %v8213_v18 = vrot.slane %v3928_v39, 4  ;;  %v3939_v32 = vrot.slane %v3938_v9, 4  ;;  %v3943_v38 = vrot.slane %v3941_v27, 5  ;;  %v5564_v22 = vld [vmem:[%s6313_s29 + $0xa8] sm:$0xf] }
 0x127   : > { %v1144_v45 = vadd.f32 %v5867_v37, %v7689_v5  ;;  %v5902_v2 = vpop.f32.mrf.mxu0  ;;  %6073 = vmatprep.mubr.msk.bf16.mxu1 %vm756_vm3, %v7940_v23  ;;  %v3948_v29 = vrot.slane %v3946_v54, 4  ;;  %v3951_v59 = vrot.slane %v3949_v15, 5  ;;  %v4498_v6 = vrot.slane %v8160_v13, 5  ;;  %v8239_v27 = vld [vmem:[%s6313_s29 + $0xac] sm:$0xf] }
 0x128   : > { %v1135_v57 = vpop.f32.mrf.mxu1  ;;  %v3961_v9 = vrot.slane %v3959_v35, 4  ;;  %v9071_v35 = vld [vmem:[#allocation8_spill] sm:$0xff] }
 0x129   : > { %v8208_v5 = vadd.f32 %v5901_v56, %v1144_v45  ;;  %v1136_v23 = vadd.f32 %v1135_v57, %v7713_v20  ;;  %v1563_v30 = vpop.f32.mrf.mxu0  ;;  %v9068_v45 = vcombine.low %v7881_v63, %v7907_v52  ;;  %v8224_v20 = vsel %vm6643_vm7, %v4490_v62, %v4491_v49  ;;  %v5620_v62 = vld [vmem:[%s6313_s29 + $0x9c] sm:$0xe] }
 0x12a   : > { %v5868_v14 = vpop.f32.mrf.mxu1  ;;  %v4497_v63 = vrot.slane %v4495_v34, 4  ;;  %v8236_v52 = vrot.slane %v3955_v11, 5  ;;  %v4502_v49 = vrot.slane %v8191_v24, 5  ;;  %v3979_v24 = vshll.u32 %v8239_v27, 16 }
 0x12b   : > { %v8215_v37 = vadd.f32 %v1560_v33, %v1136_v23  ;;  %v1147_v40 = vadd.f32 %v5868_v14, %v7732_v53  ;;  %v5905_v56 = vpop.f32.mrf.mxu0  ;;  %6108 = vmatmul.mubr.msk.bf16.gmra.mxu0 %vm756_vm3, %v9068_v45  ;;  %v9069_v33 = vcombine.low %v7946_v21, %v7950_v1  ;;  %v8234_v53 = vsel %vm6643_vm7, %v5635_v16, %v4495_v34  ;;  %v5563_v1 = vld [vmem:[%s6313_s29 + $0xa4] sm:$0x1]  ;;  %v9070_v16 = vld [vmem:[#allocation11_spill] sm:$0xff] }
 0x12c   : > { %v1138_v39 = vpop.f32.mrf.mxu1  ;;  %v3934_v21 = vsel %vm6357_vm4, %v8213_v18, %v8148_v51  ;;  %v3970_v34 = vshrl.u32 %v5564_v22, 16  ;;  %v9072_v51 = vld [vmem:[#allocation16_spill] sm:$0xff]  ;;  %v3983_v18 = vshrl.u32 %v8239_v27, 16 }
 0x12d   : > { %6111 = vmatprep.mubr.msk.bf16.mxu0 %vm756_vm3, %v9069_v33  ;;  %v8241_v54 = vadd.f32 %v5902_v2, %v1147_v40  ;;  %v1139_v13 = vadd.f32 %v1138_v39, %v7777_v12  ;;  %v1576_v15 = vpop.f32.mrf.mxu0  ;;  %v3944_v40 = vsel %vm6357_vm4, %v3939_v32, %v3943_v38  ;;  %v3952_v2 = vor.u32 %v3951_v59, %v3948_v29  ;;  %v9073_v59 = vld [vmem:[#allocation12_spill] sm:$0xff] }
 0x12e   : > { %v5871_v57 = vpop.f32.mrf.mxu1  ;;  %6074 = vmatmul.mubr.msk.bf16.gmra.mxu1 %vm756_vm3, %v9070_v16  ;;  %v3973_v12 = vshll.u32 %v5564_v22, 16  ;;  %v8264_v39 = vsel %vm6643_vm7, %v4497_v63, %v4498_v6  ;;  %v3962_v32 = vor.u32 %v3961_v9, %v8236_v52  ;;  %v3965_v38 = vshll.u32 %v5563_v1, 16 }
 0x12f   : > { %v8255_v11 = vadd.f32 %v1563_v30, %v1139_v13  ;;  %v1160_v23 = vadd.f32 %v5871_v57, %v9071_v35  ;;  %v5906_v14 = vpop.f32.mrf.mxu0  ;;  %6077 = vmatprep.mubr.msk.bf16.mxu1 %vm756_vm3, %v9072_v51  ;;  %v5636_v30 = vrot.slane %v5620_v62, 9  ;;  %v4504_v13 = vrot.slane %v4502_v49, 4 }
 0x130   : > { %v1151_v45 = vpop.f32.mrf.mxu1  ;;  %v4505_v57 = vrot.slane %v5563_v1, 5  ;;  %v8272_v51 = vrot.slane %v3952_v2, 4  ;;  %v3972_v6 = vrot.slane %v3970_v34, 4  ;;  %v3975_v63 = vrot.slane %v3973_v12, 5  ;;  %v8282_v1 = vld [vmem:[%s6313_s29 + $0xb0] sm:$0x1] }
 0x131   : > { %v8267_v29 = vadd.f32 %v5905_v56, %v1160_v23  ;;  %v1152_v22 = vadd.f32 %v1151_v45, %v9073_v59  ;;  %v1579_v33 = vpop.f32.mrf.mxu0  ;;  %v8284_v23 = vrot.slane %v3979_v24, 5  ;;  %v3985_v2 = vrot.slane %v3983_v18, 4  ;;  %v9075_v12 = vld [vmem:[#allocation14_spill] sm:$0xff] }
 0x132   : > { %v5872_v16 = vpop.f32.mrf.mxu1  ;;  %v8294_v43 = vrot.slane %v3962_v32, 4  ;;  %v8296_v17 = vrot.slane %v3965_v38, 5  ;;  %v8304_v58 = vsel %vm6643_vm7, %v5636_v30, %v4502_v49  ;;  %v8308_v36 = vsel %vm6643_vm7, %v4504_v13, %v4505_v57  ;;  %v8320_v30 = vld [vmem:[%s6313_s29 + $0xb8] sm:$0xf] }
 0x133   : > { %v8274_v9 = vadd.f32 %v1576_v15, %v1152_v22  ;;  %v1163_v62 = vadd.f32 %v5872_v16, %v9074_v4  ;;  %v5909_v56 = vpop.f32.mrf.mxu0  ;;  %6112 = vmatmul.mubr.msk.bf16.gmra.mxu0 %vm756_vm3, %v5647_v10  ;;  %v8290_v15 = vcombine.low %v3934_v21, %v3944_v40  ;;  %v5621_v10 = vld [vmem:[%s6313_s29 + $0xa8] sm:$0xe]  ;;  %v3976_v32 = vor.u32 %v3975_v63, %v3972_v6  ;;  %v9077_v22 = vld [vmem:[#allocation9_spill] sm:$0xff] }
 0x134   : > { %v1154_v45 = vpop.f32.mrf.mxu1  ;;  %6115 = vmatprep.mubr.msk.bf16.mxu0 %vm756_vm3, %v5648_v41  ;;  %v5567_v41 = vld [vmem:[%s6313_s29 + $0xb4] sm:$0xf]  ;;  %v9076_v40 = vld [vmem:[#allocation19_spill] sm:$0xff]  ;;  %v3989_v38 = vshll.u32 %v8282_v1, 16  ;;  %v4509_v49 = vrot.slane %v8239_v27, 5  ;;  %v3986_v16 = vor.u32 %v3985_v2, %v8284_v23  ;;  %v3968_v27 = vsel %vm6357_vm4, %v8294_v43, %v8296_v17 }
 0x135   : > { %v8299_v34 = vadd.f32 %v5906_v14, %v1163_v62  ;;  %v1155_v24 = vadd.f32 %v1154_v45, %v9075_v12  ;;  %v1592_v18 = vpop.f32.mrf.mxu0  ;;  %v5637_v62 = vrot.slane %v5621_v10, 9  ;;  %v3994_v6 = vshrl.u32 %v5567_v41, 16 }
 0x136   : > { %v5875_v21 = vpop.f32.mrf.mxu1  ;;  %6078 = vmatmul.mubr.msk.bf16.gmra.mxu1 %vm756_vm3, %v9076_v40  ;;  %v3997_v63 = vshll.u32 %v5567_v41, 16  ;;  %v4003_v2 = vshll.u32 %v8320_v30, 16  ;;  %v4007_v10 = vshrl.u32 %v8320_v30, 16  ;;  %v5570_v40 = vld [vmem:[%s6313_s29 + $0xc0] sm:$0xf]  ;;  %v3977_v4 = vrot.slane %v3976_v32, 4 }
 0x137   : > { %v8322_v59 = vadd.f32 %v1579_v33, %v1155_v24  ;;  %v1176_v13 = vadd.f32 %v5875_v21, %v9077_v22  ;;  %v5910_v57 = vpop.f32.mrf.mxu0  ;;  %6081 = vmatprep.mubr.msk.bf16.mxu1 %vm756_vm3, %v8174_v46  ;;  %v9079_v24 = vld [vmem:[#allocation18_spill] sm:$0xff]  ;;  %v3991_v43 = vrot.slane %v3989_v38, 5  ;;  %v4511_v17 = vrot.slane %v4509_v49, 4 }
 0x138   : > { %v1167_v45 = vpop.f32.mrf.mxu1  ;;  %v4512_v33 = vrot.slane %v8282_v1, 5  ;;  %v8350_v14 = vsel %vm6643_vm7, %v5637_v62, %v4509_v49  ;;  %v8353_v32 = vld [vmem:[%s6313_s29 + $0xc4] sm:$0xf]  ;;  %v9083_v1 = vcombine.low %v8132_v25, %v8136_v50  ;;  %v8365_v62 = vrot.slane %v4003_v2, 5 }
 0x139   : > { %v8334_v12 = vadd.f32 %v5909_v56, %v1176_v13  ;;  %v1168_v21 = vadd.f32 %v1167_v45, %v9079_v24  ;;  %v1595_v46 = vpop.f32.mrf.mxu0  ;;  %v9081_v56 = vld [vmem:[#allocation21_spill] sm:$0xff]  ;;  %v9082_v45 = vcombine.low %v8120_v47, %v8124_v7  ;;  %v3987_v24 = vrot.slane %v3986_v16, 4  ;;  %v9084_v16 = vld [vmem:[#allocation23_spill] sm:$0xff] }
 0x13a   : > { %v5876_v22 = vpop.f32.mrf.mxu1  ;;  %v4018_v47 = vshrl.u32 %v5570_v40, 16  ;;  %v4021_v7 = vshll.u32 %v5570_v40, 16  ;;  %v3982_v25 = vsel %vm6357_vm4, %v3977_v4, %v8284_v23  ;;  %v8374_v50 = vsel %vm6643_vm7, %v4511_v17, %v4512_v33  ;;  %v5622_v40 = vld [vmem:[%s6313_s29 + $0xb4] sm:$0xe] }
 0x13b   : > { %9078 = vst [vmem:[#allocation11_spill] sm:$0xff] %v8334_v12  ;;  %v8341_v35 = vadd.f32 %v1592_v18, %v1168_v21  ;;  %v1179_v41 = vadd.f32 %v5876_v22, %v9081_v56  ;;  %v5913_v13 = vpop.f32.mrf.mxu0  ;;  %6116 = vmatmul.mubr.msk.bf16.gmra.mxu0 %vm756_vm3, %v9082_v45  ;;  %v8360_v18 = vld [vmem:[%s6313_s29 + $0xbc] sm:$0x1]  ;;  %v3996_v21 = vrot.slane %v3994_v6, 4  ;;  %v3999_v22 = vrot.slane %v3997_v63, 5 }
 0x13c   : > { %v1170_v38 = vpop.f32.mrf.mxu1  ;;  %6119 = vmatprep.mubr.msk.bf16.mxu0 %vm756_vm3, %v9083_v1  ;;  %v4031_v6 = vshrl.u32 %v8353_v32, 16  ;;  %v4013_v23 = vshll.u32 %v8360_v18, 16  ;;  %v4516_v17 = vrot.slane %v8320_v30, 5  ;;  %v9085_v1 = vld [vmem:[#allocation25_spill] sm:$0xff] }
 0x13d   : > { %9080 = vst [vmem:[#allocation8_spill] sm:$0xff] %v8341_v35  ;;  %v8362_v56 = vadd.f32 %v5910_v57, %v1179_v41  ;;  %v1171_v45 = vadd.f32 %v1170_v38, %v9084_v16  ;;  %v1608_v49 = vpop.f32.mrf.mxu0  ;;  %v4009_v35 = vrot.slane %v4007_v10, 4  ;;  %v4027_v57 = vshll.u32 %v8353_v32, 16 }
 0x13e   : > { %v5879_v12 = vpop.f32.mrf.mxu1  ;;  %6082 = vmatmul.mubr.msk.bf16.gmra.mxu1 %vm756_vm3, %v8176_v61  ;;  %v3992_v61 = vsel %vm6357_vm4, %v3987_v24, %v3991_v43  ;;  %v4000_v33 = vor.u32 %v3999_v22, %v3996_v21  ;;  %v4020_v41 = vrot.slane %v4018_v47, 4  ;;  %v4023_v38 = vrot.slane %v4021_v7, 5 }
 0x13f   : > { %v8378_v63 = vadd.f32 %v1595_v46, %v1171_v45  ;;  %v1192_v2 = vadd.f32 %v5879_v12, %v8084_v28  ;;  %v5914_v10 = vpop.f32.mrf.mxu0  ;;  %6085 = vmatprep.mubr.msk.bf16.mxu1 %vm756_vm3, %v8182_v60  ;;  %v9086_v60 = vsel %vm6357_vm4, %v8272_v51, %v8236_v52  ;;  %v4010_v24 = vor.u32 %v4009_v35, %v8365_v62 }
 0x140   : > { %v1183_v4 = vpop.f32.mrf.mxu1  ;;  %v8396_v43 = vcombine.low %v9086_v60, %v3968_v27  ;;  %v8399_v30 = vcombine.low %v3982_v25, %v3992_v61  ;;  %v8403_v22 = vrot.slane %v4027_v57, 5  ;;  %v4033_v47 = vrot.slane %v4031_v6, 4  ;;  %v5572_v27 = vld [vmem:[%s6313_s29 + $0xc8] sm:$0x1] }
 0x141   : > { %v8388_v46 = vadd.f32 %v5913_v13, %v1192_v2  ;;  %v1184_v28 = vadd.f32 %v1183_v4, %v9085_v1  ;;  %v1611_v12 = vpop.f32.mrf.mxu0  ;;  %v5654_v13 = vcombine.low %v8350_v14, %v8374_v50  ;;  %v9087_v52 = vcombine.low %v8202_v3, %v8224_v20  ;;  %v5573_v14 = vld [vmem:[%s6313_s29 + $0xcc] sm:$0xf]  ;;  %v8424_v20 = vld [vmem:[%s6313_s29 + $0xd0] sm:$0xf]  ;;  %v5623_v4 = vld [vmem:[%s6313_s29 + $0xc0] sm:$0xe] }
 0x142   : > { %v5880_v21 = vpop.f32.mrf.mxu1  ;;  %v8412_v35 = vrot.slane %v4013_v23, 5  ;;  %v5638_v51 = vrot.slane %v5622_v40, 9  ;;  %v9088_v50 = vcombine.low %v8234_v53, %v8264_v39  ;;  %v4519_v57 = vrot.slane %v8360_v18, 5 }
 0x143   : > { %v8405_v7 = vadd.f32 %v1608_v49, %v1184_v28  ;;  %v1195_v16 = vadd.f32 %v5880_v21, %v8107_v19  ;;  %v5917_v45 = vpop.f32.mrf.mxu0  ;;  %6120 = vmatmul.mubr.msk.bf16.gmra.mxu0 %vm756_vm3, %v9087_v52  ;;  %v8420_v49 = vrot.slane %v4000_v33, 4  ;;  %v4518_v19 = vrot.slane %v4516_v17, 4 }
 0x144   : > { %v1186_v25 = vpop.f32.mrf.mxu1  ;;  %6123 = vmatprep.mubr.msk.bf16.mxu0 %vm756_vm3, %v9088_v50  ;;  %v4024_v3 = vor.u32 %v4023_v38, %v4020_v41  ;;  %v8429_v23 = vrot.slane %v4010_v24, 4  ;;  %v4523_v53 = vrot.slane %v8353_v32, 5  ;;  %v4034_v33 = vor.u32 %v4033_v47, %v8403_v22 }
 0x145   : > { %v8426_v6 = vadd.f32 %v5914_v10, %v1195_v16  ;;  %v1187_v2 = vadd.f32 %v1186_v25, %v8139_v26  ;;  %v1624_v61 = vpop.f32.mrf.mxu0  ;;  %v4037_v18 = vshll.u32 %v5572_v27, 16  ;;  %v4042_v40 = vshrl.u32 %v5573_v14, 16  ;;  %v9091_v10 = vld [vmem:[#allocation4_spill] sm:$0xff]  ;;  %v9092_v16 = vld [vmem:[#allocation3_spill] sm:$0xff] }
 0x146   : > { %v5883_v39 = vpop.f32.mrf.mxu1  ;;  %6086 = vmatmul.mubr.msk.bf16.gmra.mxu1 %vm756_vm3, %v8211_v48  ;;  %v4045_v41 = vshll.u32 %v5573_v14, 16  ;;  %v4051_v28 = vshll.u32 %v8424_v20, 16  ;;  %v4055_v32 = vshrl.u32 %v8424_v20, 16  ;;  %v4517_v48 = vsel %vm6643_vm7, %v5638_v51, %v4516_v17  ;;  %v9093_v17 = vld [vmem:[#allocation6_spill] sm:$0xff] }
 0x147   : > { %9089 = vst [vmem:[#allocation16_spill] sm:$0xff] %v8426_v6  ;;  %v8436_v38 = vadd.f32 %v1611_v12, %v1187_v2  ;;  %v1208_v1 = vadd.f32 %v5883_v39, %v9091_v10  ;;  %v5918_v26 = vpop.f32.mrf.mxu0  ;;  %6089 = vmatprep.mubr.msk.bf16.mxu1 %vm756_vm3, %v8290_v15  ;;  %v4520_v24 = vsel %vm6643_vm7, %v4518_v19, %v4519_v57  ;;  %v4025_v21 = vrot.slane %v4024_v3, 4 }
 0x148   : > { %v1199_v60 = vpop.f32.mrf.mxu1  ;;  %v5639_v12 = vrot.slane %v5623_v4, 9  ;;  %v4525_v25 = vrot.slane %v4523_v53, 4  ;;  %v4526_v15 = vrot.slane %v5572_v27, 5  ;;  %v4035_v2 = vrot.slane %v4034_v33, 4  ;;  %v5575_v33 = vld [vmem:[%s6313_s29 + $0xd4] sm:$0x1] }
 0x149   : > { %9090 = vst [vmem:[#allocation12_spill] sm:$0xff] %v8436_v38  ;;  %v8447_v47 = vadd.f32 %v5917_v45, %v1208_v1  ;;  %v1200_v52 = vadd.f32 %v1199_v60, %v9092_v16  ;;  %v1627_v14 = vpop.f32.mrf.mxu0  ;;  %v4039_v39 = vrot.slane %v4037_v18, 5  ;;  %v4044_v10 = vrot.slane %v4042_v40, 4  ;;  %v9095_v18 = vld [vmem:[#allocation5_spill] sm:$0xff] }
 0x14a   : > { %v5884_v50 = vpop.f32.mrf.mxu1  ;;  %v4047_v38 = vrot.slane %v4045_v41, 5  ;;  %v9094_v45 = vcombine.low %v8304_v58, %v8308_v36  ;;  %v8457_v57 = vrot.slane %v4051_v28, 5  ;;  %v4057_v27 = vrot.slane %v4055_v32, 4 }
 0x14b   : > { %v8450_v6 = vadd.f32 %v1624_v61, %v1200_v52  ;;  %v1211_v51 = vadd.f32 %v5884_v50, %v9093_v17  ;;  %v5921_v19 = vpop.f32.mrf.mxu0  ;;  %v4006_v61 = vsel %vm6357_vm4, %v8420_v49, %v8365_v62  ;;  %v4016_v4 = vsel %vm6357_vm4, %v8429_v23, %v8412_v35  ;;  %v5624_v62 = vld [vmem:[%s6313_s29 + $0xcc] sm:$0xe] }
 0x14c   : > { %6124 = vmatmul.mubr.msk.bf16.gmra.mxu0 %vm756_vm3, %v9094_v45  ;;  %v1202_v3 = vpop.f32.mrf.mxu1  ;;  %v4530_v58 = vrot.slane %v8424_v20, 5  ;;  %v4527_v1 = vsel %vm6643_vm7, %v4525_v25, %v4526_v15  ;;  %v5655_v35 = vcombine.low %v4517_v48, %v4520_v24  ;;  %v4030_v20 = vsel %vm6357_vm4, %v4025_v21, %v8403_v22  ;;  %v9097_v25 = vld [vmem:[#allocation10_spill] sm:$0xff] }
 0x14d   : > { %6127 = vmatprep.mubr.msk.bf16.mxu0 %vm756_vm3, %v5654_v13  ;;  %v8470_v36 = vadd.f32 %v5918_v26, %v1211_v51  ;;  %v1203_v40 = vadd.f32 %v1202_v3, %v9095_v18  ;;  %v1640_v41 = vpop.f32.mrf.mxu0  ;;  %v4524_v13 = vsel %vm6643_vm7, %v5639_v12, %v4523_v53  ;;  %v4040_v23 = vsel %vm6357_vm4, %v4035_v2, %v4039_v39  ;;  %v9096_v53 = vld [vmem:[#allocation7_spill] sm:$0xff] }
 0x14e   : > { %v5887_v49 = vpop.f32.mrf.mxu1  ;;  %6090 = vmatmul.mubr.msk.bf16.gmra.mxu1 %vm756_vm3, %v8396_v43  ;;  %v4048_v26 = vor.u32 %v4047_v38, %v4044_v10  ;;  %v4058_v12 = vor.u32 %v4057_v27, %v8457_v57  ;;  %v4061_v43 = vshll.u32 %v5575_v33, 16  ;;  %v5656_v24 = vcombine.low %v4524_v13, %v4527_v1 }
 0x14f   : > { %v8485_v28 = vadd.f32 %v1627_v14, %v1203_v40  ;;  %v1224_v32 = vadd.f32 %v5887_v49, %v9096_v53  ;;  %v5922_v60 = vpop.f32.mrf.mxu0  ;;  %6093 = vmatprep.mubr.msk.bf16.mxu1 %vm756_vm3, %v8399_v30  ;;  %v5640_v16 = vrot.slane %v5624_v62, 9  ;;  %v4532_v52 = vrot.slane %v4530_v58, 4  ;;  %v9098_v30 = vld [vmem:[#allocation13_spill] sm:$0xff] }
 0x150   : > { %v1215_v48 = vpop.f32.mrf.mxu1  ;;  %v4533_v22 = vrot.slane %v5575_v33, 5  ;;  %v5590_v50 = vcombine.low %v4006_v61, %v4016_v4  ;;  %v5591_v2 = vcombine.low %v4030_v20, %v4040_v23  ;;  %v4049_v39 = vrot.slane %v4048_v26, 4  ;;  %v9099_v33 = vld [vmem:[#allocation15_spill] sm:$0xff]  ;;  %v9100_v62 = vld [vmem:[#allocation17_spill] sm:$0xff]  ;;  %v9101_v26 = vld [vmem:[#allocation20_spill] sm:$0xff] }
 0x151   : > { %v8491_v21 = vadd.f32 %v5921_v19, %v1224_v32  ;;  %v1216_v38 = vadd.f32 %v1215_v48, %v9097_v25  ;;  %v1643_v14 = vpop.f32.mrf.mxu0  ;;  %v4059_v45 = vrot.slane %v4058_v12, 4  ;;  %v4063_v27 = vrot.slane %v4061_v43, 5  ;;  %v9102_v43 = vld [vmem:[#allocation22_spill] sm:$0xff] }
 0x152   : > { %v5888_v15 = vpop.f32.mrf.mxu1  ;;  %v4531_v19 = vsel %vm6643_vm7, %v5640_v16, %v4530_v58  ;;  %v4534_v61 = vsel %vm6643_vm7, %v4532_v52, %v4533_v22  ;;  %v4054_v13 = vsel %vm6357_vm4, %v4049_v39, %v8457_v57 }
 0x153   : > { %v8494_v10 = vadd.f32 %v1640_v41, %v1216_v38  ;;  %v1227_v17 = vadd.f32 %v5888_v15, %v9098_v30  ;;  %v5925_v51 = vpop.f32.mrf.mxu0  ;;  %v4064_v0 = vsel %vm6357_vm4, %v4059_v45, %v4063_v27 }
 0x154   : > { %6128 = vmatmul.mubr.msk.bf16.gmra.mxu0 %vm756_vm3, %v5655_v35  ;;  %v1218_v3 = vpop.f32.mrf.mxu1  ;;  %v5657_v35 = vcombine.low %v4531_v19, %v4534_v61  ;;  %v5592_v12 = vcombine.low %v4054_v13, %v4064_v0 }
 0x155   : > { %6131 = vmatprep.mubr.msk.bf16.mxu0 %vm756_vm3, %v5656_v24  ;;  %v8503_v4 = vadd.f32 %v5922_v60, %v1227_v17  ;;  %v1219_v18 = vadd.f32 %v1218_v3, %v9099_v33  ;;  %v1656_v40 = vpop.f32.mrf.mxu0 }
 0x156   : > { %v5891_v41 = vpop.f32.mrf.mxu1  ;;  %6094 = vmatmul.mubr.msk.bf16.gmra.mxu1 %vm756_vm3, %v5590_v50 }
 0x157   : > { %v8510_v1 = vadd.f32 %v1643_v14, %v1219_v18  ;;  %v1240_v49 = vadd.f32 %v5891_v41, %v9100_v62  ;;  %v5926_v58 = vpop.f32.mrf.mxu0  ;;  %6097 = vmatprep.mubr.msk.bf16.mxu1 %vm756_vm3, %v5591_v2 }
 0x158   : > { %v1231_v20 = vpop.f32.mrf.mxu1 }
 0x159   : > { %v8516_v23 = vadd.f32 %v5925_v51, %v1240_v49  ;;  %v1232_v53 = vadd.f32 %v1231_v20, %v9101_v26  ;;  %v1659_v32 = vpop.f32.mrf.mxu0 }
 0x15a   : > { %v5892_v60 = vpop.f32.mrf.mxu1 }
 0x15b   : > { %v8519_v57 = vadd.f32 %v1656_v40, %v1232_v53  ;;  %v1243_v48 = vadd.f32 %v5892_v60, %v9102_v43  ;;  %v5929_v24 = vpop.f32.mrf.mxu0 }
 0x15c   : > { %6132 = vmatmul.mubr.msk.bf16.gmra.mxu0 %vm756_vm3, %v5657_v35  ;;  %v1234_v16 = vpop.f32.mrf.mxu1 }
 0x15d   : > { %v8523_v52 = vadd.f32 %v5926_v58, %v1243_v48  ;;  %v1235_v22 = vadd.f32 %v1234_v16, %v9103_v31  ;;  %v1672_v25 = vpop.f32.mrf.mxu0 }
 0x15e   : > { %v5895_v38 = vpop.f32.mrf.mxu1  ;;  %6098 = vmatmul.mubr.msk.bf16.gmra.mxu1 %vm756_vm3, %v5592_v12 }
 0x15f   : > { %v8527_v14 = vadd.f32 %v1659_v32, %v1235_v22  ;;  %v1256_v15 = vadd.f32 %v5895_v38, %v8099_v42  ;;  %v5930_v50 = vpop.f32.mrf.mxu0 }
 0x160   : > { %v1247_v2 = vpop.f32.mrf.mxu1 }
 0x161   : > { %v8530_v39 = vadd.f32 %v5929_v24, %v1256_v15  ;;  %v1248_v30 = vadd.f32 %v1247_v2, %v8126_v44  ;;  %v1675_v17 = vpop.f32.mrf.mxu0 }
 0x162   : > { %v5896_v51 = vpop.f32.mrf.mxu1 }
 0x163   : > { %v8533_v45 = vadd.f32 %v1672_v25, %v1248_v30  ;;  %v1259_v27 = vadd.f32 %v5896_v51, %v8141_v8  ;;  %v5969_v3 = vpop.f32.mrf.mxu0  ;;  %v9104_v30 = vld [vmem:[#allocation11_spill] sm:$0xff] }
 0x164   : > { %v1250_v19 = vpop.f32.mrf.mxu1 }
 0x165   : > { %v8536_v61 = vadd.f32 %v5930_v50, %v1259_v27  ;;  %v1251_v33 = vadd.f32 %v1250_v19, %v8163_v55  ;;  %v2645_v18 = vpop.f32.mrf.mxu0 }
 0x166   : > { %v5935_v42 = vpop.f32.mrf.mxu1 }
 0x167   : > { %v8539_v40 = vadd.f32 %v1675_v17, %v1251_v33  ;;  %v2048_v41 = vadd.f32 %v5935_v42, %v8208_v5  ;;  %v5970_v13 = vpop.f32.mrf.mxu0 }
 0x168   : > { %v1919_v44 = vpop.f32.mrf.mxu1 }
 0x169   : > { %v8542_v62 = vadd.f32 %v5969_v3, %v2048_v41  ;;  %v2046_v49 = vadd.f32 %v1919_v44, %v8215_v37  ;;  %v2648_v58 = vpop.f32.mrf.mxu0  ;;  %v9105_v3 = vld [vmem:[#allocation8_spill] sm:$0xff] }
 0x16a   : > { %v5936_v8 = vpop.f32.mrf.mxu1 }
 0x16b   : > { %v8545_v0 = vadd.f32 %v2645_v18, %v2046_v49  ;;  %v2049_v35 = vadd.f32 %v5936_v8, %v8241_v54  ;;  %v5973_v20 = vpop.f32.mrf.mxu0 }
 0x16c   : > { %v1922_v55 = vpop.f32.mrf.mxu1 }
 0x16d   : > { %v8548_v26 = vadd.f32 %v5970_v13, %v2049_v35  ;;  %v2047_v53 = vadd.f32 %v1922_v55, %v8255_v11  ;;  %v2661_v32 = vpop.f32.mrf.mxu0 }
 0x16e   : > { %v5939_v5 = vpop.f32.mrf.mxu1 }
 0x16f   : > { %v8551_v60 = vadd.f32 %v2648_v58, %v2047_v53  ;;  %v2052_v12 = vadd.f32 %v5939_v5, %v8267_v29  ;;  %v5974_v43 = vpop.f32.mrf.mxu0 }
 0x170   : > { %v1935_v37 = vpop.f32.mrf.mxu1 }
 0x171   : > { %v8554_v48 = vadd.f32 %v5973_v20, %v2052_v12  ;;  %v2050_v24 = vadd.f32 %v1935_v37, %v8274_v9  ;;  %v2664_v16 = vpop.f32.mrf.mxu0 }
 0x172   : > { %v5940_v54 = vpop.f32.mrf.mxu1 }
 0x173   : > { %v8557_v31 = vadd.f32 %v2661_v32, %v2050_v24  ;;  %v2053_v22 = vadd.f32 %v5940_v54, %v8299_v34  ;;  %v5977_v25 = vpop.f32.mrf.mxu0  ;;  %v9107_v54 = vld [vmem:[#allocation12_spill] sm:$0xff] }
 0x174   : > { %v1938_v11 = vpop.f32.mrf.mxu1 }
 0x175   : > { %v8560_v38 = vadd.f32 %v5974_v43, %v2053_v22  ;;  %v2051_v15 = vadd.f32 %v1938_v11, %v8322_v59  ;;  %v2677_v50 = vpop.f32.mrf.mxu0  ;;  %v9106_v43 = vld [vmem:[#allocation16_spill] sm:$0xff] }
 0x176   : > { %v5943_v29 = vpop.f32.mrf.mxu1 }
 0x177   : > { %v8563_v2 = vadd.f32 %v2664_v16, %v2051_v15  ;;  %v2056_v17 = vadd.f32 %v5943_v29, %v9104_v30  ;;  %v5978_v51 = vpop.f32.mrf.mxu0 }
 0x178   : > { %v1951_v9 = vpop.f32.mrf.mxu1 }
 0x179   : > { %v8566_v27 = vadd.f32 %v5977_v25, %v2056_v17  ;;  %v2054_v19 = vadd.f32 %v1951_v9, %v9105_v3  ;;  %v2680_v33 = vpop.f32.mrf.mxu0 }
 0x17a   : > { %v5944_v34 = vpop.f32.mrf.mxu1 }
 0x17b   : > { %v8569_v18 = vadd.f32 %v2677_v50, %v2054_v19  ;;  %v2057_v42 = vadd.f32 %v5944_v34, %v8362_v56  ;;  %v5981_v41 = vpop.f32.mrf.mxu0 }
 0x17c   : > { %v1954_v59 = vpop.f32.mrf.mxu1 }
 0x17d   : > { %v8572_v13 = vadd.f32 %v5978_v51, %v2057_v42  ;;  %v2055_v44 = vadd.f32 %v1954_v59, %v8378_v63  ;;  %v2693_v49 = vpop.f32.mrf.mxu0 }
 0x17e   : > { %v5947_v58 = vpop.f32.mrf.mxu1 }
 0x17f   : > { %v8575_v8 = vadd.f32 %v2680_v33, %v2055_v44  ;;  %v2060_v35 = vadd.f32 %v5947_v58, %v8388_v46  ;;  %v5982_v20 = vpop.f32.mrf.mxu0 }
 0x180   : > { %v1967_v55 = vpop.f32.mrf.mxu1 }
 0x181   : > { %v8578_v53 = vadd.f32 %v5981_v41, %v2060_v35  ;;  %v2058_v32 = vadd.f32 %v1967_v55, %v8405_v7  ;;  %v2696_v5 = vpop.f32.mrf.mxu0 }
 0x182   : > { %v5948_v56 = vpop.f32.mrf.mxu1 }
 0x183   : > { %v8581_v12 = vadd.f32 %v2693_v49, %v2058_v32  ;;  %v2061_v37 = vadd.f32 %v5948_v56, %v9106_v43  ;;  %v5985_v24 = vpop.f32.mrf.mxu0 }
 0x184   : > { %v1970_v63 = vpop.f32.mrf.mxu1 }
 0x185   : > { %v8584_v16 = vadd.f32 %v5982_v20, %v2061_v37  ;;  %v2059_v22 = vadd.f32 %v1970_v63, %v9107_v54  ;;  %v2709_v25 = vpop.f32.mrf.mxu0 }
 0x186   : > { %v5951_v46 = vpop.f32.mrf.mxu1 }
 0x187   : > { %v8587_v11 = vadd.f32 %v2696_v5, %v2059_v22  ;;  %v2064_v15 = vadd.f32 %v5951_v46, %v8447_v47  ;;  %v5986_v50 = vpop.f32.mrf.mxu0 }
 0x188   : > { %v1983_v7 = vpop.f32.mrf.mxu1 }
 0x189   : > { %v8590_v29 = vadd.f32 %v5985_v24, %v2064_v15  ;;  %v2062_v30 = vadd.f32 %v1983_v7, %v8450_v6  ;;  %v2712_v17 = vpop.f32.mrf.mxu0 }
 0x18a   : > { %v5952_v51 = vpop.f32.mrf.mxu1 }
 0x18b   : > { %v8593_v9 = vadd.f32 %v2709_v25, %v2062_v30  ;;  %v2065_v3 = vadd.f32 %v5952_v51, %v8470_v36  ;;  %v5989_v19 = vpop.f32.mrf.mxu0 }
 0x18c   : > { %v1986_v33 = vpop.f32.mrf.mxu1 }
 0x18d   : > { %v8596_v34 = vadd.f32 %v5986_v50, %v2065_v3  ;;  %v2063_v42 = vadd.f32 %v1986_v33, %v8485_v28  ;;  %v2725_v41 = vpop.f32.mrf.mxu0 }
 0x18e   : > { %v5955_v47 = vpop.f32.mrf.mxu1 }
 0x18f   : > { %9108 = vst [vmem:[#allocation2_spill] sm:$0xff] %v8596_v34  ;;  %v8599_v59 = vadd.f32 %v2712_v17, %v2063_v42  ;;  %v2068_v44 = vadd.f32 %v5955_v47, %v8491_v21  ;;  %v5990_v49 = vpop.f32.mrf.mxu0 }
 0x190   : > { %v1999_v6 = vpop.f32.mrf.mxu1 }
 0x191   : > { %9109 = vst [vmem:[#allocation14_spill] sm:$0xff] %v8599_v59  ;;  %v8602_v58 = vadd.f32 %v5989_v19, %v2068_v44  ;;  %v2066_v35 = vadd.f32 %v1999_v6, %v8494_v10  ;;  %v2728_v20 = vpop.f32.mrf.mxu0 }
 0x192   : > { %v5956_v36 = vpop.f32.mrf.mxu1 }
 0x193   : > { %9110 = vst [vmem:[#allocation19_spill] sm:$0xff] %v8602_v58  ;;  %v8605_v55 = vadd.f32 %v2725_v41, %v2066_v35  ;;  %v2069_v32 = vadd.f32 %v5956_v36, %v8503_v4  ;;  %v5993_v5 = vpop.f32.mrf.mxu0 }
 0x194   : > { %v2002_v28 = vpop.f32.mrf.mxu1 }
 0x195   : > { %9111 = vst [vmem:[#allocation9_spill] sm:$0xff] %v8605_v55  ;;  %v8608_v56 = vadd.f32 %v5990_v49, %v2069_v32  ;;  %v2067_v43 = vadd.f32 %v2002_v28, %v8510_v1  ;;  %v2741_v37 = vpop.f32.mrf.mxu0 }
 0x196   : > { %v5959_v21 = vpop.f32.mrf.mxu1 }
 0x197   : > { %9112 = vst [vmem:[#allocation18_spill] sm:$0xff] %v8608_v56  ;;  %v8611_v24 = vadd.f32 %v2728_v20, %v2067_v43  ;;  %v2072_v63 = vadd.f32 %v5959_v21, %v8516_v23  ;;  %v5994_v54 = vpop.f32.mrf.mxu0 }
 0x198   : > { %v2015_v10 = vpop.f32.mrf.mxu1 }
 0x199   : > { %9113 = vst [vmem:[#allocation21_spill] sm:$0xff] %v8611_v24  ;;  %v8614_v22 = vadd.f32 %v5993_v5, %v2072_v63  ;;  %v2070_v25 = vadd.f32 %v2015_v10, %v8519_v57  ;;  %v2744_v46 = vpop.f32.mrf.mxu0 }
 0x19a   : > { %v5960_v4 = vpop.f32.mrf.mxu1 }
 0x19b   : > { %9114 = vst [vmem:[#allocation23_spill] sm:$0xff] %v8614_v22  ;;  %v8617_v15 = vadd.f32 %v2741_v37, %v2070_v25  ;;  %v2073_v50 = vadd.f32 %v5960_v4, %v8523_v52  ;;  %v5997_v7 = vpop.f32.mrf.mxu0 }
 0x19c   : > { %v2018_v1 = vpop.f32.mrf.mxu1 }
 0x19d   : > { %9115 = vst [vmem:[#allocation25_spill] sm:$0xff] %v8617_v15  ;;  %v8620_v30 = vadd.f32 %v5994_v54, %v2073_v50  ;;  %v2071_v17 = vadd.f32 %v2018_v1, %v8527_v14  ;;  %v2757_v51 = vpop.f32.mrf.mxu0 }
 0x19e   : > { %v5963_v23 = vpop.f32.mrf.mxu1 }
 0x19f   : > { %9116 = vst [vmem:[#allocation4_spill] sm:$0xff] %v8620_v30  ;;  %v8623_v3 = vadd.f32 %v2744_v46, %v2071_v17  ;;  %v2076_v19 = vadd.f32 %v5963_v23, %v8530_v39  ;;  %v5998_v33 = vpop.f32.mrf.mxu0 }
 0x1a0   : > { %v2031_v57 = vpop.f32.mrf.mxu1 }
 0x1a1   : > { %9117 = vst [vmem:[#allocation3_spill] sm:$0xff] %v8623_v3  ;;  %v8626_v42 = vadd.f32 %v5997_v7, %v2076_v19  ;;  %v2074_v41 = vadd.f32 %v2031_v57, %v8533_v45  ;;  %v2760_v47 = vpop.f32.mrf.mxu0 }
 0x1a2   : > { %v5964_v52 = vpop.f32.mrf.mxu1 }
 0x1a3   : > { %9118 = vst [vmem:[#allocation6_spill] sm:$0xff] %v8626_v42  ;;  %v8629_v44 = vadd.f32 %v2757_v51, %v2074_v41  ;;  %v2077_v49 = vadd.f32 %v5964_v52, %v8536_v61  ;;  %v8632_v6 = vpop.f32.mrf.mxu0 }
 0x1a4   : > { %v2034_v14 = vpop.f32.mrf.mxu1 }
 0x1a5   : > { %9119 = vst [vmem:[#allocation5_spill] sm:$0xff] %v8629_v44  ;;  %v8634_v35 = vadd.f32 %v5998_v33, %v2077_v49  ;;  %v2075_v20 = vadd.f32 %v2034_v14, %v8539_v40  ;;  %v8637_v39 = vpop.f32.mrf.mxu0 }
 0x1a6   : > { %v6003_v36 = vpop.f32.mrf.mxu1 }
 0x1a7   : > { %9120 = vst [vmem:[#allocation7_spill] sm:$0xff] %v8634_v35  ;;  %v8639_v32 = vadd.f32 %v2760_v47, %v2075_v20  ;;  %v8641_v5 = vpop.f32.mrf.mxu0 }
 0x1a8   : > { %v8643_v45 = vpop.f32.mrf.mxu1 }
 0x1a9   : > { %9121 = vst [vmem:[#allocation10_spill] sm:$0xff] %v8639_v32  ;;  %v8645_v28 = vpop.f32.mrf.mxu0 }
 0x1aa   : > { %v8647_v43 = vpop.f32.mrf.mxu1 }
 0x1ab   : > { %v8649_v61 = vpop.f32.mrf.mxu0 }
 0x1ac   : > { %v8651_v37 = vpop.f32.mrf.mxu1 }
 0x1ad   : > { %v8653_v21 = vpop.f32.mrf.mxu0 }
 0x1ae   : > { %v8655_v40 = vpop.f32.mrf.mxu1 }
 0x1af   : > { %v8657_v63 = vpop.f32.mrf.mxu0 }
 0x1b0   : > { %v8659_v54 = vpop.f32.mrf.mxu1 }
 0x1b1   : > { %v8661_v10 = vpop.f32.mrf.mxu0 }
 0x1b2   : > { %v8663_v25 = vpop.f32.mrf.mxu1 }
 0x1b3   : > { %v8665_v46 = vpop.f32.mrf.mxu0 }
 0x1b4   : > { %v8667_v4 = vpop.f32.mrf.mxu1 }
 0x1b5   : > { %v8669_v50 = vpop.f32.mrf.mxu0 }
 0x1b6   : > { %v8671_v7 = vpop.f32.mrf.mxu1 }
 0x1b7   : > { %v8673_v1 = vpop.f32.mrf.mxu0 }
 0x1b8   : > { %v8675_v17 = vpop.f32.mrf.mxu1 }
 0x1b9   : > { %v8677_v51 = vpop.f32.mrf.mxu0 }
 0x1ba   : > { %v8679_v23 = vpop.f32.mrf.mxu1 }
 0x1bb   : > { %v8681_v19 = vpop.f32.mrf.mxu0 }
 0x1bc   : > { %v8683_v33 = vpop.f32.mrf.mxu1 }
 0x1bd   : > { %v8685_v57 = vpop.f32.mrf.mxu0 }
 0x1be   : > { %v8687_v41 = vpop.f32.mrf.mxu1 }
 0x1bf   : > { %v8689_v47 = vpop.f32.mrf.mxu0 }
 0x1c0   : > { %v8691_v52 = vpop.f32.mrf.mxu1 }
 0x1c1   : > { %v8693_v49 = vpop.f32.mrf.mxu0 }
 0x1c2   : > { %v8695_v14 = vpop.f32.mrf.mxu1 }
 0x1c3   : > { %v8697_v20 = vpop.f32.mrf.mxu0 }
 0x1c4   : > { %v8699_v32 = vpop.f32.mrf.mxu1 }
 0x1c5   : > { %v8701_v35 = vpop.f32.mrf.mxu0 }
 0x1c6   : > { %9122 = vst [vmem:[#allocation13_spill] sm:$0xff] %v8701_v35  ;;  %v8703_v44 = vpop.f32.mrf.mxu1 }
 0x1c7   : > { %v8705_v42 = vpop.f32.mrf.mxu0 }
 0x1c8   : > { %9123 = vst [vmem:[#allocation15_spill] sm:$0xff] %v8705_v42  ;;  %v8707_v3 = vpop.f32.mrf.mxu1 }
 0x1c9   : > { %v8709_v30 = vpop.f32.mrf.mxu0 }
 0x1ca   : > { %9124 = vst [vmem:[#allocation17_spill] sm:$0xff] %v8709_v30  ;;  %v8711_v15 = vpop.f32.mrf.mxu1 }
 0x1cb   : > { %9125 = vst [vmem:[#allocation20_spill] sm:$0xff] %v8711_v15  ;;  %v8713_v22 = vpop.f32.mrf.mxu0 }
 0x1cc   : > { %9126 = vst [vmem:[#allocation22_spill] sm:$0xff] %v8713_v22  ;;  %v8715_v24 = vpop.f32.mrf.mxu1 }
 0x1cd   : > { %9127 = vst [vmem:[#allocation24_spill] sm:$0xff] %v8715_v24  ;;  %v8717_v56 = vpop.f32.mrf.mxu0 }
 0x1ce   : > { %9128 = vst [vmem:[#allocation11_spill] sm:$0xff] %v8717_v56  ;;  %v8719_v55 = vpop.f32.mrf.mxu1 }
 0x1cf   : > { %9129 = vst [vmem:[#allocation8_spill] sm:$0xff] %v8719_v55  ;;  %v8721_v58 = vpop.f32.mrf.mxu0 }
 0x1d0   : > { %9130 = vst [vmem:[#allocation16_spill] sm:$0xff] %v8721_v58  ;;  %v8723_v59 = vpop.f32.mrf.mxu1 }
 0x1d1   : > { %v8725_v42 = vpop.f32.mrf.mxu0 }
 0x1d2   : > { %9131 = vst [vmem:[#allocation12_spill] sm:$0xff] %v8725_v42  ;;  %v8727_v35 = vpop.f32.mrf.mxu1 }
 0x1d3   : > { %9132 = vst [vmem:[#allocation26_spill] sm:$0xff] %v8727_v35  ;;  %v8729_v30 = vpop.f32.mrf.mxu0 }
 0x1d4   : > { %9133 = vst [vmem:[#allocation27_spill] sm:$0xff] %v8729_v30  ;;  %v8731_v15 = vpop.f32.mrf.mxu1 }
 0x1d5   : > { %9134 = vst [vmem:[#allocation28_spill] sm:$0xff] %v8731_v15  ;;  %v8733_v22 = vpop.f32.mrf.mxu0 }
 0x1d6   : > { %9135 = vst [vmem:[#allocation29_spill] sm:$0xff] %v8733_v22  ;;  %v8735_v34 = vpop.f32.mrf.mxu1 }
 0x1d7   : > { %9136 = vst [vmem:[#allocation30_spill] sm:$0xff] %v8735_v34  ;;  %v8737_v24 = vpop.f32.mrf.mxu0 }
 0x1d8   : > { %9137 = vst [vmem:[#allocation31_spill] sm:$0xff] %v8737_v24  ;;  %v8739_v56 = vpop.f32.mrf.mxu1  ;;  %v3244_v24 = vadd.f32 %v6003_v36, %v8542_v62  ;;  %v3243_v36 = vadd.f32 %v8651_v37, %v8551_v60 }
 0x1d9   : > { %9138 = vst [vmem:[#allocation32_spill] sm:$0xff] %v8739_v56  ;;  %v8741_v55 = vpop.f32.mrf.mxu0 }
 0x1da   : > { %9139 = vst [vmem:[#allocation33_spill] sm:$0xff] %v8741_v55  ;;  %v8743_v58 = vpop.f32.mrf.mxu1  ;;  %v3602_v60 = vadd.f32 %v8645_v28, %v3243_v36  ;;  %v3247_v28 = vadd.f32 %v8667_v4, %v8563_v2 }
 0x1db   : > { %9140 = vst [vmem:[#allocation34_spill] sm:$0xff] %v8743_v58  ;;  %v8746_v42 = vpop.f32.mrf.mxu0 }
 0x1dc   : > { %9141 = vst [vmem:[#allocation35_spill] sm:$0xff] %v8746_v42  ;;  %v8748_v35 = vpop.f32.mrf.mxu1  ;;  %v3242_v42 = vadd.f32 %v8643_v45, %v8545_v0 }
 0x1dd   : > { %9142 = vst [vmem:[#allocation36_spill] sm:$0xff] %v8748_v35  ;;  %v8750_v30 = vpop.f32.mrf.mxu0 }
 0x1de   : > { %9143 = vst [vmem:[#allocation37_spill] sm:$0xff] %v8750_v30  ;;  %v8752_v15 = vpop.f32.mrf.mxu1  ;;  %v3603_v30 = vadd.f32 %v8632_v6, %v3244_v24  ;;  %v3601_v62 = vadd.f32 %v8637_v39, %v3242_v42  ;;  %v3248_v24 = vadd.f32 %v8655_v40, %v8554_v48 }
 0x1df   : > { %9144 = vst [vmem:[#allocation38_spill] sm:$0xff] %v8752_v15  ;;  %v8754_v22 = vpop.f32.mrf.mxu0 }
 0x1e0   : > { %9145 = vst [vmem:[#allocation39_spill] sm:$0xff] %v8754_v22  ;;  %v8756_v34 = vpop.f32.mrf.mxu1  ;;  %v3245_v22 = vadd.f32 %v8647_v43, %v8548_v26 }
 0x1e1   : > { %9146 = vst [vmem:[#allocation40_spill] sm:$0xff] %v8756_v34  ;;  %v8759_v56 = vpop.f32.mrf.mxu0 }
 0x1e2   : > { %9147 = vst [vmem:[#allocation41_spill] sm:$0xff] %v8759_v56  ;;  %v8761_v55 = vpop.f32.mrf.mxu1  ;;  %v3604_v26 = vadd.f32 %v8641_v5, %v3245_v22  ;;  %v3607_v22 = vadd.f32 %v8649_v61, %v3248_v24  ;;  %v3249_v5 = vadd.f32 %v8663_v25, %v8560_v38  ;;  %v3252_v61 = vadd.f32 %v8671_v7, %v8566_v27 }
 0x1e3   : > { %9148 = vst [vmem:[#allocation42_spill] sm:$0xff] %v8761_v55  ;;  %v6105_v35 = vpop.f32.mrf.mxu0 }
 0x1e4   : > { %v8765_v58 = vpop.f32.mrf.mxu1  ;;  %v3608_v2 = vadd.f32 %v8657_v63, %v3249_v5  ;;  %v3611_v7 = vadd.f32 %v8665_v46, %v3252_v61 }
 0x1e5   : > { %9149 = vst [vmem:[#allocation43_spill] sm:$0xff] %v8765_v58  ;;  %v4670_v34 = vpop.f32.mrf.mxu0 }
 0x1e6   : > { %v6071_v15 = vpop.f32.mrf.mxu1 }
 0x1e7   : > { %v4329_v56 = vadd.f32 %v6071_v15, %v3603_v30  ;;  %v6106_v55 = vpop.f32.mrf.mxu0  ;;  %v3246_v15 = vadd.f32 %v8659_v54, %v8557_v31 }
 0x1e8   : > { %v4200_v0 = vpop.f32.mrf.mxu1 }
 0x1e9   : > { %v4799_v6 = vadd.f32 %v6105_v35, %v4329_v56  ;;  %v4327_v42 = vadd.f32 %v4200_v0, %v3601_v62  ;;  %v4673_v39 = vpop.f32.mrf.mxu0  ;;  %v3605_v31 = vadd.f32 %v8653_v21, %v3246_v15  ;;  %v3606_v21 = vadd.f32 %v8661_v10, %v3247_v28 }
 0x1ea   : > { %v6072_v45 = vpop.f32.mrf.mxu1  ;;  %v3253_v15 = vadd.f32 %v8679_v23, %v8572_v13 }
 0x1eb   : > { %4831 = vst [vmem:[%s8776_s24 + $0x10] sm:$0xff] %v4799_v6  ;;  %v4797_v30 = vadd.f32 %v4670_v34, %v4327_v42  ;;  %v4330_v43 = vadd.f32 %v6072_v45, %v3604_v26  ;;  %v6109_v37 = vpop.f32.mrf.mxu0  ;;  %v4901_v24 = vmul.f32 %v4799_v6, %v4799_v6 }
 0x1ec   : > { %v4203_v58 = vpop.f32.mrf.mxu1 }
 0x1ed   : > { %4829 = vst [vmem:[%s8776_s24] sm:$0xff] %v4797_v30  ;;  %v4800_v48 = vadd.f32 %v6106_v55, %v4330_v43  ;;  %v4328_v56 = vadd.f32 %v4203_v58, %v3602_v60  ;;  %v4686_v35 = vpop.f32.mrf.mxu0  ;;  %v4899_v55 = vmul.f32 %v4797_v30, %v4797_v30  ;;  %v3250_v60 = vadd.f32 %v8675_v17, %v8569_v18 }
 0x1ee   : > { %v6075_v40 = vpop.f32.mrf.mxu1 }
 0x1ef   : > { %4832 = vst [vmem:[%s8776_s24 + $0x18] sm:$0xff] %v4800_v48  ;;  %v4798_v34 = vadd.f32 %v4673_v39, %v4328_v56  ;;  %v4333_v54 = vadd.f32 %v6075_v40, %v3607_v22  ;;  %v6110_v62 = vpop.f32.mrf.mxu0  ;;  %v4902_v43 = vmul.f32 %v4800_v48, %v4800_v48  ;;  %v3251_v56 = vadd.f32 %v8683_v33, %v8575_v8 }
 0x1f0   : > { %v4216_v58 = vpop.f32.mrf.mxu1  ;;  %v3609_v40 = vadd.f32 %v8669_v50, %v3250_v60 }
 0x1f1   : > { %4830 = vst [vmem:[%s8776_s24 + $0x8] sm:$0xff] %v4798_v34  ;;  %v4861_v36 = vadd.f32 %v4798_v34, %v4797_v30  ;;  %v4900_v0 = vmul.f32 %v4798_v34, %v4798_v34  ;;  %v4803_v38 = vadd.f32 %v6109_v37, %v4333_v54  ;;  %v4331_v25 = vadd.f32 %v4216_v58, %v3605_v31  ;;  %v4689_v26 = vpop.f32.mrf.mxu0 }
 0x1f2   : > { %v6076_v4 = vpop.f32.mrf.mxu1  ;;  %v3612_v31 = vadd.f32 %v8673_v1, %v3253_v15  ;;  %v3254_v58 = vadd.f32 %v8691_v52, %v8581_v12 }
 0x1f3   : > { %v4862_v42 = vadd.f32 %v4861_v36, %v4799_v6  ;;  %v4931_v39 = vadd.f32 %v4900_v0, %v4899_v55  ;;  %4835 = vst [vmem:[%s8776_s24 + $0x30] sm:$0xff] %v4803_v38  ;;  %v4801_v45 = vadd.f32 %v4686_v35, %v4331_v25  ;;  %v6113_v27 = vpop.f32.mrf.mxu0  ;;  %v4334_v30 = vadd.f32 %v6076_v4, %v3608_v2 }
 0x1f4   : > { %v4219_v63 = vpop.f32.mrf.mxu1  ;;  %v3256_v55 = vadd.f32 %v8687_v41, %v8578_v53  ;;  %v4905_v1 = vmul.f32 %v4803_v38, %v4803_v38 }
 0x1f5   : > { %v4932_v37 = vadd.f32 %v4931_v39, %v4901_v24  ;;  %4833 = vst [vmem:[%s8776_s24 + $0x20] sm:$0xff] %v4801_v45  ;;  %v4863_v10 = vadd.f32 %v4862_v42, %v4800_v48  ;;  %v4332_v6 = vadd.f32 %v4219_v63, %v3606_v21  ;;  %v4702_v22 = vpop.f32.mrf.mxu0  ;;  %v4903_v46 = vmul.f32 %v4801_v45, %v4801_v45 }
 0x1f6   : > { %v4804_v35 = vadd.f32 %v6110_v62, %v4334_v30  ;;  %v6079_v5 = vpop.f32.mrf.mxu1  ;;  %v3610_v62 = vadd.f32 %v8677_v51, %v3251_v56  ;;  %v3257_v21 = vadd.f32 %v8695_v14, %v8584_v16  ;;  %v3615_v39 = vadd.f32 %v8681_v19, %v3256_v55 }
 0x1f7   : > { %v4864_v18 = vadd.f32 %v4863_v10, %v4801_v45  ;;  %v4933_v17 = vadd.f32 %v4932_v37, %v4902_v43  ;;  %v4802_v28 = vadd.f32 %v4689_v26, %v4332_v6  ;;  %v4337_v13 = vadd.f32 %v6079_v5, %v3611_v7  ;;  %v6114_v23 = vpop.f32.mrf.mxu0 }
 0x1f8   : > { %4836 = vst [vmem:[%s8776_s24 + $0x38] sm:$0xff] %v4804_v35  ;;  %v4232_v48 = vpop.f32.mrf.mxu1  ;;  %v4906_v51 = vmul.f32 %v4804_v35, %v4804_v35  ;;  %v3616_v15 = vadd.f32 %v8689_v47, %v3257_v21  ;;  %v3255_v30 = vadd.f32 %v8699_v32, %v8587_v11  ;;  %v3260_v63 = vadd.f32 %v8703_v44, %v8590_v29  ;;  %v9156_v21 = vld [vmem:[#allocation19_spill] sm:$0xff] }
 0x1f9   : > { %v4934_v34 = vadd.f32 %v4933_v17, %v4903_v46  ;;  %4834 = vst [vmem:[%s8776_s24 + $0x28] sm:$0xff] %v4802_v28  ;;  %v4865_v54 = vadd.f32 %v4864_v18, %v4802_v28  ;;  %v4904_v61 = vmul.f32 %v4802_v28, %v4802_v28  ;;  %v4807_v8 = vadd.f32 %v6113_v27, %v4337_v13  ;;  %v4705_v33 = vpop.f32.mrf.mxu0  ;;  %v9150_v28 = vld [vmem:[#allocation2_spill] sm:$0xff]  ;;  %v9151_v13 = vld [vmem:[#allocation20_spill] sm:$0xff] }
 0x1fa   : > { %v4335_v50 = vadd.f32 %v4232_v48, %v3609_v40  ;;  %v6080_v36 = vpop.f32.mrf.mxu1  ;;  %v3258_v56 = vadd.f32 %v8707_v3, %v8593_v9  ;;  %v3614_v18 = vadd.f32 %v8693_v49, %v3255_v30  ;;  %v3619_v17 = vadd.f32 %v8697_v20, %v3260_v63  ;;  %v9161_v30 = vld [vmem:[#allocation26_spill] sm:$0xff] }
 0x1fb   : > { %v4866_v0 = vadd.f32 %v4865_v54, %v4803_v38  ;;  %v4935_v25 = vadd.f32 %v4934_v34, %v4904_v61  ;;  %4839 = vst [vmem:[%s8776_s24 + $0x50] sm:$0xff] %v4807_v8  ;;  %v4338_v26 = vadd.f32 %v6080_v36, %v3612_v31  ;;  %v6117_v2 = vpop.f32.mrf.mxu0  ;;  %v3613_v38 = vadd.f32 %v8685_v57, %v3254_v58  ;;  %v9152_v54 = vld [vmem:[#allocation13_spill] sm:$0xff] }
 0x1fc   : > { %v4805_v4 = vadd.f32 %v4702_v22, %v4335_v50  ;;  %v4235_v24 = vpop.f32.mrf.mxu1  ;;  %v4909_v47 = vmul.f32 %v4807_v8, %v4807_v8  ;;  %v3617_v61 = vadd.f32 %v9152_v54, %v3258_v56  ;;  %v9167_v54 = vld [vmem:[#allocation23_spill] sm:$0xff] }
 0x1fd   : > { %v4936_v53 = vadd.f32 %v4935_v25, %v4905_v1  ;;  %v4867_v41 = vadd.f32 %v4866_v0, %v4804_v35  ;;  %v4808_v42 = vadd.f32 %v6114_v23, %v4338_v26  ;;  %v4336_v12 = vadd.f32 %v4235_v24, %v3610_v62  ;;  %v4718_v52 = vpop.f32.mrf.mxu0  ;;  %v9155_v0 = vld [vmem:[#allocation15_spill] sm:$0xff] }
 0x1fe   : > { %4837 = vst [vmem:[%s8776_s24 + $0x40] sm:$0xff] %v4805_v4  ;;  %v6083_v45 = vpop.f32.mrf.mxu1  ;;  %v4907_v7 = vmul.f32 %v4805_v4, %v4805_v4  ;;  %v3261_v23 = vadd.f32 %v9151_v13, %v9150_v28 }
 0x1ff   : > { %v4868_v27 = vadd.f32 %v4867_v41, %v4805_v4  ;;  %v4937_v60 = vadd.f32 %v4936_v53, %v4906_v51  ;;  %4840 = vst [vmem:[%s8776_s24 + $0x58] sm:$0xff] %v4808_v42  ;;  %v4806_v16 = vadd.f32 %v4705_v33, %v4336_v12  ;;  %v6118_v14 = vpop.f32.mrf.mxu0  ;;  %v4341_v19 = vadd.f32 %v6083_v45, %v3615_v39  ;;  %v9154_v33 = vld [vmem:[#allocation24_spill] sm:$0xff] }
 0x200   : > { %v4248_v43 = vpop.f32.mrf.mxu1  ;;  %v4910_v9 = vmul.f32 %v4808_v42, %v4808_v42  ;;  %v3620_v25 = vadd.f32 %v9155_v0, %v3261_v23  ;;  %v9157_v51 = vld [vmem:[#allocation8_spill] sm:$0xff] }
 0x201   : > { %v4938_v37 = vadd.f32 %v4937_v60, %v4907_v7  ;;  %4838 = vst [vmem:[%s8776_s24 + $0x48] sm:$0xff] %v4806_v16  ;;  %v4869_v57 = vadd.f32 %v4868_v27, %v4806_v16  ;;  %v4908_v10 = vmul.f32 %v4806_v16, %v4806_v16  ;;  %v4339_v6 = vadd.f32 %v4248_v43, %v3613_v38  ;;  %v4721_v22 = vpop.f32.mrf.mxu0  ;;  %v9158_v38 = vld [vmem:[#allocation17_spill] sm:$0xff]  ;;  %v9166_v23 = vld [vmem:[#allocation16_spill] sm:$0xff] }
 0x202   : > { %v4811_v46 = vadd.f32 %v6117_v2, %v4341_v19  ;;  %v6084_v35 = vpop.f32.mrf.mxu1  ;;  %v3264_v4 = vadd.f32 %v9157_v51, %v9156_v21  ;;  %v9159_v27 = vld [vmem:[#allocation9_spill] sm:$0xff]  ;;  %v9171_v0 = vld [vmem:[#allocation32_spill] sm:$0xff] }
 0x203   : > { %v4870_v11 = vadd.f32 %v4869_v57, %v4807_v8  ;;  %v4939_v32 = vadd.f32 %v4938_v37, %v4908_v10  ;;  %v4809_v5 = vadd.f32 %v4718_v52, %v4339_v6  ;;  %v4342_v29 = vadd.f32 %v6084_v35, %v3616_v15  ;;  %v6121_v44 = vpop.f32.mrf.mxu0  ;;  %v9153_v8 = vld [vmem:[#allocation14_spill] sm:$0xff]  ;;  %v9172_v51 = vld [vmem:[#allocation4_spill] sm:$0xff] }
 0x204   : > { %4843 = vst [vmem:[%s8776_s24 + $0x70] sm:$0xff] %v4811_v46  ;;  %v4251_v40 = vpop.f32.mrf.mxu1  ;;  %v3259_v62 = vadd.f32 %v9154_v33, %v9153_v8  ;;  %v3262_v7 = vadd.f32 %v8723_v59, %v9159_v27  ;;  %v9160_v15 = vld [vmem:[#allocation18_spill] sm:$0xff]  ;;  %v4913_v19 = vmul.f32 %v4811_v46, %v4811_v46 }
 0x205   : > { %v4940_v3 = vadd.f32 %v4939_v32, %v4909_v47  ;;  %4841 = vst [vmem:[%s8776_s24 + $0x60] sm:$0xff] %v4809_v5  ;;  %v4871_v31 = vadd.f32 %v4870_v11, %v4808_v42  ;;  %v4812_v48 = vadd.f32 %v6118_v14, %v4342_v29  ;;  %v4734_v34 = vpop.f32.mrf.mxu0  ;;  %v4340_v49 = vadd.f32 %v4251_v40, %v3614_v18  ;;  %v9162_v10 = vld [vmem:[#allocation22_spill] sm:$0xff]  ;;  %v9165_v18 = vld [vmem:[#allocation28_spill] sm:$0xff] }
 0x206   : > { %v6087_v20 = vpop.f32.mrf.mxu1  ;;  %v4911_v58 = vmul.f32 %v4809_v5, %v4809_v5  ;;  %v3618_v45 = vadd.f32 %v9158_v38, %v3259_v62  ;;  %v3265_v63 = vadd.f32 %v9161_v30, %v9160_v15  ;;  %v3623_v6 = vadd.f32 %v9162_v10, %v3264_v4  ;;  %v9173_v4 = vld [vmem:[#allocation34_spill] sm:$0xff]  ;;  %v9175_v30 = vld [vmem:[#allocation29_spill] sm:$0xff] }
 0x207   : > { %v4872_v55 = vadd.f32 %v4871_v31, %v4809_v5  ;;  %v4941_v50 = vadd.f32 %v4940_v3, %v4910_v9  ;;  %4844 = vst [vmem:[%s8776_s24 + $0x78] sm:$0xff] %v4812_v48  ;;  %v4345_v36 = vadd.f32 %v6087_v20, %v3619_v17  ;;  %v6122_v1 = vpop.f32.mrf.mxu0  ;;  %v4810_v26 = vadd.f32 %v4721_v22, %v4340_v49  ;;  %v9163_v5 = vld [vmem:[#allocation11_spill] sm:$0xff] }
 0x208   : > { %v4264_v2 = vpop.f32.mrf.mxu1  ;;  %v4914_v35 = vmul.f32 %v4812_v48, %v4812_v48  ;;  %v3621_v29 = vadd.f32 %v9163_v5, %v3262_v7  ;;  %v3624_v40 = vadd.f32 %v9166_v23, %v3265_v63  ;;  %v9180_v5 = vld [vmem:[#allocation38_spill] sm:$0xff]  ;;  %v9181_v23 = vld [vmem:[#allocation33_spill] sm:$0xff] }
 0x209   : > { %v4942_v24 = vadd.f32 %v4941_v50, %v4911_v58  ;;  %v4815_v53 = vadd.f32 %v6121_v44, %v4345_v36  ;;  %v4343_v41 = vadd.f32 %v4264_v2, %v3617_v61  ;;  %v4737_v42 = vpop.f32.mrf.mxu0  ;;  %4842 = vst [vmem:[%s8776_s24 + $0x68] sm:$0xff] %v4810_v26  ;;  %v4873_v12 = vadd.f32 %v4872_v55, %v4810_v26  ;;  %v9164_v44 = vld [vmem:[#allocation21_spill] sm:$0xff]  ;;  %v9168_v61 = vld [vmem:[#allocation30_spill] sm:$0xff]  ;;  %v9169_v50 = vld [vmem:[#allocation12_spill] sm:$0xff] }
 0x20a   : > { %v4912_v52 = vmul.f32 %v4810_v26, %v4810_v26  ;;  %v6088_v39 = vpop.f32.mrf.mxu1  ;;  %v3263_v17 = vadd.f32 %v9165_v18, %v9164_v44 }
 0x20b   : > { %4847 = vst [vmem:[%s8776_s24 + $0x90] sm:$0xff] %v4815_v53  ;;  %v4813_v60 = vadd.f32 %v4734_v34, %v4343_v41  ;;  %v4346_v16 = vadd.f32 %v6088_v39, %v3620_v25  ;;  %v4874_v43 = vadd.f32 %v4873_v12, %v4811_v46  ;;  %v4917_v41 = vmul.f32 %v4815_v53, %v4815_v53  ;;  %v9174_v39 = vld [vmem:[#allocation27_spill] sm:$0xff] }
 0x20c   : > { %v6125_v14 = vpop.f32.mrf.mxu0  ;;  %v4943_v37 = vadd.f32 %v4942_v24, %v4912_v52  ;;  %v4267_v57 = vpop.f32.mrf.mxu1  ;;  %v3622_v36 = vadd.f32 %v9169_v50, %v3263_v17  ;;  %v3269_v24 = vadd.f32 %v9173_v4, %v9172_v51  ;;  %v9186_v50 = vld [vmem:[#allocation42_spill] sm:$0xff]  ;;  %v9187_v4 = vld [vmem:[#allocation37_spill] sm:$0xff] }
 0x20d   : > { %4845 = vst [vmem:[%s8776_s24 + $0x80] sm:$0xff] %v4813_v60  ;;  %v4816_v22 = vadd.f32 %v6122_v1, %v4346_v16  ;;  %v4344_v56 = vadd.f32 %v4267_v57, %v3618_v45  ;;  %v4875_v11 = vadd.f32 %v4874_v43, %v4812_v48  ;;  %v4915_v3 = vmul.f32 %v4813_v60, %v4813_v60  ;;  %v9170_v1 = vld [vmem:[#allocation25_spill] sm:$0xff]  ;;  %v9177_v43 = vld [vmem:[#allocation36_spill] sm:$0xff] }
 0x20e   : > { %v4750_v47 = vpop.f32.mrf.mxu0  ;;  %v4944_v59 = vadd.f32 %v4943_v37, %v4913_v19  ;;  %v6091_v32 = vpop.f32.mrf.mxu1  ;;  %v3268_v48 = vadd.f32 %v9168_v61, %v9167_v54  ;;  %v3266_v25 = vadd.f32 %v9171_v0, %v9170_v1  ;;  %v9176_v19 = vld [vmem:[#allocation3_spill] sm:$0xff] }
 0x20f   : > { %4848 = vst [vmem:[%s8776_s24 + $0x98] sm:$0xff] %v4816_v22  ;;  %v4814_v46 = vadd.f32 %v4737_v42, %v4344_v56  ;;  %v4349_v28 = vadd.f32 %v6091_v32, %v3623_v6  ;;  %v4876_v9 = vadd.f32 %v4875_v11, %v4813_v60  ;;  %v4918_v60 = vmul.f32 %v4816_v22, %v4816_v22  ;;  %v9178_v6 = vld [vmem:[#allocation31_spill] sm:$0xff]  ;;  %v9179_v32 = vld [vmem:[#allocation6_spill] sm:$0xff] }
 0x210   : > { %v6126_v13 = vpop.f32.mrf.mxu0  ;;  %v4945_v31 = vadd.f32 %v4944_v59, %v4914_v35  ;;  %v4280_v34 = vpop.f32.mrf.mxu1  ;;  %v3627_v38 = vadd.f32 %v9174_v39, %v3268_v48  ;;  %v3625_v63 = vadd.f32 %v9175_v30, %v3266_v25  ;;  %v3267_v37 = vadd.f32 %v9177_v43, %v9176_v19 }
 0x211   : > { %4846 = vst [vmem:[%s8776_s24 + $0x88] sm:$0xff] %v4814_v46  ;;  %v4916_v8 = vmul.f32 %v4814_v46, %v4814_v46  ;;  %v4819_v33 = vadd.f32 %v6125_v14, %v4349_v28  ;;  %v4347_v62 = vadd.f32 %v4280_v34, %v3621_v29  ;;  %v4877_v55 = vadd.f32 %v4876_v9, %v4814_v46  ;;  %v9182_v9 = vld [vmem:[#allocation5_spill] sm:$0xff] }
 0x212   : > { %v4753_v49 = vpop.f32.mrf.mxu0  ;;  %v4946_v20 = vadd.f32 %v4945_v31, %v4915_v3  ;;  %v6092_v58 = vpop.f32.mrf.mxu1  ;;  %v3628_v56 = vadd.f32 %v9178_v6, %v3269_v24  ;;  %v9183_v3 = vld [vmem:[#allocation40_spill] sm:$0xff] }
 0x213   : > { %4851 = vst [vmem:[%s8776_s24 + $0xb0] sm:$0xff] %v4819_v33  ;;  %v4817_v26 = vadd.f32 %v4750_v47, %v4347_v62  ;;  %v4350_v2 = vadd.f32 %v6092_v58, %v3624_v40  ;;  %v4878_v42 = vadd.f32 %v4877_v55, %v4815_v53  ;;  %v3626_v40 = vadd.f32 %v9181_v23, %v3267_v37  ;;  %v9185_v58 = vld [vmem:[#allocation7_spill] sm:$0xff]  ;;  %v9191_v37 = vld [vmem:[#allocation41_spill] sm:$0xff] }
 0x214   : > { %v6129_v21 = vpop.f32.mrf.mxu0  ;;  %v4947_v12 = vadd.f32 %v4946_v20, %v4916_v8  ;;  %v4283_v52 = vpop.f32.mrf.mxu1  ;;  %v3270_v31 = vadd.f32 %v9183_v3, %v9182_v9  ;;  %v4921_v48 = vmul.f32 %v4819_v33, %v4819_v33  ;;  %v9184_v20 = vld [vmem:[#allocation35_spill] sm:$0xff] }
 0x215   : > { %4849 = vst [vmem:[%s8776_s24 + $0xa0] sm:$0xff] %v4817_v26  ;;  %v4820_v45 = vadd.f32 %v6126_v13, %v4350_v2  ;;  %v4348_v27 = vadd.f32 %v4283_v52, %v3622_v36  ;;  %v4879_v14 = vadd.f32 %v4878_v42, %v4816_v22  ;;  %v4919_v35 = vmul.f32 %v4817_v26, %v4817_v26 }
 0x216   : > { %v4766_v7 = vpop.f32.mrf.mxu0  ;;  %v4948_v16 = vadd.f32 %v4947_v12, %v4917_v41  ;;  %v6095_v15 = vpop.f32.mrf.mxu1  ;;  %v3272_v22 = vadd.f32 %v9180_v5, %v9179_v32  ;;  %v3273_v36 = vadd.f32 %v9186_v50, %v9185_v58  ;;  %v3629_v24 = vadd.f32 %v9187_v4, %v3270_v31  ;;  %v9188_v41 = vld [vmem:[#allocation10_spill] sm:$0xff] }
 0x217   : > { %4852 = vst [vmem:[%s8776_s24 + $0xb8] sm:$0xff] %v4820_v45  ;;  %v4818_v53 = vadd.f32 %v4753_v49, %v4348_v27  ;;  %v4353_v57 = vadd.f32 %v6095_v15, %v3627_v38  ;;  %v4880_v47 = vadd.f32 %v4879_v14, %v4817_v26  ;;  %v4922_v25 = vmul.f32 %v4820_v45, %v4820_v45 }
 0x218   : > { %v6130_v10 = vpop.f32.mrf.mxu0  ;;  %v4949_v59 = vadd.f32 %v4948_v16, %v4918_v60  ;;  %v4296_v11 = vpop.f32.mrf.mxu1  ;;  %v3631_v55 = vadd.f32 %v9184_v20, %v3272_v22  ;;  %v9190_v60 = vld [vmem:[#allocation39_spill] sm:$0xff] }
 0x219   : > { %4850 = vst [vmem:[%s8776_s24 + $0xa8] sm:$0xff] %v4818_v53  ;;  %v4920_v29 = vmul.f32 %v4818_v53, %v4818_v53  ;;  %v4823_v44 = vadd.f32 %v6129_v21, %v4353_v57  ;;  %v4351_v18 = vadd.f32 %v4296_v11, %v3625_v63  ;;  %v4881_v28 = vadd.f32 %v4880_v47, %v4818_v53 }
 0x21a   : > { %v4769_v17 = vpop.f32.mrf.mxu0  ;;  %v4950_v46 = vadd.f32 %v4949_v59, %v4919_v35  ;;  %v6096_v13 = vpop.f32.mrf.mxu1  ;;  %v3632_v16 = vadd.f32 %v9190_v60, %v3273_v36 }
 0x21b   : > { %4855 = vst [vmem:[%s8776_s24 + $0xd0] sm:$0xff] %v4823_v44  ;;  %v4821_v34 = vadd.f32 %v4766_v7, %v4351_v18  ;;  %v4354_v54 = vadd.f32 %v6096_v13, %v3628_v56  ;;  %v4882_v8 = vadd.f32 %v4881_v28, %v4819_v33  ;;  %v9189_v33 = vld [vmem:[#allocation43_spill] sm:$0xff]  ;;  %v4925_v6 = vmul.f32 %v4823_v44, %v4823_v44 }
 0x21c   : > { %v6133_v61 = vpop.f32.mrf.mxu0  ;;  %v4951_v62 = vadd.f32 %v4950_v46, %v4920_v29  ;;  %v4299_v49 = vpop.f32.mrf.mxu1  ;;  %v3271_v42 = vadd.f32 %v9189_v33, %v9188_v41 }
 0x21d   : > { %4853 = vst [vmem:[%s8776_s24 + $0xc0] sm:$0xff] %v4821_v34  ;;  %v4824_v1 = vadd.f32 %v6130_v10, %v4354_v54  ;;  %v4352_v0 = vadd.f32 %v4299_v49, %v3626_v40  ;;  %v4883_v2 = vadd.f32 %v4882_v8, %v4820_v45  ;;  %v4923_v38 = vmul.f32 %v4821_v34, %v4821_v34 }
 0x21e   : > { %v4952_v26 = vadd.f32 %v4951_v62, %v4921_v48  ;;  %v6099_v21 = vpop.f32.mrf.mxu1  ;;  %v4782_v51 = vpop.f32.mrf.mxu0  ;;  %v3630_v53 = vadd.f32 %v9191_v37, %v3271_v42 }
 0x21f   : > { %4856 = vst [vmem:[%s8776_s24 + $0xd8] sm:$0xff] %v4824_v1  ;;  %v4822_v12 = vadd.f32 %v4769_v17, %v4352_v0  ;;  %v4357_v52 = vadd.f32 %v6099_v21, %v3631_v55  ;;  %v4884_v39 = vadd.f32 %v4883_v2, %v4821_v34  ;;  %v4926_v32 = vmul.f32 %v4824_v1, %v4824_v1 }
 0x220   : > { %v4953_v27 = vadd.f32 %v4952_v26, %v4922_v25  ;;  %v4312_v7 = vpop.f32.mrf.mxu1  ;;  %v6134_v43 = vpop.f32.mrf.mxu0 }
 0x221   : > { %4854 = vst [vmem:[%s8776_s24 + $0xc8] sm:$0xff] %v4822_v12  ;;  %v4924_v45 = vmul.f32 %v4822_v12, %v4822_v12  ;;  %v4827_v14 = vadd.f32 %v6133_v61, %v4357_v52  ;;  %v4355_v15 = vadd.f32 %v4312_v7, %v3629_v24  ;;  %v4885_v63 = vadd.f32 %v4884_v39, %v4822_v12 }
 0x222   : > { %v4954_v30 = vadd.f32 %v4953_v27, %v4923_v38  ;;  %v6100_v19 = vpop.f32.mrf.mxu1  ;;  %v4785_v29 = vpop.f32.mrf.mxu0 }
 0x223   : > { %4859 = vst [vmem:[%s8776_s24 + $0xf0] sm:$0xff] %v4827_v14  ;;  %v4825_v57 = vadd.f32 %v4782_v51, %v4355_v15  ;;  %v4358_v10 = vadd.f32 %v6100_v19, %v3632_v16  ;;  %v4886_v56 = vadd.f32 %v4885_v63, %v4823_v44  ;;  %v4929_v9 = vmul.f32 %v4827_v14, %v4827_v14 }
 0x224   : > { %v4955_v47 = vadd.f32 %v4954_v30, %v4924_v45  ;;  %v4315_v35 = vpop.f32.mrf.mxu1 }
 0x225   : > { %4857 = vst [vmem:[%s8776_s24 + $0xe0] sm:$0xff] %v4825_v57  ;;  %v4828_v59 = vadd.f32 %v6134_v43, %v4358_v10  ;;  %v4356_v11 = vadd.f32 %v4315_v35, %v3630_v53  ;;  %v4887_v22 = vadd.f32 %v4886_v56, %v4824_v1  ;;  %v4927_v46 = vmul.f32 %v4825_v57, %v4825_v57 }
 0x226   : > { %v4956_v5 = vadd.f32 %v4955_v47, %v4925_v6 }
 0x227   : > { %4860 = vst [vmem:[%s8776_s24 + $0xf8] sm:$0xff] %v4828_v59  ;;  %v4826_v18 = vadd.f32 %v4785_v29, %v4356_v11  ;;  %v4888_v17 = vadd.f32 %v4887_v22, %v4825_v57  ;;  %v4930_v31 = vmul.f32 %v4828_v59, %v4828_v59 }
 0x228   : > { %v4957_v28 = vadd.f32 %v4956_v5, %v4926_v32 }
 0x229   : > { %4858 = vst [vmem:[%s8776_s24 + $0xe8] sm:$0xff] %v4826_v18  ;;  %v4928_v13 = vmul.f32 %v4826_v18, %v4826_v18  ;;  %v4889_v40 = vadd.f32 %v4888_v17, %v4826_v18 }
 0x22a   : > { %v4958_v23 = vadd.f32 %v4957_v28, %v4927_v46 }
 0x22b   : > { %v4890_v44 = vadd.f32 %v4889_v40, %v4827_v14 }
 0x22c   : > { %v4959_v3 = vadd.f32 %v4958_v23, %v4928_v13 }
 0x22d   : > { %v4891_v34 = vadd.f32 %v4890_v44, %v4828_v59 }
 0x22e   : > { %v4960_v54 = vadd.f32 %v4959_v3, %v4929_v9 }
 0x22f   : > { %v4892_v61 = vrot.slane %v4891_v34, 4 }
 0x230   : > { %v4961_v48 = vadd.f32 %v4960_v54, %v4930_v31 }
 0x231   : > { %v4893_v8 = vadd.f32 %v4892_v61, %v4891_v34 }
 0x232   : > { %v4962_v62 = vrot.slane %v4961_v48, 4 }
 0x233   : > { %v4894_v49 = vrot.slane %v4893_v8, 2 }
 0x234   : > { %v4963_v20 = vadd.f32 %v4962_v62, %v4961_v48 }
 0x235   : > { %v4895_v55 = vadd.f32 %v4894_v49, %v4893_v8 }
 0x236   : > { %v4964_v58 = vrot.slane %v4963_v20, 2 }
 0x237   : > { %v4896_v50 = vrot.slane %v4895_v55, 1 }
 0x238   : > { %v4965_v36 = vadd.f32 %v4964_v58, %v4963_v20 }
 0x239   : > { %v4897_v1 = vadd.f32 %v4896_v50, %v4895_v55 }
 0x23a   : > { %v4966_v0 = vrot.slane %v4965_v36, 1 }
 0x23b   : > { %4898 = vst [vmem:[%s262_s27] sm:$0x1] %v4897_v1 }
 0x23c   : > { %v4967_v25 = vadd.f32 %v4966_v0, %v4965_v36 }
 0x23e   : > { %4968 = vst [vmem:[%s268_s30] sm:$0x1] %v4967_v25 }
 0x23f PF: > { %s15_s17 = sadd.s32 1, %s6244_s17   ;;  %s9192_s15 = smov %s6240_s16 }
 0x240   : > { %p12_p6 = scmp.ge.s32.totalorder %s15_s17, 4   ;;  %s9193_s16 = smov %s9195_s18 }
 0x242   :  { %14 = sbr.rel (!%p12_p6) target bundleno = 2 (0x2), region = 95 }

</bundles_post_ra>
